<compile_context>
chip_gen: v6e
topology: v6e:2x2x1
jax: 0.10.0
libtpu: 0.0.40
codegen_flags: <defaults>
</compile_context>

<pallas_src>
import functools

import jax
import jax.numpy as jnp
from jax import lax
from jax.experimental import pallas as pl
from jax.experimental.pallas import tpu as pltpu

HIDDEN = 768      # BERT hidden size hard-coded by the module (768 * 2 -> 300)
MLP_DIM = 300     # hidden dim of the ner_classifier MLP
_LANE = 128


def _round_up(x, m):
    return ((x + m - 1) // m) * m


def _entity_kernel(seq_ref, side_ref,
                   w1a_ref, w1b_ref, b1_ref, w2_ref, b2_ref, w3_ref, b3_ref,
                   logits_ref, emb_ref, loss_ref, *, nl_true):
    seq = seq_ref[...]                               # (Bb, L, H) f32
    side = side_ref[...]                             # (Bb, S, 4) i32
    Bb, L, H = seq.shape
    S = side.shape[1]
    R = Bb * S                                       # flattened span rows

    start = side[:, :, 0:1]                          # (Bb, S, 1) i32
    end = side[:, :, 1:2]
    mask = side[:, :, 2:3]
    label = side[:, :, 3:4]

    # --- span gather: ONE block-diagonal one-hot matmul on the MXU ----------
    b_off = lax.broadcasted_iota(jnp.int32, (Bb, S, 1), 0) * L
    start_g = (start + b_off).reshape(R, 1)          # global row in seq_flat
    end_g = (end + b_off).reshape(R, 1)
    idx = jnp.concatenate([start_g, end_g], axis=0)  # (2R, 1) rows: starts|ends
    col = lax.broadcasted_iota(jnp.int32, (2 * R, Bb * L), 1)
    oh = (col == idx).astype(jnp.float32)            # (2R, Bb*L) one-hot
    seq_flat = seq.reshape(Bb * L, H)
    emb_both = jnp.dot(oh, seq_flat, preferred_element_type=jnp.float32)  # (2R, H)
    s_emb = emb_both[:R]                             # (R, H)
    e_emb = emb_both[R:]                             # (R, H)

    # spans_embedding = cat(start, end): write halves directly (lane-aligned).
    emb_ref[:, :, :H] = s_emb.reshape(Bb, S, H).astype(emb_ref.dtype)
    emb_ref[:, :, H:] = e_emb.reshape(Bb, S, H).astype(emb_ref.dtype)

    # --- ner_classifier MLP (dropout = identity at inference) ---------------
    h1 = jnp.maximum(
        jnp.dot(s_emb, w1a_ref[...], preferred_element_type=jnp.float32)
        + jnp.dot(e_emb, w1b_ref[...], preferred_element_type=jnp.float32)
        + b1_ref[...], 0.0)
    h2 = jnp.maximum(
        jnp.dot(h1, w2_ref[...], preferred_element_type=jnp.float32)
        + b2_ref[...], 0.0)
    logits = jnp.dot(h2, w3_ref[...], preferred_element_type=jnp.float32) + b3_ref[...]
    nl_pad = logits.shape[-1]
    logits_ref[...] = logits.reshape(Bb, S, nl_pad).astype(logits_ref.dtype)

    # --- masked CrossEntropyLoss(reduction='sum'): per-step partial ---------
    cls = lax.broadcasted_iota(jnp.int32, (R, nl_pad), 1)
    valid_col = cls < nl_true                        # exclude padded label cols
    ml = jnp.where(valid_col, logits, jnp.float32(-1e30))
    m = jnp.max(ml, axis=-1, keepdims=True)
    lse = m + jnp.log(jnp.sum(jnp.exp(ml - m), axis=-1, keepdims=True))   # (R, 1)
    lbl = label.reshape(R, 1)
    picked = jnp.sum(jnp.where(cls == lbl, logits, 0.0), axis=-1, keepdims=True)
    active = (mask.reshape(R, 1) == 1).astype(jnp.float32)
    loss_ref[...] = jnp.sum(active * (lse - picked)).reshape(1, 1, 1)


def bert_for_entity_forward(sequence_output, spans, spans_mask, spans_ner_label,
                            params, *, batch_block=None):
    """Returns (loss, logits, spans_embedding), matching the PyTorch forward."""
    B, L, H = sequence_output.shape
    S = spans.shape[1]
    w1, b1, w2, b2, w3, b3 = params
    NL = w3.shape[1]
    MLP_PAD = _round_up(w1.shape[1], _LANE)          # 300 -> 384
    NL_PAD = _round_up(NL, _LANE)                    # 6   -> 128

    def pad2(w, rows, cols):
        return jnp.pad(w, ((0, rows - w.shape[0]), (0, cols - w.shape[1])))

    # Split W1 into start/end halves; zero-pad all widths to lane multiples.
    w1a = pad2(w1[:H], H, MLP_PAD)
    w1b = pad2(w1[H:], H, MLP_PAD)
    b1p = pad2(b1.reshape(1, -1), 1, MLP_PAD)
    w2p = pad2(w2, MLP_PAD, MLP_PAD)
    b2p = pad2(b2.reshape(1, -1), 1, MLP_PAD)
    w3p = pad2(w3, MLP_PAD, NL_PAD)
    b3p = pad2(b3.reshape(1, -1), 1, NL_PAD)

    # Pack [start, end, mask, label] -> one int32 side input (one DMA / step).
    side = jnp.stack(
        [spans[:, :, 0].astype(jnp.int32),
         spans[:, :, 1].astype(jnp.int32),
         spans_mask.astype(jnp.int32),
         spans_ner_label.astype(jnp.int32)], axis=-1)                 # (B, S, 4)

    if batch_block is None:
        batch_block = min(B, 8)
        while B % batch_block:
            batch_block -= 1
    assert B % batch_block == 0, "batch_block must divide the batch size"
    Bb = batch_block
    G = B // Bb

    out_shapes = (
        jax.ShapeDtypeStruct((B, S, NL_PAD), jnp.float32),     # padded logits
        jax.ShapeDtypeStruct((B, S, 2 * H), jnp.float32),      # spans_embedding
        jax.ShapeDtypeStruct((G, 1, 1), jnp.float32),          # per-step loss
    )

    grid_spec = pltpu.PrefetchScalarGridSpec(
        num_scalar_prefetch=0,
        grid=(G,),
        in_specs=[
            pl.BlockSpec((Bb, L, H), lambda g: (g, 0, 0)),       # sequence_output
            pl.BlockSpec((Bb, S, 4), lambda g: (g, 0, 0)),       # packed side ints
            pl.BlockSpec((H, MLP_PAD), lambda g: (0, 0)),        # W1 (start half)
            pl.BlockSpec((H, MLP_PAD), lambda g: (0, 0)),        # W1 (end half)
            pl.BlockSpec((1, MLP_PAD), lambda g: (0, 0)),        # b1
            pl.BlockSpec((MLP_PAD, MLP_PAD), lambda g: (0, 0)),  # W2
            pl.BlockSpec((1, MLP_PAD), lambda g: (0, 0)),        # b2
            pl.BlockSpec((MLP_PAD, NL_PAD), lambda g: (0, 0)),   # W3
            pl.BlockSpec((1, NL_PAD), lambda g: (0, 0)),         # b3
        ],
        out_specs=[
            pl.BlockSpec((Bb, S, NL_PAD), lambda g: (g, 0, 0)),
            pl.BlockSpec((Bb, S, 2 * H), lambda g: (g, 0, 0)),
            pl.BlockSpec((1, 1, 1), lambda g: (g, 0, 0)),
        ],
    )

    kernel = functools.partial(_entity_kernel, nl_true=NL)
    logits_pad, emb, loss_part = pl.pallas_call(
        kernel,
        out_shape=out_shapes,
        grid_spec=grid_spec,
        compiler_params=pltpu.CompilerParams(
            # Per-step partial loss (no resident accumulator) => batch axis can
            # be sharded across TensorCores (v7x megacore).
            dimension_semantics=("parallel",)),
    )(sequence_output, side, w1a, w1b, b1p, w2p, b2p, w3p, b3p)

    loss = jnp.sum(loss_part)
    return loss, logits_pad[:, :, :NL], emb


def _reference(sequence_output, spans, spans_mask, spans_ner_label, params):
    """Pure-JAX reference mirroring the PyTorch forward (eval mode)."""
    w1, b1, w2, b2, w3, b3 = params
    B = sequence_output.shape[0]
    bidx = jnp.arange(B)[:, None]
    start_emb = sequence_output[bidx, spans[:, :, 0], :]
    end_emb = sequence_output[bidx, spans[:, :, 1], :]
    emb = jnp.concatenate([start_emb, end_emb], axis=-1)
    h1 = jax.nn.relu(emb @ w1 + b1)
    h2 = jax.nn.relu(h1 @ w2 + b2)
    logits = h2 @ w3 + b3
    logp = jax.nn.log_softmax(logits, axis=-1)
    picked = jnp.take_along_axis(logp, spans_ner_label[:, :, None], axis=-1)[..., 0]
    loss = jnp.sum(jnp.where(spans_mask == 1, -picked, 0.0))
    return loss, logits, emb


if __name__ == "__main__":
    B, L, S = 2, 32, 8          # batch, seq length, number of candidate spans
    H = HIDDEN                  # 768 (module hard-codes 768*2 classifier input)
    NUM_NER_LABELS = 6

    key = jax.random.PRNGKey(0)
    k_seq, k_sp, k_lbl, k_w1, k_b1, k_w2, k_b2, k_w3, k_b3 = jax.random.split(key, 9)

    # VisualEncoder output stand-in (see TODO above).
    sequence_output = jax.random.normal(k_seq, (B, L, H), dtype=jnp.float32)

    spans = jax.random.randint(k_sp, (B, S, 2), 0, L, dtype=jnp.int32)
    spans_mask = jnp.tile(
        jnp.array([1, 1, 1, 1, 1, 1, 0, 0], dtype=jnp.int32)[None, :], (B, 1))
    spans_ner_label = jax.random.randint(k_lbl, (B, S), 0, NUM_NER_LABELS,
                                         dtype=jnp.int32)

    # Deterministic classifier parameters (Sequential: 1536->300->300->NL).
    params = (
        0.02 * jax.random.normal(k_w1, (2 * H, MLP_DIM), dtype=jnp.float32),
        0.02 * jax.random.normal(k_b1, (MLP_DIM,), dtype=jnp.float32),
        0.02 * jax.random.normal(k_w2, (MLP_DIM, MLP_DIM), dtype=jnp.float32),
        0.02 * jax.random.normal(k_b2, (MLP_DIM,), dtype=jnp.float32),
        0.02 * jax.random.normal(k_w3, (MLP_DIM, NUM_NER_LABELS), dtype=jnp.float32),
        0.02 * jax.random.normal(k_b3, (NUM_NER_LABELS,), dtype=jnp.float32),
    )

    loss, logits, spans_embedding = bert_for_entity_forward(
        sequence_output, spans, spans_mask, spans_ner_label, params)
    jax.block_until_ready((loss, logits, spans_embedding))

    ref_loss, ref_logits, ref_emb = _reference(
        sequence_output, spans, spans_mask, spans_ner_label, params)
    assert jnp.allclose(spans_embedding, ref_emb, atol=1e-4, rtol=1e-4)
    assert jnp.allclose(logits, ref_logits, atol=1e-4, rtol=1e-4)
    assert jnp.allclose(loss, ref_loss, atol=1e-3, rtol=1e-4)

    print("KERNEL_OK")
</pallas_src>

<mosaic_0001>
module attributes {stable_mosaic.version = 11 : i64} {
  func.func @_entity_kernel(%arg0: i32, %arg1: memref<2x32x768xf32, #tpu.memory_space<vmem>>, %arg2: memref<2x8x4xi32, #tpu.memory_space<vmem>>, %arg3: memref<768x384xf32, #tpu.memory_space<vmem>>, %arg4: memref<768x384xf32, #tpu.memory_space<vmem>>, %arg5: memref<1x384xf32, #tpu.memory_space<vmem>>, %arg6: memref<384x384xf32, #tpu.memory_space<vmem>>, %arg7: memref<1x384xf32, #tpu.memory_space<vmem>>, %arg8: memref<384x128xf32, #tpu.memory_space<vmem>>, %arg9: memref<1x128xf32, #tpu.memory_space<vmem>>, %arg10: memref<2x8x128xf32, #tpu.memory_space<vmem>>, %arg11: memref<2x8x1536xf32, #tpu.memory_space<vmem>>, %arg12: memref<1x1x1xf32, #tpu.memory_space<vmem>>) attributes {dimension_semantics = [#tpu.dimension_semantics<parallel>], iteration_bounds = array<i64: 1>, scalar_prefetch = 0 : i64, scratch_operands = 0 : i64, tpu.core_type = #tpu.core_type<tc>, window_params = [{transform_indices = @transform_0, window_bounds = array<i64: 2, 32, 768>}, {transform_indices = @transform_1, window_bounds = array<i64: 2, 8, 4>}, {pipeline_mode = #tpu.pipeline_mode<synchronous>, transform_indices = @transform_2, window_bounds = array<i64: 768, 384>}, {pipeline_mode = #tpu.pipeline_mode<synchronous>, transform_indices = @transform_3, window_bounds = array<i64: 768, 384>}, {pipeline_mode = #tpu.pipeline_mode<synchronous>, transform_indices = @transform_4, window_bounds = array<i64: 1, 384>}, {pipeline_mode = #tpu.pipeline_mode<synchronous>, transform_indices = @transform_5, window_bounds = array<i64: 384, 384>}, {pipeline_mode = #tpu.pipeline_mode<synchronous>, transform_indices = @transform_6, window_bounds = array<i64: 1, 384>}, {pipeline_mode = #tpu.pipeline_mode<synchronous>, transform_indices = @transform_7, window_bounds = array<i64: 384, 128>}, {pipeline_mode = #tpu.pipeline_mode<synchronous>, transform_indices = @transform_8, window_bounds = array<i64: 1, 128>}, {transform_indices = @transform_9, window_bounds = array<i64: 2, 8, 128>}, {transform_indices = @transform_10, window_bounds = array<i64: 2, 8, 1536>}, {transform_indices = @transform_11, window_bounds = array<i64: 1, 1, 1>}]} {
    %c0 = arith.constant 0 : index
    %c0_0 = arith.constant 0 : index
    %c0_1 = arith.constant 0 : index
    %0 = vector.load %arg1[%c0, %c0_0, %c0_1] : memref<2x32x768xf32, #tpu.memory_space<vmem>>, vector<2x32x768xf32>
    %c0_2 = arith.constant 0 : index
    %c0_3 = arith.constant 0 : index
    %c0_4 = arith.constant 0 : index
    %1 = vector.load %arg2[%c0_2, %c0_3, %c0_4] : memref<2x8x4xi32, #tpu.memory_space<vmem>>, vector<2x8x4xi32>
    %2 = vector.extract_strided_slice %1 {offsets = [0, 0, 0], sizes = [2, 8, 1], strides = [1, 1, 1]} : vector<2x8x4xi32> to vector<2x8x1xi32>
    %3 = vector.extract_strided_slice %1 {offsets = [0, 0, 1], sizes = [2, 8, 1], strides = [1, 1, 1]} : vector<2x8x4xi32> to vector<2x8x1xi32>
    %4 = vector.extract_strided_slice %1 {offsets = [0, 0, 2], sizes = [2, 8, 1], strides = [1, 1, 1]} : vector<2x8x4xi32> to vector<2x8x1xi32>
    %5 = vector.extract_strided_slice %1 {offsets = [0, 0, 3], sizes = [2, 8, 1], strides = [1, 1, 1]} : vector<2x8x4xi32> to vector<2x8x1xi32>
    %6 = tpu.iota {dimensions = array<i32: 0>} : vector<2x8x1xi32>
    %c32_i32 = arith.constant 32 : i32
    %7 = vector.broadcast %c32_i32 : i32 to vector<2x8x1xi32>
    %8 = arith.muli %6, %7 : vector<2x8x1xi32>
    %9 = arith.addi %2, %8 : vector<2x8x1xi32>
    %10 = vector.shape_cast %9 : vector<2x8x1xi32> to vector<16x1xi32>
    %11 = arith.addi %3, %8 : vector<2x8x1xi32>
    %12 = vector.shape_cast %11 : vector<2x8x1xi32> to vector<16x1xi32>
    %13 = tpu.concatenate %10, %12 in 0 : vector<16x1xi32>, vector<16x1xi32> -> vector<32x1xi32>
    %14 = tpu.iota {dimensions = array<i32: 1>} : vector<32x64xi32>
    %15 = vector.broadcast %13 : vector<32x1xi32> to vector<32x64xi32>
    %16 = arith.cmpi eq, %14, %15 : vector<32x64xi32>
    %17 = arith.extui %16 : vector<32x64xi1> to vector<32x64xi32>
    %18 = arith.sitofp %17 : vector<32x64xi32> to vector<32x64xf32>
    %19 = vector.shape_cast %0 : vector<2x32x768xf32> to vector<64x768xf32>
    %cst = arith.constant dense<0.000000e+00> : vector<32x768xf32>
    %20 = tpu.matmul %18, %19, %cst {dimension_numbers = #tpu.dot_dimension_numbers<[1], [0], [0], [1], [0, 0, 1, 1], [], []>} : vector<32x64xf32>, vector<64x768xf32>, vector<32x768xf32> -> vector<32x768xf32>
    %21 = vector.extract_strided_slice %20 {offsets = [0, 0], sizes = [16, 768], strides = [1, 1]} : vector<32x768xf32> to vector<16x768xf32>
    %22 = vector.extract_strided_slice %20 {offsets = [16, 0], sizes = [16, 768], strides = [1, 1]} : vector<32x768xf32> to vector<16x768xf32>
    %23 = vector.shape_cast %21 : vector<16x768xf32> to vector<2x8x768xf32>
    %c0_5 = arith.constant 0 : index
    %c0_6 = arith.constant 0 : index
    %c0_7 = arith.constant 0 : index
    %24 = vector.load %arg11[%c0_5, %c0_6, %c0_7] : memref<2x8x1536xf32, #tpu.memory_space<vmem>>, vector<2x8x768xf32>
    tpu.vector_store %arg11[%c0_5, %c0_6, %c0_7], %23 {strides = array<i32>} : memref<2x8x1536xf32, #tpu.memory_space<vmem>>, vector<2x8x768xf32>,
    %25 = vector.shape_cast %22 : vector<16x768xf32> to vector<2x8x768xf32>
    %c0_8 = arith.constant 0 : index
    %c0_9 = arith.constant 0 : index
    %c768 = arith.constant 768 : index
    %26 = vector.load %arg11[%c0_8, %c0_9, %c768] : memref<2x8x1536xf32, #tpu.memory_space<vmem>>, vector<2x8x768xf32>
    tpu.vector_store %arg11[%c0_8, %c0_9, %c768], %25 {strides = array<i32>} : memref<2x8x1536xf32, #tpu.memory_space<vmem>>, vector<2x8x768xf32>,
    %c0_10 = arith.constant 0 : index
    %c0_11 = arith.constant 0 : index
    %27 = vector.load %arg3[%c0_10, %c0_11] : memref<768x384xf32, #tpu.memory_space<vmem>>, vector<768x384xf32>
    %cst_12 = arith.constant dense<0.000000e+00> : vector<16x384xf32>
    %28 = tpu.matmul %21, %27, %cst_12 {dimension_numbers = #tpu.dot_dimension_numbers<[1], [0], [0], [1], [0, 0, 1, 1], [], []>} : vector<16x768xf32>, vector<768x384xf32>, vector<16x384xf32> -> vector<16x384xf32>
    %c0_13 = arith.constant 0 : index
    %c0_14 = arith.constant 0 : index
    %29 = vector.load %arg4[%c0_13, %c0_14] : memref<768x384xf32, #tpu.memory_space<vmem>>, vector<768x384xf32>
    %cst_15 = arith.constant dense<0.000000e+00> : vector<16x384xf32>
    %30 = tpu.matmul %22, %29, %cst_15 {dimension_numbers = #tpu.dot_dimension_numbers<[1], [0], [0], [1], [0, 0, 1, 1], [], []>} : vector<16x768xf32>, vector<768x384xf32>, vector<16x384xf32> -> vector<16x384xf32>
    %31 = arith.addf %28, %30 : vector<16x384xf32>
    %c0_16 = arith.constant 0 : index
    %c0_17 = arith.constant 0 : index
    %32 = vector.load %arg5[%c0_16, %c0_17] : memref<1x384xf32, #tpu.memory_space<vmem>>, vector<1x384xf32>
    %33 = vector.broadcast %32 : vector<1x384xf32> to vector<16x384xf32>
    %34 = arith.addf %31, %33 : vector<16x384xf32>
    %cst_18 = arith.constant 0.000000e+00 : f32
    %35 = vector.broadcast %cst_18 : f32 to vector<16x384xf32>
    %36 = arith.maximumf %34, %35 : vector<16x384xf32>
    %c0_19 = arith.constant 0 : index
    %c0_20 = arith.constant 0 : index
    %37 = vector.load %arg6[%c0_19, %c0_20] : memref<384x384xf32, #tpu.memory_space<vmem>>, vector<384x384xf32>
    %cst_21 = arith.constant dense<0.000000e+00> : vector<16x384xf32>
    %38 = tpu.matmul %36, %37, %cst_21 {dimension_numbers = #tpu.dot_dimension_numbers<[1], [0], [0], [1], [0, 0, 1, 1], [], []>} : vector<16x384xf32>, vector<384x384xf32>, vector<16x384xf32> -> vector<16x384xf32>
    %c0_22 = arith.constant 0 : index
    %c0_23 = arith.constant 0 : index
    %39 = vector.load %arg7[%c0_22, %c0_23] : memref<1x384xf32, #tpu.memory_space<vmem>>, vector<1x384xf32>
    %40 = vector.broadcast %39 : vector<1x384xf32> to vector<16x384xf32>
    %41 = arith.addf %38, %40 : vector<16x384xf32>
    %cst_24 = arith.constant 0.000000e+00 : f32
    %42 = vector.broadcast %cst_24 : f32 to vector<16x384xf32>
    %43 = arith.maximumf %41, %42 : vector<16x384xf32>
    %c0_25 = arith.constant 0 : index
    %c0_26 = arith.constant 0 : index
    %44 = vector.load %arg8[%c0_25, %c0_26] : memref<384x128xf32, #tpu.memory_space<vmem>>, vector<384x128xf32>
    %cst_27 = arith.constant dense<0.000000e+00> : vector<16x128xf32>
    %45 = tpu.matmul %43, %44, %cst_27 {dimension_numbers = #tpu.dot_dimension_numbers<[1], [0], [0], [1], [0, 0, 1, 1], [], []>} : vector<16x384xf32>, vector<384x128xf32>, vector<16x128xf32> -> vector<16x128xf32>
    %c0_28 = arith.constant 0 : index
    %c0_29 = arith.constant 0 : index
    %46 = vector.load %arg9[%c0_28, %c0_29] : memref<1x128xf32, #tpu.memory_space<vmem>>, vector<1x128xf32>
    %47 = vector.broadcast %46 : vector<1x128xf32> to vector<16x128xf32>
    %48 = arith.addf %45, %47 : vector<16x128xf32>
    %49 = vector.shape_cast %48 : vector<16x128xf32> to vector<2x8x128xf32>
    %c0_30 = arith.constant 0 : index
    %c0_31 = arith.constant 0 : index
    %c0_32 = arith.constant 0 : index
    %50 = vector.load %arg10[%c0_30, %c0_31, %c0_32] : memref<2x8x128xf32, #tpu.memory_space<vmem>>, vector<2x8x128xf32>
    tpu.vector_store %arg10[%c0_30, %c0_31, %c0_32], %49 {strides = array<i32>} : memref<2x8x128xf32, #tpu.memory_space<vmem>>, vector<2x8x128xf32>,
    %51 = tpu.iota {dimensions = array<i32: 1>} : vector<16x128xi32>
    %c6_i32 = arith.constant 6 : i32
    %52 = vector.broadcast %c6_i32 : i32 to vector<16x128xi32>
    %53 = arith.cmpi slt, %51, %52 : vector<16x128xi32>
    %cst_33 = arith.constant -1.000000e+30 : f32
    %54 = vector.broadcast %cst_33 : f32 to vector<16x128xf32>
    %55 = arith.select %53, %48, %54 : vector<16x128xi1>, vector<16x128xf32>
    %cst_34 = arith.constant dense<0xFF800000> : vector<16xf32>
    %56 = vector.multi_reduction <maximumf>, %55, %cst_34 [1] : vector<16x128xf32> to vector<16xf32>
    %57 = vector.shape_cast %56 : vector<16xf32> to vector<16x1xf32>
    %58 = vector.broadcast %57 : vector<16x1xf32> to vector<16x128xf32>
    %59 = arith.subf %55, %58 : vector<16x128xf32>
    %60 = math.exp %59 : vector<16x128xf32>
    %cst_35 = arith.constant dense<0.000000e+00> : vector<16xf32>
    %61 = vector.multi_reduction <add>, %60, %cst_35 [1] : vector<16x128xf32> to vector<16xf32>
    %62 = vector.shape_cast %61 : vector<16xf32> to vector<16x1xf32>
    %63 = math.log %62 : vector<16x1xf32>
    %64 = arith.addf %57, %63 : vector<16x1xf32>
    %65 = vector.shape_cast %5 : vector<2x8x1xi32> to vector<16x1xi32>
    %66 = vector.broadcast %65 : vector<16x1xi32> to vector<16x128xi32>
    %67 = arith.cmpi eq, %51, %66 : vector<16x128xi32>
    %cst_36 = arith.constant 0.000000e+00 : f32
    %68 = vector.broadcast %cst_36 : f32 to vector<16x128xf32>
    %69 = arith.select %67, %48, %68 : vector<16x128xi1>, vector<16x128xf32>
    %cst_37 = arith.constant dense<0.000000e+00> : vector<16xf32>
    %70 = vector.multi_reduction <add>, %69, %cst_37 [1] : vector<16x128xf32> to vector<16xf32>
    %71 = vector.shape_cast %70 : vector<16xf32> to vector<16x1xf32>
    %72 = vector.shape_cast %4 : vector<2x8x1xi32> to vector<16x1xi32>
    %c1_i32 = arith.constant 1 : i32
    %73 = vector.broadcast %c1_i32 : i32 to vector<16x1xi32>
    %74 = arith.cmpi eq, %72, %73 : vector<16x1xi32>
    %75 = arith.extui %74 : vector<16x1xi1> to vector<16x1xi32>
    %76 = arith.sitofp %75 : vector<16x1xi32> to vector<16x1xf32>
    %77 = arith.subf %64, %71 : vector<16x1xf32>
    %78 = arith.mulf %76, %77 : vector<16x1xf32>
    %79 = vector.shape_cast %78 : vector<16x1xf32> to vector<1x16x1xf32>
    %cst_38 = arith.constant dense<0.000000e+00> : vector<1xf32>
    %80 = vector.multi_reduction <add>, %79, %cst_38 [1, 2] : vector<1x16x1xf32> to vector<1xf32>
    %81 = vector.shape_cast %80 : vector<1xf32> to vector<1x1x1xf32>
    %82 = vector.extract %81[0, 0, 0] : f32 from vector<1x1x1xf32>
    %83 = vector.broadcast %82 : f32 to vector<1x1x1xf32>
    %c0_39 = arith.constant 0 : index
    %c0_40 = arith.constant 0 : index
    %c0_41 = arith.constant 0 : index
    %84 = vector.load %arg12[%c0_39, %c0_40, %c0_41] : memref<1x1x1xf32, #tpu.memory_space<vmem>>, vector<1x1x1xf32>
    tpu.vector_store %arg12[%c0_39, %c0_40, %c0_41], %83 {strides = array<i32>} : memref<1x1x1xf32, #tpu.memory_space<vmem>>, vector<1x1x1xf32>,
    return
  }
  func.func @transform_0(%arg0: i32) -> (i32, i32, i32) {
    %c0_i32 = arith.constant 0 : i32
    %c0_i32_0 = arith.constant 0 : i32
    %c0_i32_1 = arith.constant 0 : i32
    return %arg0, %c0_i32, %c0_i32_0 : i32, i32, i32
  }
  func.func @transform_1(%arg0: i32) -> (i32, i32, i32) {
    %c0_i32 = arith.constant 0 : i32
    %c0_i32_0 = arith.constant 0 : i32
    %c0_i32_1 = arith.constant 0 : i32
    return %arg0, %c0_i32, %c0_i32_0 : i32, i32, i32
  }
  func.func @transform_2(%arg0: i32) -> (i32, i32) {
    %c0_i32 = arith.constant 0 : i32
    %c0_i32_0 = arith.constant 0 : i32
    %c0_i32_1 = arith.constant 0 : i32
    return %c0_i32, %c0_i32_0 : i32, i32
  }
  func.func @transform_3(%arg0: i32) -> (i32, i32) {
    %c0_i32 = arith.constant 0 : i32
    %c0_i32_0 = arith.constant 0 : i32
    %c0_i32_1 = arith.constant 0 : i32
    return %c0_i32, %c0_i32_0 : i32, i32
  }
  func.func @transform_4(%arg0: i32) -> (i32, i32) {
    %c0_i32 = arith.constant 0 : i32
    %c0_i32_0 = arith.constant 0 : i32
    %c0_i32_1 = arith.constant 0 : i32
    return %c0_i32, %c0_i32_0 : i32, i32
  }
  func.func @transform_5(%arg0: i32) -> (i32, i32) {
    %c0_i32 = arith.constant 0 : i32
    %c0_i32_0 = arith.constant 0 : i32
    %c0_i32_1 = arith.constant 0 : i32
    return %c0_i32, %c0_i32_0 : i32, i32
  }
  func.func @transform_6(%arg0: i32) -> (i32, i32) {
    %c0_i32 = arith.constant 0 : i32
    %c0_i32_0 = arith.constant 0 : i32
    %c0_i32_1 = arith.constant 0 : i32
    return %c0_i32, %c0_i32_0 : i32, i32
  }
  func.func @transform_7(%arg0: i32) -> (i32, i32) {
    %c0_i32 = arith.constant 0 : i32
    %c0_i32_0 = arith.constant 0 : i32
    %c0_i32_1 = arith.constant 0 : i32
    return %c0_i32, %c0_i32_0 : i32, i32
  }
  func.func @transform_8(%arg0: i32) -> (i32, i32) {
    %c0_i32 = arith.constant 0 : i32
    %c0_i32_0 = arith.constant 0 : i32
    %c0_i32_1 = arith.constant 0 : i32
    return %c0_i32, %c0_i32_0 : i32, i32
  }
  func.func @transform_9(%arg0: i32) -> (i32, i32, i32) {
    %c0_i32 = arith.constant 0 : i32
    %c0_i32_0 = arith.constant 0 : i32
    %c0_i32_1 = arith.constant 0 : i32
    return %arg0, %c0_i32, %c0_i32_0 : i32, i32, i32
  }
  func.func @transform_10(%arg0: i32) -> (i32, i32, i32) {
    %c0_i32 = arith.constant 0 : i32
    %c0_i32_0 = arith.constant 0 : i32
    %c0_i32_1 = arith.constant 0 : i32
    return %arg0, %c0_i32, %c0_i32_0 : i32, i32, i32
  }
  func.func @transform_11(%arg0: i32) -> (i32, i32, i32) {
    %c0_i32 = arith.constant 0 : i32
    %c0_i32_0 = arith.constant 0 : i32
    %c0_i32_1 = arith.constant 0 : i32
    return %arg0, %c0_i32, %c0_i32_0 : i32, i32, i32
  }
}

</mosaic_0001>

<bundles_post_ra>
// kernel: tpu_custom_call.1
= control target key start
LH: loop header
LB: loop body
LE: loop exit
PB: predicated region body
PF: predicated region fallthrough
CT: control target
= control target key end

     0   :  { %17 = vsyncpa [#allocation3], 0  ;;  %s3946_s0 = inlined_call_operand.hbm [shape: f32[2,32,768], index: 0, kind: input, shape index: {}]   ;;  %s3947_s1 = inlined_call_operand.vmem [shape: s32[2,8,4], index: 1, kind: input, shape index: {}]   ;;  %s3948_s2 = inlined_call_operand.hbm [shape: f32[768,384], index: 2, kind: input, shape index: {}]   ;;  %s3949_s3 = inlined_call_operand.hbm [shape: f32[768,384], index: 3, kind: input, shape index: {}]   ;;  %s3950_s4 = inlined_call_operand.hbm [shape: f32[1,384], index: 4, kind: input, shape index: {}]   ;;  %s3951_s5 = inlined_call_operand.hbm [shape: f32[384,384], index: 5, kind: input, shape index: {}]   ;;  %s3952_s6 = inlined_call_operand.hbm [shape: f32[1,384], index: 6, kind: input, shape index: {}]   ;;  %s3953_s7 = inlined_call_operand.hbm [shape: f32[384,128], index: 7, kind: input, shape index: {}]   ;;  %s3954_s8 = inlined_call_operand.hbm [shape: f32[1,128], index: 8, kind: input, shape index: {}]   ;;  %s3955_s9 = inlined_call_operand.hbm [shape: f32[2,8,128], index: 9, kind: output, shape index: {0}]   ;;  %s3956_s10 = inlined_call_operand.hbm [shape: f32[2,8,1536], index: 10, kind: output, shape index: {1}]   ;;  %s3957_s11 = inlined_call_operand.hbm [shape: f32[1,1,1], index: 11, kind: output, shape index: {2}]  }
   0x1   :  { %18 = vsyncpa [#allocation6], 0 }
   0x2   :  { %19 = vsyncpa [#allocation9], 0 }
   0x3   :  { %20 = vsyncpa [#allocation12], 0 }
   0x4   :  { %21 = vsyncpa [#allocation15], 0 }
   0x5   :  { %22 = vsyncpa [#allocation4], 0 }
   0x6   :  { %23 = vsyncpa [#allocation18], 0  ;;  %s3556_s17 = smov [#allocation5]  }
   0x7   :  { %s43_s18 = sshll.u32 %s3556_s17, 4  ;;  %s44_s18 = int_to_ptr.vmem [resolvable:$true] %s43_s18 }
   0x8   :  { %s3330_s19 = scalar_lea.vmem %s44_s18, 36864  ;;  %p3335_p1 = scmp.lt.s32.totalorder %s44_s18, %s44_s18 }
   0x9   :  { %p3331_p0 = scmp.ne.s32.totalorder %s44_s18, %s3330_s19  ;;  %p3336_p2 = scmp.lt.s32.totalorder %s3330_s19, %s3330_s19 }
   0xb   :  { %p3337_p3 = por %p3336_p2, %p3335_p1 }
   0xd   :  { %p3338_p4 = pnand %p3337_p3, %p3331_p0 }
   0xf   :  { %3341 = shalt.err (!%p3338_p4)
}
  0x10   :  { %s3557_s20 = smov 384   ;;  %s3558_s21 = smov 24  }
  0x11   :  { %49 = dma.hbm_to_vmem [thread:$0]  %s3948_s2, 36864, %s44_s18, [#allocation6], %s3557_s20, %s3557_s20, %s3558_s21  }
  0x12   :  { %s3559_s24 = smov [#allocation8]   ;;  %s3560_s26 = smov [#allocation11]  }
  0x13   :  { %s68_s25 = sshll.u32 %s3559_s24, 4  ;;  %s90_s27 = sshll.u32 %s3560_s26, 4  ;;  %s69_s25 = int_to_ptr.vmem [resolvable:$true] %s68_s25  ;;  %s91_s27 = int_to_ptr.vmem [resolvable:$true] %s90_s27 }
  0x14   :  { %s3350_s28 = scalar_lea.vmem %s69_s25, 48  ;;  %s3354_s29 = scalar_lea.vmem %s69_s25, 64 }
  0x15   :  { %p3351_p5 = scmp.ne.s32.totalorder %s69_s25, %s3350_s28  ;;  %p3355_p6 = scmp.lt.s32.totalorder %s69_s25, %s69_s25 }
  0x16   :  { %p3356_p7 = scmp.lt.s32.totalorder %s3354_s29, %s3350_s28 }
  0x18   :  { %p3357_p8 = por %p3356_p7, %p3355_p6 }
  0x1a   :  { %p3358_p9 = pnand %p3357_p8, %p3351_p5 }
  0x1c   :  { %3361 = shalt.err (!%p3358_p9)
}
  0x1d   :  { %71 = dma.hbm_to_vmem [thread:$0]  %s3950_s4, 48, %s69_s25, [#allocation9]  }
  0x1e   :  { %s3370_s13 = scalar_lea.vmem %s91_s27, 48  ;;  %s3374_s2 = scalar_lea.vmem %s91_s27, 64 }
  0x1f   :  { %p3371_p10 = scmp.ne.s32.totalorder %s91_s27, %s3370_s13  ;;  %p3375_p11 = scmp.lt.s32.totalorder %s91_s27, %s91_s27 }
  0x20   :  { %p3376_p12 = scmp.lt.s32.totalorder %s3374_s2, %s3370_s13 }
  0x22   :  { %p3377_p13 = por %p3376_p12, %p3375_p11 }
  0x24   :  { %p3378_p0 = pnand %p3377_p13, %p3371_p10 }
  0x26   :  { %3381 = shalt.err (!%p3378_p0)
}
  0x27   :  { %93 = dma.hbm_to_vmem [thread:$0]  %s3952_s6, 48, %s91_s27, [#allocation12]  }
  0x28   :  { %s3561_s16 = smov [#allocation2]  }
  0x29   :  { %s29_s17 = sshll.u32 %s3561_s16, 4  ;;  %s30_s17 = int_to_ptr.vmem [resolvable:$true] %s29_s17 }
  0x2a   :  { %s3390_s18 = scalar_lea.vmem %s30_s17, 6144  ;;  %p3395_p2 = scmp.lt.s32.totalorder %s30_s17, %s30_s17 }
  0x2b   :  { %p3391_p1 = scmp.ne.s32.totalorder %s30_s17, %s3390_s18  ;;  %p3396_p3 = scmp.lt.s32.totalorder %s3390_s18, %s3390_s18 }
  0x2d   :  { %p3397_p4 = por %p3396_p3, %p3395_p2 }
  0x2f   :  { %p3398_p5 = pnand %p3397_p4, %p3391_p1 }
  0x31   :  { %3401 = shalt.err (!%p3398_p5)
}
  0x32   :  { %s3562_s4 = smov 768   ;;  %s3563_s19 = smov 48  }
  0x33   :  { %35 = dma.hbm_to_vmem [thread:$0]  %s3946_s0, 6144, %s30_s17, [#allocation3], %s3562_s4, %s3562_s4, %s3563_s19  }
  0x34   :  { %s3564_s24 = smov [#allocation7]   ;;  %s3565_s26 = smov [#allocation10]  }
  0x35   :  { %s55_s25 = sshll.u32 %s3564_s24, 4  ;;  %s77_s6 = sshll.u32 %s3565_s26, 4  ;;  %s56_s25 = int_to_ptr.vmem [resolvable:$true] %s55_s25  ;;  %s78_s6 = int_to_ptr.vmem [resolvable:$true] %s77_s6 }
  0x36   :  { %s3410_s27 = scalar_lea.vmem %s56_s25, 36864  ;;  %p3415_p7 = scmp.lt.s32.totalorder %s56_s25, %s56_s25 }
  0x37   :  { %p3411_p6 = scmp.ne.s32.totalorder %s56_s25, %s3410_s27  ;;  %p3416_p8 = scmp.lt.s32.totalorder %s3410_s27, %s3410_s27 }
  0x39   :  { %p3417_p9 = por %p3416_p8, %p3415_p7 }
  0x3b   :  { %p3418_p10 = pnand %p3417_p9, %p3411_p6 }
  0x3d   :  { %3421 = shalt.err (!%p3418_p10)
}
  0x3e   :  { %61 = dma.hbm_to_vmem [thread:$0]  %s3949_s3, 36864, %s56_s25, [#allocation6], %s3557_s20, %s3557_s20, %s3558_s21  }
  0x3f   :  { %s3430_s0 = scalar_lea.vmem %s78_s6, 18432  ;;  %p3435_p12 = scmp.lt.s32.totalorder %s78_s6, %s78_s6 }
  0x40   :  { %p3431_p11 = scmp.ne.s32.totalorder %s78_s6, %s3430_s0  ;;  %p3436_p13 = scmp.lt.s32.totalorder %s3430_s0, %s3430_s0 }
  0x42   :  { %p3437_p0 = por %p3436_p13, %p3435_p12 }
  0x44   :  { %p3438_p1 = pnand %p3437_p0, %p3431_p11 }
  0x46   :  { %3441 = shalt.err (!%p3438_p1)
}
  0x47   :  { %83 = dma.hbm_to_vmem [thread:$0]  %s3951_s5, 18432, %s78_s6, [#allocation9], %s3557_s20, %s3557_s20, %s3558_s21  }
  0x48   :  { %s3566_s13 = smov [#allocation13]  }
  0x49   :  { %s99_s2 = sshll.u32 %s3566_s13, 4  ;;  %s100_s2 = int_to_ptr.vmem [resolvable:$true] %s99_s2 }
  0x4a   :  { %s3450_s14 = scalar_lea.vmem %s100_s2, 6144  ;;  %p3455_p3 = scmp.lt.s32.totalorder %s100_s2, %s100_s2 }
  0x4b   :  { %p3451_p2 = scmp.ne.s32.totalorder %s100_s2, %s3450_s14  ;;  %p3456_p4 = scmp.lt.s32.totalorder %s3450_s14, %s3450_s14 }
  0x4d   :  { %p3457_p5 = por %p3456_p4, %p3455_p3 }
  0x4f   :  { %p3458_p6 = pnand %p3457_p5, %p3451_p2 }
  0x51   :  { %3461 = shalt.err (!%p3458_p6)
}
  0x52   :  { %s3567_s3 = smov 128   ;;  %s3568_s15 = smov 8  }
  0x53   :  { %105 = dma.hbm_to_vmem [thread:$0]  %s3953_s7, 6144, %s100_s2, [#allocation12], %s3567_s3, %s3567_s3, %s3568_s15  }
  0x54   :  { %s3569_s5 = smov [#allocation14]  }
  0x55   :  { %s112_s20 = sshll.u32 %s3569_s5, 4  ;;  %s113_s20 = int_to_ptr.vmem [resolvable:$true] %s112_s20 }
  0x56   :  { %s3470_s21 = scalar_lea.vmem %s113_s20, 16  ;;  %s3474_s18 = scalar_lea.vmem %s113_s20, 32 }
  0x57   :  { %p3471_p7 = scmp.ne.s32.totalorder %s113_s20, %s3470_s21  ;;  %p3475_p8 = scmp.lt.s32.totalorder %s113_s20, %s113_s20 }
  0x58   :  { %p3476_p9 = scmp.lt.s32.totalorder %s3474_s18, %s3470_s21 }
  0x5a   :  { %p3477_p10 = por %p3476_p9, %p3475_p8 }
  0x5c   :  { %p3478_p11 = pnand %p3477_p10, %p3471_p7 }
  0x5e   :  { %3481 = shalt.err (!%p3478_p11)
}
  0x5f   :  { %115 = dma.hbm_to_vmem [thread:$0]  %s3954_s8, 16, %s113_s20, [#allocation15]  }
  0x60   :  { %3542 = dma.done.wait [#allocation3], 6144  }
  0x61   :  { %3543 = vsyncadd [#allocation3], 4294961152 }
  0x62   :  { %3544 = dma.done.wait [#allocation6], 73728  }
  0x63   :  { %3545 = vsyncadd [#allocation6], 4294893568 }
  0x64   :  { %3546 = dma.done.wait [#allocation9], 18480  }
  0x65   :  { %3547 = vsyncadd [#allocation9], 4294948816 }
  0x66   :  { %3548 = dma.done.wait [#allocation12], 6192  }
  0x67   :  { %3549 = vsyncadd [#allocation12], 4294961104 }
  0x68   :  { %3550 = dma.done.wait [#allocation15], 16  }
  0x69   :  { %3551 = vsyncadd [#allocation15], 4294967280  ;;  %v3570_v0 = vmov 0   ;;  %v3571_v1 = vmov 0.0   ;;  %v188_v2 = vld [vmem:[%s3947_s1] sm:$0xff]  ;;  %v189_v3 = vld [vmem:[%s3947_s1 + $0x8] sm:$0xff]  ;;  %v195_v39 = vlaneseq }
  0x6a   :  { %3296 = vset.pattern.permute.xlu1 %v3570_v0  ;;  %3297 = vset.pattern.permute.xlu0 %v3570_v0  ;;  %v183_v4 = vld [vmem:[#allocation2 + $0x158] sm:$0xff]  ;;  %s3572_s24 = smov 127   ;;  %v190_v5 = vadd.s32 32, %v189_v3  ;;  %v185_v6 = vld [vmem:[#allocation2 + $0x168] sm:$0xff]  ;;  %v182_v7 = vld [vmem:[#allocation2 + $0x150] sm:$0xff]  ;;  %vm221_vm0 = vcmask 523264  }
  0x6b   :  { %298 = vmatprep.mubr.f32.mxu0 %v3571_v1  ;;  %387 = vmatprep.mubr.f32.mxu1 %v3571_v1  ;;  %v184_v8 = vld [vmem:[#allocation2 + $0x160] sm:$0xff]  ;;  %v177_v9 = vld [vmem:[#allocation2 + $0x128] sm:$0xff]  ;;  %v179_v10 = vld [vmem:[#allocation2 + $0x138] sm:$0xff]  ;;  %v3685_v41 = vand.u32 127, %v195_v39  ;;  %vm2775_vm10 = vcmask 7168   ;;  %s3575_s28 = smov [#allocation17]  }
  0x6c   :  { %191 = vrot.lane.b32.xlu0 %v188_v2, %s3572_s24  ;;  %198 = vperm.xlu1 %3296, %v188_v2   ;;  %v176_v11 = vld [vmem:[#allocation2 + $0x120] sm:$0xff]  ;;  %v178_v12 = vld [vmem:[#allocation2 + $0x130] sm:$0xff]  ;;  %v171_v13 = vld [vmem:[#allocation2 + $0xf8] sm:$0xff]  ;;  %s2808_s29 = sshll.u32 %s3575_s28, 4  ;;  %s3576_s0 = smov [#allocation16]   ;;  %s2809_s29 = int_to_ptr.vmem [resolvable:$true] %s2808_s29 }
  0x6d   :  { %250 = vmatprep.subr.mxu0 %v183_v4  ;;  %339 = vmatprep.subr.mxu1 %v185_v6  ;;  %v173_v14 = vld [vmem:[#allocation2 + $0x108] sm:$0xff]  ;;  %v170_v15 = vld [vmem:[#allocation2 + $0xf0] sm:$0xff]  ;;  %v172_v16 = vld [vmem:[#allocation2 + $0x100] sm:$0xff]  ;;  %vm2720_vm5 = vcmp.lt.s32.totalorder %v3685_v41, 6  ;;  %s2796_s30 = sshll.u32 %s3576_s0, 4  ;;  %s3482_s12 = scalar_lea.vmem %s2809_s29, 3072  ;;  %s2797_s30 = int_to_ptr.vmem [resolvable:$true] %s2796_s30 }
  0x6e   :  { %251 = vmatpush1.msra.mxu0 %v182_v7  ;;  %340 = vmatpush1.msra.mxu1 %v184_v8  ;;  %v165_v17 = vld [vmem:[#allocation2 + $0xc8] sm:$0xff]  ;;  %v167_v18 = vld [vmem:[#allocation2 + $0xd8] sm:$0xff]  ;;  %v164_v19 = vld [vmem:[#allocation2 + $0xc0] sm:$0xff]  ;;  %p3483_p12 = scmp.ne.s32.totalorder %s2809_s29, %s3482_s12  ;;  %p3487_p13 = scmp.lt.s32.totalorder %s2809_s29, %s2809_s29 }
  0x6f   :  { %252 = vmatprep.subr.mxu0 %v177_v9  ;;  %341 = vmatprep.subr.mxu1 %v179_v10  ;;  %v166_v20 = vld [vmem:[#allocation2 + $0xd0] sm:$0xff]  ;;  %v159_v21 = vld [vmem:[#allocation2 + $0x98] sm:$0xff]  ;;  %v161_v22 = vld [vmem:[#allocation2 + $0xa8] sm:$0xff]  ;;  %p3488_p0 = scmp.lt.s32.totalorder %s3482_s12, %s3482_s12 }
  0x70   :  { %193 = vrot.lane.b32.xlu0 %v190_v5, %s3572_s24  ;;  %201 = vperm.xlu1 %3296, %v190_v5   ;;  %v158_v23 = vld [vmem:[#allocation2 + $0x90] sm:$0xff]  ;;  %v160_v24 = vld [vmem:[#allocation2 + $0xa0] sm:$0xff]  ;;  %v153_v25 = vld [vmem:[#allocation2 + $0x68] sm:$0xff] }
  0x71   :  { %253 = vmatpush1.msra.mxu0 %v176_v11  ;;  %342 = vmatpush1.msra.mxu1 %v178_v12  ;;  %v155_v26 = vld [vmem:[#allocation2 + $0x78] sm:$0xff]  ;;  %v152_v27 = vld [vmem:[#allocation2 + $0x60] sm:$0xff]  ;;  %v154_v28 = vld [vmem:[#allocation2 + $0x70] sm:$0xff]  ;;  %p3489_p1 = por %p3488_p0, %p3487_p13 }
  0x72   :  { %254 = vmatprep.subr.mxu0 %v171_v13  ;;  %343 = vmatprep.subr.mxu1 %v173_v14  ;;  %v147_v29 = vld [vmem:[#allocation2 + $0x38] sm:$0xff]  ;;  %v149_v30 = vld [vmem:[#allocation2 + $0x48] sm:$0xff]  ;;  %v146_v31 = vld [vmem:[#allocation2 + $0x30] sm:$0xff] }
  0x73   :  { %255 = vmatpush1.msra.mxu0 %v170_v15  ;;  %344 = vmatpush1.msra.mxu1 %v172_v16  ;;  %v148_v32 = vld [vmem:[#allocation2 + $0x40] sm:$0xff]  ;;  %v141_v33 = vld [vmem:[#allocation2 + $0x8] sm:$0xff]  ;;  %v143_v34 = vld [vmem:[#allocation2 + $0x18] sm:$0xff]  ;;  %p3490_p2 = pnand %p3489_p1, %p3483_p12 }
  0x74   :  { %256 = vmatprep.subr.mxu0 %v165_v17  ;;  %345 = vmatprep.subr.mxu1 %v167_v18  ;;  %v140_v35 = vld [vmem:[#allocation2] sm:$0xff]  ;;  %v142_v36 = vld [vmem:[#allocation2 + $0x10] sm:$0xff]  ;;  %v187_v37 = vld [vmem:[#allocation2 + $0x178] sm:$0xff] }
  0x75   :  { %257 = vmatpush1.msra.mxu0 %v164_v19  ;;  %346 = vmatpush1.msra.mxu1 %v166_v20  ;;  %v186_v44 = vld [vmem:[#allocation2 + $0x170] sm:$0xff]  ;;  %v181_v45 = vld [vmem:[#allocation2 + $0x148] sm:$0xff]  ;;  %v180_v47 = vld [vmem:[#allocation2 + $0x140] sm:$0xff] }
  0x76   :  { %258 = vmatprep.subr.mxu0 %v159_v21  ;;  %347 = vmatprep.subr.mxu1 %v161_v22  ;;  %v175_v49 = vld [vmem:[#allocation2 + $0x118] sm:$0xff]  ;;  %v174_v50 = vld [vmem:[#allocation2 + $0x110] sm:$0xff]  ;;  %v169_v51 = vld [vmem:[#allocation2 + $0xe8] sm:$0xff] }
  0x77   :  { %259 = vmatpush1.msra.mxu0 %v158_v23  ;;  %348 = vmatpush1.msra.mxu1 %v160_v24  ;;  %v168_v52 = vld [vmem:[#allocation2 + $0xe0] sm:$0xff]  ;;  %v163_v53 = vld [vmem:[#allocation2 + $0xb8] sm:$0xff]  ;;  %v859_v54 = vld [vmem:[#allocation7 + $0x170] sm:$0xff] }
  0x78   :  { %260 = vmatprep.subr.mxu0 %v153_v25  ;;  %349 = vmatprep.subr.mxu1 %v155_v26  ;;  %v858_v55 = vld [vmem:[#allocation7 + $0x168] sm:$0xff]  ;;  %v162_v56 = vld [vmem:[#allocation2 + $0xb0] sm:$0xff]  ;;  %v856_v57 = vld [vmem:[#allocation7 + $0x158] sm:$0xff] }
  0x79   :  { %261 = vmatpush1.msra.mxu0 %v152_v27  ;;  %350 = vmatpush1.msra.mxu1 %v154_v28  ;;  %v157_v58 = vld [vmem:[#allocation2 + $0x88] sm:$0xff]  ;;  %v855_v59 = vld [vmem:[#allocation7 + $0x150] sm:$0xff]  ;;  %v853_v60 = vld [vmem:[#allocation7 + $0x140] sm:$0xff] }
  0x7a   :  { %262 = vmatprep.subr.mxu0 %v147_v29  ;;  %351 = vmatprep.subr.mxu1 %v149_v30  ;;  %v156_v61 = vld [vmem:[#allocation2 + $0x80] sm:$0xff]  ;;  %v852_v62 = vld [vmem:[#allocation7 + $0x138] sm:$0xff]  ;;  %v850_v0 = vld [vmem:[#allocation7 + $0x128] sm:$0xff] }
  0x7b   :  { %263 = vmatpush1.msra.mxu0 %v146_v31  ;;  %352 = vmatpush1.msra.mxu1 %v148_v32  ;;  %v151_v63 = vld [vmem:[#allocation2 + $0x58] sm:$0xff]  ;;  %v150_v2 = vld [vmem:[#allocation2 + $0x50] sm:$0xff]  ;;  %v849_v3 = vld [vmem:[#allocation7 + $0x120] sm:$0xff] }
  0x7c   :  { %264 = vmatprep.subr.mxu0 %v141_v33  ;;  %353 = vmatprep.subr.mxu1 %v143_v34  ;;  %v145_v4 = vld [vmem:[#allocation2 + $0x28] sm:$0xff]  ;;  %v847_v5 = vld [vmem:[#allocation7 + $0x110] sm:$0xff]  ;;  %v144_v6 = vld [vmem:[#allocation2 + $0x20] sm:$0xff] }
  0x7d   :  { %265 = vmatpush1.msra.mxu0 %v140_v35  ;;  %354 = vmatpush1.msra.mxu1 %v142_v36  ;;  %v846_v7 = vld [vmem:[#allocation7 + $0x108] sm:$0xff]  ;;  %v955_v8 = vld [vmem:[#allocation7 + $0x470] sm:$0xff]  ;;  %v844_v9 = vld [vmem:[#allocation7 + $0xf8] sm:$0xff] }
  0x7e   :  { %428 = vmatprep.subr.mxu0 %v187_v37  ;;  %1101 = vmatprep.subr.mxu1 %v859_v54  ;;  %v843_v10 = vld [vmem:[#allocation7 + $0xf0] sm:$0xff]  ;;  %v841_v11 = vld [vmem:[#allocation7 + $0xe0] sm:$0xff]  ;;  %v840_v12 = vld [vmem:[#allocation7 + $0xd8] sm:$0xff] }
  0x7f   :  { %v838_v13 = vld [vmem:[#allocation7 + $0xc8] sm:$0xff]  ;;  %v837_v14 = vld [vmem:[#allocation7 + $0xc0] sm:$0xff]  ;;  %v835_v15 = vld [vmem:[#allocation7 + $0xb0] sm:$0xff] }
  0x80   :  { %v834_v16 = vld [vmem:[#allocation7 + $0xa8] sm:$0xff]  ;;  %v832_v17 = vld [vmem:[#allocation7 + $0x98] sm:$0xff]  ;;  %v831_v18 = vld [vmem:[#allocation7 + $0x90] sm:$0xff] }
  0x81   :  { %v829_v19 = vld [vmem:[#allocation7 + $0x80] sm:$0xff]  ;;  %v828_v20 = vld [vmem:[#allocation7 + $0x78] sm:$0xff]  ;;  %v826_v21 = vld [vmem:[#allocation7 + $0x68] sm:$0xff] }
  0x82   :  { %v825_v22 = vld [vmem:[#allocation7 + $0x60] sm:$0xff]  ;;  %v823_v23 = vld [vmem:[#allocation7 + $0x50] sm:$0xff]  ;;  %v822_v24 = vld [vmem:[#allocation7 + $0x48] sm:$0xff] }
  0x83   :  { %v820_v25 = vld [vmem:[#allocation7 + $0x38] sm:$0xff]  ;;  %v819_v26 = vld [vmem:[#allocation7 + $0x30] sm:$0xff]  ;;  %v817_v27 = vld [vmem:[#allocation7 + $0x20] sm:$0xff] }
  0x84   :  { %v816_v28 = vld [vmem:[#allocation7 + $0x18] sm:$0xff]  ;;  %v814_v29 = vld [vmem:[#allocation7 + $0x8] sm:$0xff]  ;;  %v813_v30 = vld [vmem:[#allocation7] sm:$0xff] }
  0x85   :  { %v907_v31 = vld [vmem:[#allocation7 + $0x2f0] sm:$0xff]  ;;  %v906_v32 = vld [vmem:[#allocation7 + $0x2e8] sm:$0xff]  ;;  %v904_v33 = vld [vmem:[#allocation7 + $0x2d8] sm:$0xff] }
  0x86   :  { %v903_v34 = vld [vmem:[#allocation7 + $0x2d0] sm:$0xff]  ;;  %v901_v35 = vld [vmem:[#allocation7 + $0x2c0] sm:$0xff]  ;;  %v900_v36 = vld [vmem:[#allocation7 + $0x2b8] sm:$0xff] }
  0x87   :  { %v898_v37 = vld [vmem:[#allocation7 + $0x2a8] sm:$0xff]  ;;  %v879_v54 = vld [vmem:[#allocation7 + $0x210] sm:$0xff] }
  0xde   :  { %v192_v38 = vpop.permute.xlu0 %191 }
  0xdf   :  { %204 = vperm.xlu0 %3297, %v192_v38   ;;  %v897_v38 = vld [vmem:[#allocation7 + $0x2a0] sm:$0xff] }
  0xe2   :  { %v194_v40 = vpop.permute.xlu0 %193 }
  0xe3   :  { %207 = vperm.xlu1 %3296, %v194_v40   ;;  %v895_v40 = vld [vmem:[#allocation7 + $0x290] sm:$0xff] }
  0xe7   :  { %v199_v42 = vpop.permute.xlu1 %198 }
  0xe8   :  { %vm209_vm1 = vcmp.eq.s32.totalorder %v3685_v41, %v199_v42  ;;  %v894_v42 = vld [vmem:[#allocation7 + $0x288] sm:$0xff] }
  0xe9   :  { %v3689_v43 = vsel %vm209_vm1, 1.0, %v3571_v1 }
  0xea   :  { %2845 = vmatmul.mubr.msk.f32.vlgmr.msra.gmra.mxu0 %vm221_vm0, %v3689_v43  ;;  %2849 = vmatmul.mubr.msk.f32.vlgmr.msra.gmra.mxu1 %vm221_vm0, %v3689_v43 }
  0xeb   :  { %v202_v46 = vpop.permute.xlu1 %201  ;;  %304 = vmatprep.mubr.f32.mxu0 %v3571_v1  ;;  %393 = vmatprep.mubr.f32.mxu1 %v3571_v1 }
  0xec   :  { %vm210_vm2 = vcmp.eq.s32.totalorder %v3685_v41, %v202_v46  ;;  %429 = vmatpush1.msra.mxu0 %v186_v44  ;;  %1102 = vmatpush1.msra.mxu1 %v858_v55  ;;  %v892_v44 = vld [vmem:[#allocation7 + $0x278] sm:$0xff]  ;;  %v889_v46 = vld [vmem:[#allocation7 + $0x260] sm:$0xff] }
  0xed   :  { %v3699_v48 = vsel %vm210_vm2, 1.0, %v3571_v1  ;;  %430 = vmatprep.subr.mxu0 %v181_v45  ;;  %1103 = vmatprep.subr.mxu1 %v856_v57  ;;  %v891_v45 = vld [vmem:[#allocation7 + $0x270] sm:$0xff]  ;;  %v877_v55 = vld [vmem:[#allocation7 + $0x200] sm:$0xff]  ;;  %v874_v57 = vld [vmem:[#allocation7 + $0x1e8] sm:$0xff] }
  0xee   :  { %2846 = vmatmul.mubr.msk.f32.gmra.mxu0 %vm221_vm0, %v3699_v48  ;;  %2850 = vmatmul.mubr.msk.f32.gmra.mxu1 %vm221_vm0, %v3699_v48 }
  0xef   :  { %431 = vmatpush1.msra.mxu0 %v180_v47  ;;  %310 = vmatprep.mubr.f32.mxu0 %v3571_v1  ;;  %v888_v47 = vld [vmem:[#allocation7 + $0x258] sm:$0xff] }
  0xf0   :  { %432 = vmatprep.subr.mxu0 %v175_v49  ;;  %399 = vmatprep.mubr.f32.mxu1 %v3571_v1  ;;  %v886_v49 = vld [vmem:[#allocation7 + $0x248] sm:$0xff] }
  0xf1   :  { %433 = vmatpush1.msra.mxu0 %v174_v50  ;;  %1104 = vmatpush1.msra.mxu1 %v855_v59  ;;  %v885_v50 = vld [vmem:[#allocation7 + $0x240] sm:$0xff]  ;;  %v871_v59 = vld [vmem:[#allocation7 + $0x1d0] sm:$0xff] }
  0xf2   :  { %434 = vmatprep.subr.mxu0 %v169_v51  ;;  %1105 = vmatprep.subr.mxu1 %v853_v60  ;;  %v883_v51 = vld [vmem:[#allocation7 + $0x230] sm:$0xff]  ;;  %v870_v60 = vld [vmem:[#allocation7 + $0x1c8] sm:$0xff] }
  0xf3   :  { %435 = vmatpush1.msra.mxu0 %v168_v52  ;;  %1106 = vmatpush1.msra.mxu1 %v852_v62  ;;  %v882_v52 = vld [vmem:[#allocation7 + $0x228] sm:$0xff]  ;;  %v867_v62 = vld [vmem:[#allocation7 + $0x1b0] sm:$0xff] }
  0xf4   :  { %436 = vmatprep.subr.mxu0 %v163_v53  ;;  %1107 = vmatprep.subr.mxu1 %v850_v0  ;;  %v880_v53 = vld [vmem:[#allocation7 + $0x218] sm:$0xff] }
  0xf5   :  { %437 = vmatpush1.msra.mxu0 %v162_v56  ;;  %1108 = vmatpush1.msra.mxu1 %v849_v3  ;;  %v876_v56 = vld [vmem:[#allocation7 + $0x1f8] sm:$0xff] }
  0xf6   :  { %438 = vmatprep.subr.mxu0 %v157_v58  ;;  %1109 = vmatprep.subr.mxu1 %v847_v5  ;;  %v873_v58 = vld [vmem:[#allocation7 + $0x1e0] sm:$0xff]  ;;  %v954_v5 = vld [vmem:[#allocation7 + $0x468] sm:$0xff] }
  0xf7   :  { %439 = vmatpush1.msra.mxu0 %v156_v61  ;;  %1110 = vmatpush1.msra.mxu1 %v846_v7  ;;  %v868_v61 = vld [vmem:[#allocation7 + $0x1b8] sm:$0xff]  ;;  %v951_v7 = vld [vmem:[#allocation7 + $0x450] sm:$0xff] }
  0xf8   :  { %440 = vmatprep.subr.mxu0 %v151_v63  ;;  %1111 = vmatprep.subr.mxu1 %v844_v9  ;;  %v865_v63 = vld [vmem:[#allocation7 + $0x1a0] sm:$0xff]  ;;  %v948_v9 = vld [vmem:[#allocation7 + $0x438] sm:$0xff] }
  0xf9   :  { %441 = vmatpush1.msra.mxu0 %v150_v2  ;;  %1112 = vmatpush1.msra.mxu1 %v843_v10  ;;  %v946_v10 = vld [vmem:[#allocation7 + $0x428] sm:$0xff] }
  0xfa   :  { %442 = vmatprep.subr.mxu0 %v145_v4  ;;  %1113 = vmatprep.subr.mxu1 %v841_v11  ;;  %v945_v11 = vld [vmem:[#allocation7 + $0x420] sm:$0xff] }
  0xfb   :  { %443 = vmatpush1.msra.mxu0 %v144_v6  ;;  %1114 = vmatpush1.msra.mxu1 %v840_v12  ;;  %v952_v6 = vld [vmem:[#allocation7 + $0x458] sm:$0xff]  ;;  %v943_v12 = vld [vmem:[#allocation7 + $0x410] sm:$0xff] }
  0xfc   :  { %1178 = vmatprep.subr.mxu0 %v955_v8  ;;  %1115 = vmatprep.subr.mxu1 %v838_v13  ;;  %v949_v8 = vld [vmem:[#allocation7 + $0x440] sm:$0xff]  ;;  %v940_v13 = vld [vmem:[#allocation7 + $0x3f8] sm:$0xff] }
  0xfd   :  { %1116 = vmatpush1.msra.mxu1 %v837_v14  ;;  %v939_v14 = vld [vmem:[#allocation7 + $0x3f0] sm:$0xff] }
  0xfe   :  { %1117 = vmatprep.subr.mxu1 %v835_v15  ;;  %v937_v15 = vld [vmem:[#allocation7 + $0x3e0] sm:$0xff] }
  0xff   :  { %1118 = vmatpush1.msra.mxu1 %v834_v16  ;;  %v934_v16 = vld [vmem:[#allocation7 + $0x3c8] sm:$0xff] }
 0x100   :  { %1119 = vmatprep.subr.mxu1 %v832_v17  ;;  %v933_v17 = vld [vmem:[#allocation7 + $0x3c0] sm:$0xff] }
 0x101   :  { %1120 = vmatpush1.msra.mxu1 %v831_v18  ;;  %v931_v18 = vld [vmem:[#allocation7 + $0x3b0] sm:$0xff] }
 0x102   :  { %1121 = vmatprep.subr.mxu1 %v829_v19  ;;  %v930_v19 = vld [vmem:[#allocation7 + $0x3a8] sm:$0xff] }
 0x103   :  { %1122 = vmatpush1.msra.mxu1 %v828_v20  ;;  %v928_v20 = vld [vmem:[#allocation7 + $0x398] sm:$0xff] }
 0x104   :  { %1123 = vmatprep.subr.mxu1 %v826_v21  ;;  %v927_v21 = vld [vmem:[#allocation7 + $0x390] sm:$0xff] }
 0x105   :  { %1124 = vmatpush1.msra.mxu1 %v825_v22  ;;  %v925_v22 = vld [vmem:[#allocation7 + $0x380] sm:$0xff] }
 0x106   :  { %1125 = vmatprep.subr.mxu1 %v823_v23  ;;  %v924_v23 = vld [vmem:[#allocation7 + $0x378] sm:$0xff] }
 0x107   :  { %1126 = vmatpush1.msra.mxu1 %v822_v24  ;;  %v922_v24 = vld [vmem:[#allocation7 + $0x368] sm:$0xff] }
 0x108   :  { %1127 = vmatprep.subr.mxu1 %v820_v25  ;;  %v921_v25 = vld [vmem:[#allocation7 + $0x360] sm:$0xff] }
 0x109   :  { %1128 = vmatpush1.msra.mxu1 %v819_v26  ;;  %v919_v26 = vld [vmem:[#allocation7 + $0x350] sm:$0xff] }
 0x10a   :  { %1129 = vmatprep.subr.mxu1 %v817_v27  ;;  %v918_v27 = vld [vmem:[#allocation7 + $0x348] sm:$0xff] }
 0x10b   :  { %1130 = vmatpush1.msra.mxu1 %v816_v28  ;;  %v916_v28 = vld [vmem:[#allocation7 + $0x338] sm:$0xff] }
 0x10c   :  { %1131 = vmatprep.subr.mxu1 %v814_v29  ;;  %v915_v29 = vld [vmem:[#allocation7 + $0x330] sm:$0xff] }
 0x10d   :  { %1132 = vmatpush1.msra.mxu1 %v813_v30  ;;  %v913_v30 = vld [vmem:[#allocation7 + $0x320] sm:$0xff] }
 0x10e   :  { %1133 = vmatprep.subr.mxu1 %v907_v31  ;;  %v912_v31 = vld [vmem:[#allocation7 + $0x318] sm:$0xff] }
 0x10f   :  { %1134 = vmatpush2.msra.mxu1 %v906_v32  ;;  %v910_v32 = vld [vmem:[#allocation7 + $0x308] sm:$0xff] }
 0x110   :  { %1135 = vmatprep.subr.mxu1 %v904_v33  ;;  %v909_v33 = vld [vmem:[#allocation7 + $0x300] sm:$0xff] }
 0x111   :  { %1136 = vmatpush2.msra.mxu1 %v903_v34  ;;  %v1003_v34 = vld [vmem:[#allocation7 + $0x5f0] sm:$0xff] }
 0x112   :  { %1137 = vmatprep.subr.mxu1 %v901_v35  ;;  %v1002_v35 = vld [vmem:[#allocation7 + $0x5e8] sm:$0xff] }
 0x113   :  { %1138 = vmatpush2.msra.mxu1 %v900_v36  ;;  %v1000_v36 = vld [vmem:[#allocation7 + $0x5d8] sm:$0xff] }
 0x114   :  { %1139 = vmatprep.subr.mxu1 %v898_v37  ;;  %v999_v37 = vld [vmem:[#allocation7 + $0x5d0] sm:$0xff] }
 0x115   :  { %1140 = vmatpush2.msra.mxu1 %v897_v38  ;;  %v997_v38 = vld [vmem:[#allocation7 + $0x5c0] sm:$0xff] }
 0x116   :  { %1141 = vmatprep.subr.mxu1 %v895_v40  ;;  %v996_v40 = vld [vmem:[#allocation7 + $0x5b8] sm:$0xff] }
 0x117   :  { %1142 = vmatpush2.msra.mxu1 %v894_v42  ;;  %v994_v42 = vld [vmem:[#allocation7 + $0x5a8] sm:$0xff] }
 0x118   :  { %1143 = vmatprep.subr.mxu1 %v892_v44  ;;  %v993_v44 = vld [vmem:[#allocation7 + $0x5a0] sm:$0xff] }
 0x119   :  { %1144 = vmatpush2.msra.mxu1 %v891_v45  ;;  %v991_v45 = vld [vmem:[#allocation7 + $0x590] sm:$0xff] }
 0x11a   :  { %1145 = vmatprep.subr.mxu1 %v889_v46  ;;  %v990_v46 = vld [vmem:[#allocation7 + $0x588] sm:$0xff] }
 0x11b   :  { %1146 = vmatpush2.msra.mxu1 %v888_v47  ;;  %v988_v47 = vld [vmem:[#allocation7 + $0x578] sm:$0xff] }
 0x11c   :  { %1147 = vmatprep.subr.mxu1 %v886_v49  ;;  %v987_v49 = vld [vmem:[#allocation7 + $0x570] sm:$0xff] }
 0x11d   :  { %1148 = vmatpush2.msra.mxu1 %v885_v50  ;;  %v985_v50 = vld [vmem:[#allocation7 + $0x560] sm:$0xff] }
 0x11e   :  { %1149 = vmatprep.subr.mxu1 %v883_v51  ;;  %v984_v51 = vld [vmem:[#allocation7 + $0x558] sm:$0xff] }
 0x11f   :  { %1150 = vmatpush2.msra.mxu1 %v882_v52  ;;  %v982_v52 = vld [vmem:[#allocation7 + $0x548] sm:$0xff] }
 0x120   :  { %1151 = vmatprep.subr.mxu1 %v880_v53  ;;  %v981_v53 = vld [vmem:[#allocation7 + $0x540] sm:$0xff] }
 0x121   :  { %1152 = vmatpush2.msra.mxu1 %v879_v54  ;;  %v979_v54 = vld [vmem:[#allocation7 + $0x530] sm:$0xff] }
 0x122   :  { %1153 = vmatprep.subr.mxu1 %v877_v55  ;;  %v978_v55 = vld [vmem:[#allocation7 + $0x528] sm:$0xff] }
 0x123   :  { %1154 = vmatpush2.msra.mxu1 %v876_v56  ;;  %v976_v56 = vld [vmem:[#allocation7 + $0x518] sm:$0xff] }
 0x124   :  { %1155 = vmatprep.subr.mxu1 %v874_v57  ;;  %v975_v57 = vld [vmem:[#allocation7 + $0x510] sm:$0xff] }
 0x125   :  { %1156 = vmatpush2.msra.mxu1 %v873_v58  ;;  %v973_v58 = vld [vmem:[#allocation7 + $0x500] sm:$0xff] }
 0x126   :  { %1157 = vmatprep.subr.mxu1 %v871_v59  ;;  %v972_v59 = vld [vmem:[#allocation7 + $0x4f8] sm:$0xff] }
 0x127   :  { %1158 = vmatpush2.msra.mxu1 %v870_v60  ;;  %v970_v60 = vld [vmem:[#allocation7 + $0x4e8] sm:$0xff] }
 0x128   :  { %1159 = vmatprep.subr.mxu1 %v868_v61  ;;  %v969_v61 = vld [vmem:[#allocation7 + $0x4e0] sm:$0xff] }
 0x129   :  { %1160 = vmatpush2.msra.mxu1 %v867_v62  ;;  %v967_v62 = vld [vmem:[#allocation7 + $0x4d0] sm:$0xff] }
 0x12a   :  { %1161 = vmatprep.subr.mxu1 %v865_v63  ;;  %v966_v63 = vld [vmem:[#allocation7 + $0x4c8] sm:$0xff] }
 0x15a   :  { %v205_v0 = vpop.permute.xlu0 %204 }
 0x15b   :  { %vm211_vm3 = vcmp.eq.s32.totalorder %v3685_v41, %v205_v0  ;;  %v964_v0 = vld [vmem:[#allocation7 + $0x4b8] sm:$0xff] }
 0x15c   :  { %v2843_v2 = vsel %vm211_vm3, 1.0, %v3571_v1 }
 0x15d   :  { %2847 = vmatmul.mubr.msk.f32.gmra.mxu0 %vm221_vm0, %v2843_v2  ;;  %2851 = vmatmul.mubr.msk.f32.gmra.mxu1 %vm221_vm0, %v2843_v2 }
 0x15e   :  { %v208_v3 = vpop.permute.xlu1 %207  ;;  %316 = vmatprep.mubr.f32.mxu0 %v3571_v1  ;;  %405 = vmatprep.mubr.f32.mxu1 %v3571_v1 }
 0x15f   :  { %vm212_vm4 = vcmp.eq.s32.totalorder %v3685_v41, %v208_v3  ;;  %v963_v3 = vld [vmem:[#allocation7 + $0x4b0] sm:$0xff] }
 0x160   :  { %v2844_v4 = vsel %vm212_vm4, 1.0, %v3571_v1 }
 0x161   :  { %2848 = vmatmul.mubr.msk.f32.gmra.mxu0 %vm221_vm0, %v2844_v4  ;;  %2852 = vmatmul.mubr.msk.f32.gmra.mxu1 %vm221_vm0, %v2844_v4 }
 0x162   :  { %476 = vmatprep.mubr.f32.mxu0 %v3571_v1 }
 0x165   :  { %2853 = vmatmul.mubr.msk.f32.vlgmr.msra.gmra.mxu0 %vm221_vm0, %v3689_v43  ;;  %v942_v43 = vld [vmem:[#allocation7 + $0x408] sm:$0xff] }
 0x166   :  { %482 = vmatprep.mubr.f32.mxu0 %v3571_v1  ;;  %1179 = vmatpush1.msra.mxu0 %v954_v5  ;;  %v961_v5 = vld [vmem:[#allocation7 + $0x4a0] sm:$0xff] }
 0x167   :  { %1180 = vmatprep.subr.mxu0 %v952_v6  ;;  %v861_v6 = vld [vmem:[#allocation7 + $0x180] sm:$0xff] }
 0x168   :  { %1181 = vmatpush1.msra.mxu0 %v951_v7  ;;  %v960_v7 = vld [vmem:[#allocation7 + $0x498] sm:$0xff] }
 0x169   :  { %2854 = vmatmul.mubr.msk.f32.gmra.mxu0 %vm221_vm0, %v3699_v48  ;;  %1182 = vmatprep.subr.mxu0 %v949_v8  ;;  %v936_v48 = vld [vmem:[#allocation7 + $0x3d8] sm:$0xff]  ;;  %v1051_v8 = vld [vmem:[#allocation7 + $0x770] sm:$0xff] }
 0x16a   :  { %488 = vmatprep.mubr.f32.mxu0 %v3571_v1  ;;  %1183 = vmatpush1.msra.mxu0 %v948_v9  ;;  %v958_v9 = vld [vmem:[#allocation7 + $0x488] sm:$0xff] }
 0x16b   :  { %1184 = vmatprep.subr.mxu0 %v946_v10  ;;  %v957_v10 = vld [vmem:[#allocation7 + $0x480] sm:$0xff] }
 0x16c   :  { %1185 = vmatpush1.msra.mxu0 %v945_v11  ;;  %v908_v11 = vld [vmem:[#allocation7 + $0x2f8] sm:$0xff] }
 0x16d   :  { %2855 = vmatmul.mubr.msk.f32.gmra.mxu0 %vm221_vm0, %v2843_v2  ;;  %1186 = vmatprep.subr.mxu0 %v943_v12  ;;  %v864_v2 = vld [vmem:[#allocation7 + $0x198] sm:$0xff] }
 0x16e   :  { %494 = vmatprep.mubr.f32.mxu0 %v3571_v1  ;;  %1187 = vmatpush1.msra.mxu0 %v942_v43 }
 0x16f   :  { %1188 = vmatprep.subr.mxu0 %v940_v13  ;;  %1162 = vmatpush2.msra.mxu1 %v864_v2  ;;  %v839_v2 = vld [vmem:[#allocation7 + $0xd0] sm:$0xff] }
 0x170   :  { %1189 = vmatpush1.msra.mxu0 %v939_v14 }
 0x171   :  { %2856 = vmatmul.mubr.msk.f32.gmra.mxu0 %vm221_vm0, %v2844_v4  ;;  %1190 = vmatprep.subr.mxu0 %v937_v15  ;;  %v862_v4 = vld [vmem:[#allocation7 + $0x188] sm:$0xff] }
 0x172   :  { %1191 = vmatpush1.msra.mxu0 %v936_v48  ;;  %1163 = vmatprep.subr.mxu1 %v862_v4  ;;  %v884_v4 = vld [vmem:[#allocation7 + $0x238] sm:$0xff] }
 0x173   :  { %1192 = vmatprep.subr.mxu0 %v934_v16  ;;  %1164 = vmatpush2.msra.mxu1 %v861_v6  ;;  %v1026_v6 = vld [vmem:[#allocation7 + $0x6a8] sm:$0xff] }
 0x174   :  { %1193 = vmatpush1.msra.mxu0 %v933_v17  ;;  %1255 = vmatprep.subr.mxu1 %v1051_v8  ;;  %v1024_v8 = vld [vmem:[#allocation7 + $0x698] sm:$0xff] }
 0x175   :  { %1194 = vmatprep.subr.mxu0 %v931_v18 }
 0x176   :  { %1195 = vmatpush1.msra.mxu0 %v930_v19 }
 0x177   :  { %1196 = vmatprep.subr.mxu0 %v928_v20 }
 0x178   :  { %1197 = vmatpush1.msra.mxu0 %v927_v21 }
 0x179   :  { %1198 = vmatprep.subr.mxu0 %v925_v22  ;;  %v1050_v22 = vld [vmem:[#allocation7 + $0x768] sm:$0xff] }
 0x17a   :  { %1199 = vmatpush1.msra.mxu0 %v924_v23  ;;  %v860_v23 = vld [vmem:[#allocation7 + $0x178] sm:$0xff] }
 0x17b   :  { %1200 = vmatprep.subr.mxu0 %v922_v24  ;;  %v1048_v24 = vld [vmem:[#allocation7 + $0x758] sm:$0xff] }
 0x17c   :  { %1201 = vmatpush1.msra.mxu0 %v921_v25  ;;  %v905_v25 = vld [vmem:[#allocation7 + $0x2e0] sm:$0xff] }
 0x17d   :  { %1202 = vmatprep.subr.mxu0 %v919_v26 }
 0x17e   :  { %1203 = vmatpush1.msra.mxu0 %v918_v27 }
 0x17f   :  { %1204 = vmatprep.subr.mxu0 %v916_v28  ;;  %v1047_v28 = vld [vmem:[#allocation7 + $0x750] sm:$0xff] }
 0x180   :  { %1205 = vmatpush1.msra.mxu0 %v915_v29  ;;  %v857_v29 = vld [vmem:[#allocation7 + $0x160] sm:$0xff] }
 0x181   :  { %1206 = vmatprep.subr.mxu0 %v913_v30 }
 0x182   :  { %1207 = vmatpush1.msra.mxu0 %v912_v31 }
 0x183   :  { %1208 = vmatprep.subr.mxu0 %v910_v32  ;;  %v1045_v32 = vld [vmem:[#allocation7 + $0x740] sm:$0xff] }
 0x184   :  { %1209 = vmatpush1.msra.mxu0 %v909_v33  ;;  %v902_v33 = vld [vmem:[#allocation7 + $0x2c8] sm:$0xff] }
 0x185   :  { %1210 = vmatprep.subr.mxu0 %v1003_v34 }
 0x186   :  { %1211 = vmatpush2.msra.mxu0 %v1002_v35  ;;  %v1044_v35 = vld [vmem:[#allocation7 + $0x738] sm:$0xff] }
 0x187   :  { %1212 = vmatprep.subr.mxu0 %v1000_v36  ;;  %v854_v36 = vld [vmem:[#allocation7 + $0x148] sm:$0xff] }
 0x188   :  { %1213 = vmatpush2.msra.mxu0 %v999_v37  ;;  %v1042_v37 = vld [vmem:[#allocation7 + $0x728] sm:$0xff] }
 0x189   :  { %1214 = vmatprep.subr.mxu0 %v997_v38  ;;  %v899_v38 = vld [vmem:[#allocation7 + $0x2b0] sm:$0xff] }
 0x18a   :  { %1215 = vmatpush2.msra.mxu0 %v996_v40 }
 0x18b   :  { %1216 = vmatprep.subr.mxu0 %v994_v42  ;;  %v1041_v42 = vld [vmem:[#allocation7 + $0x720] sm:$0xff] }
 0x18c   :  { %1217 = vmatpush2.msra.mxu0 %v993_v44  ;;  %v851_v44 = vld [vmem:[#allocation7 + $0x130] sm:$0xff] }
 0x18d   :  { %1218 = vmatprep.subr.mxu0 %v991_v45  ;;  %v1039_v45 = vld [vmem:[#allocation7 + $0x710] sm:$0xff] }
 0x18e   :  { %1219 = vmatpush2.msra.mxu0 %v990_v46  ;;  %v896_v46 = vld [vmem:[#allocation7 + $0x298] sm:$0xff] }
 0x18f   :  { %1220 = vmatprep.subr.mxu0 %v988_v47 }
 0x190   :  { %1221 = vmatpush2.msra.mxu0 %v987_v49  ;;  %v1038_v49 = vld [vmem:[#allocation7 + $0x708] sm:$0xff] }
 0x191   :  { %1222 = vmatprep.subr.mxu0 %v985_v50  ;;  %v848_v50 = vld [vmem:[#allocation7 + $0x118] sm:$0xff] }
 0x192   :  { %1223 = vmatpush2.msra.mxu0 %v984_v51  ;;  %v1036_v51 = vld [vmem:[#allocation7 + $0x6f8] sm:$0xff] }
 0x193   :  { %1224 = vmatprep.subr.mxu0 %v982_v52  ;;  %v893_v52 = vld [vmem:[#allocation7 + $0x280] sm:$0xff] }
 0x194   :  { %1225 = vmatpush2.msra.mxu0 %v981_v53 }
 0x195   :  { %1226 = vmatprep.subr.mxu0 %v979_v54  ;;  %v1035_v54 = vld [vmem:[#allocation7 + $0x6f0] sm:$0xff] }
 0x196   :  { %1227 = vmatpush2.msra.mxu0 %v978_v55  ;;  %v845_v55 = vld [vmem:[#allocation7 + $0x100] sm:$0xff] }
 0x197   :  { %1228 = vmatprep.subr.mxu0 %v976_v56  ;;  %v1033_v56 = vld [vmem:[#allocation7 + $0x6e0] sm:$0xff] }
 0x198   :  { %1229 = vmatpush2.msra.mxu0 %v975_v57  ;;  %v890_v57 = vld [vmem:[#allocation7 + $0x268] sm:$0xff] }
 0x199   :  { %1230 = vmatprep.subr.mxu0 %v973_v58 }
 0x19a   :  { %1231 = vmatpush2.msra.mxu0 %v972_v59  ;;  %v1032_v59 = vld [vmem:[#allocation7 + $0x6d8] sm:$0xff] }
 0x19b   :  { %1232 = vmatprep.subr.mxu0 %v970_v60  ;;  %v842_v60 = vld [vmem:[#allocation7 + $0xe8] sm:$0xff] }
 0x19c   :  { %1233 = vmatpush2.msra.mxu0 %v969_v61  ;;  %v1030_v61 = vld [vmem:[#allocation7 + $0x6c8] sm:$0xff] }
 0x19d   :  { %1234 = vmatprep.subr.mxu0 %v967_v62  ;;  %v887_v62 = vld [vmem:[#allocation7 + $0x250] sm:$0xff] }
 0x19e   :  { %1235 = vmatpush2.msra.mxu0 %v966_v63 }
 0x19f   :  { %1236 = vmatprep.subr.mxu0 %v964_v0  ;;  %v1029_v0 = vld [vmem:[#allocation7 + $0x6c0] sm:$0xff] }
 0x1a0   :  { %1237 = vmatpush2.msra.mxu0 %v963_v3  ;;  %v1027_v3 = vld [vmem:[#allocation7 + $0x6b0] sm:$0xff] }
 0x1a1   :  { %1238 = vmatprep.subr.mxu0 %v961_v5 }
 0x1a2   :  { %1239 = vmatpush2.msra.mxu0 %v960_v7  ;;  %v836_v7 = vld [vmem:[#allocation7 + $0xb8] sm:$0xff] }
 0x1a3   :  { %1240 = vmatprep.subr.mxu0 %v958_v9  ;;  %v881_v9 = vld [vmem:[#allocation7 + $0x220] sm:$0xff] }
 0x1a4   :  { %1241 = vmatpush2.msra.mxu0 %v957_v10 }
 0x1a5   :  { %2860 = vmatprep.subr.mxu0 %v908_v11  ;;  %v1023_v11 = vld [vmem:[#allocation7 + $0x690] sm:$0xff] }
 0x1aa   :  { %v300_v12 = vpop.f32.mrf.mxu0  ;;  %v389_v43 = vpop.f32.mrf.mxu1 }
 0x1ab   :  { %501 = vst [vmem:[#allocation17] sm:$0xff] %v300_v12  ;;  %503 = vst [vmem:[#allocation17 + $0x10] sm:$0xff] %v389_v43  ;;  %v833_v12 = vld [vmem:[#allocation7 + $0xa0] sm:$0xff] }
 0x1ac   :  { %v3727_v13 = vpop.f32.mrf.mxu0  ;;  %v3729_v14 = vpop.f32.mrf.mxu1  ;;  %v1021_v43 = vld [vmem:[#allocation7 + $0x680] sm:$0xff] }
 0x1ad   :  { %502 = vst [vmem:[#allocation17 + $0x8] sm:$0xff] %v3727_v13  ;;  %504 = vst [vmem:[#allocation17 + $0x18] sm:$0xff] %v3729_v14 }
 0x1ae   :  { %v306_v15 = vpop.f32.mrf.mxu0  ;;  %v395_v48 = vpop.f32.mrf.mxu1 }
 0x1af   :  { %507 = vst [vmem:[#allocation17 + $0x60] sm:$0xff] %v306_v15  ;;  %509 = vst [vmem:[#allocation17 + $0x70] sm:$0xff] %v395_v48  ;;  %v878_v15 = vld [vmem:[#allocation7 + $0x208] sm:$0xff]  ;;  %v1020_v48 = vld [vmem:[#allocation7 + $0x678] sm:$0xff] }
 0x1b0   :  { %v308_v16 = vpop.f32.mrf.mxu0  ;;  %v397_v17 = vpop.f32.mrf.mxu1 }
 0x1b1   :  { %508 = vst [vmem:[#allocation17 + $0x68] sm:$0xff] %v308_v16  ;;  %510 = vst [vmem:[#allocation17 + $0x78] sm:$0xff] %v397_v17  ;;  %v830_v16 = vld [vmem:[#allocation7 + $0x88] sm:$0xff] }
 0x1b2   :  { %v1018_v17 = vld [vmem:[#allocation7 + $0x668] sm:$0xff] }
 0x21d   :  { %v3733_v18 = vpop.f32.mrf.mxu0  ;;  %v3735_v19 = vpop.f32.mrf.mxu1 }
 0x21e   :  { %513 = vst [vmem:[#allocation17 + $0x30] sm:$0xff] %v3733_v18  ;;  %515 = vst [vmem:[#allocation17 + $0x40] sm:$0xff] %v3735_v19 }
 0x21f   :  { %v314_v20 = vpop.f32.mrf.mxu0  ;;  %v3739_v21 = vpop.f32.mrf.mxu1 }
 0x220   :  { %514 = vst [vmem:[#allocation17 + $0x38] sm:$0xff] %v314_v20  ;;  %516 = vst [vmem:[#allocation17 + $0x48] sm:$0xff] %v3739_v21  ;;  %1165 = vmatprep.mubr.f32.mxu1 %v314_v20  ;;  %1242 = vmatprep.mubr.f32.mxu0 %v3739_v21 }
 0x221   :  { %v3743_v26 = vpop.f32.mrf.mxu0  ;;  %v3745_v27 = vpop.f32.mrf.mxu1  ;;  %1166 = vmatmul.mubr.f32.vlgmr.msra.gmra.mxu1 %v3733_v18  ;;  %1243 = vmatmul.mubr.f32.vlgmr.msra.gmra.mxu0 %v3735_v19 }
 0x222   :  { %519 = vst [vmem:[#allocation17 + $0x90] sm:$0xff] %v3743_v26  ;;  %521 = vst [vmem:[#allocation17 + $0xa0] sm:$0xff] %v3745_v27  ;;  %1256 = vmatpush1.msra.mxu1 %v1050_v22  ;;  %2861 = vmatpush3.msra.mxu0 %v860_v23  ;;  %v1017_v22 = vld [vmem:[#allocation7 + $0x660] sm:$0xff]  ;;  %v827_v23 = vld [vmem:[#allocation7 + $0x70] sm:$0xff] }
 0x223   :  { %1257 = vmatprep.subr.mxu1 %v1048_v24  ;;  %2862 = vmatprep.subr.mxu0 %v905_v25  ;;  %v3751_v30 = vpop.f32.mrf.mxu0  ;;  %v3753_v31 = vpop.f32.mrf.mxu1  ;;  %v1015_v24 = vld [vmem:[#allocation7 + $0x650] sm:$0xff]  ;;  %v872_v25 = vld [vmem:[#allocation7 + $0x1d8] sm:$0xff] }
 0x224   :  { %520 = vst [vmem:[#allocation17 + $0x98] sm:$0xff] %v3751_v30  ;;  %522 = vst [vmem:[#allocation17 + $0xa8] sm:$0xff] %v3753_v31  ;;  %1258 = vmatpush1.msra.mxu1 %v1047_v28  ;;  %2863 = vmatpush3.msra.mxu0 %v857_v29  ;;  %v1014_v28 = vld [vmem:[#allocation7 + $0x648] sm:$0xff]  ;;  %v824_v29 = vld [vmem:[#allocation7 + $0x58] sm:$0xff] }
 0x225   :  { %1171 = vmatprep.mubr.f32.mxu1 %v3751_v30  ;;  %1248 = vmatprep.mubr.f32.mxu0 %v3753_v31  ;;  %v478_v34 = vpop.f32.mrf.mxu0 }
 0x226   :  { %1259 = vmatprep.subr.mxu1 %v1045_v32  ;;  %2864 = vmatprep.subr.mxu0 %v902_v33  ;;  %505 = vst [vmem:[#allocation17 + $0x20] sm:$0xff] %v478_v34  ;;  %v1012_v32 = vld [vmem:[#allocation7 + $0x638] sm:$0xff]  ;;  %v869_v33 = vld [vmem:[#allocation7 + $0x1c0] sm:$0xff]  ;;  %v1011_v34 = vld [vmem:[#allocation7 + $0x630] sm:$0xff] }
 0x227   :  { %1172 = vmatmul.mubr.f32.gmra.mxu1 %v3743_v26  ;;  %1249 = vmatmul.mubr.f32.gmra.mxu0 %v3745_v27  ;;  %v480_v40 = vpop.f32.mrf.mxu0 }
 0x228   :  { %1260 = vmatpush1.msra.mxu1 %v1044_v35  ;;  %2865 = vmatpush3.msra.mxu0 %v854_v36  ;;  %506 = vst [vmem:[#allocation17 + $0x28] sm:$0xff] %v480_v40  ;;  %v821_v35 = vld [vmem:[#allocation7 + $0x40] sm:$0xff]  ;;  %v818_v40 = vld [vmem:[#allocation7 + $0x28] sm:$0xff] }
 0x229   :  { %1261 = vmatprep.subr.mxu1 %v1042_v37  ;;  %2866 = vmatprep.subr.mxu0 %v899_v38  ;;  %v484_v47 = vpop.f32.mrf.mxu0  ;;  %v1009_v36 = vld [vmem:[#allocation7 + $0x620] sm:$0xff]  ;;  %v866_v37 = vld [vmem:[#allocation7 + $0x1a8] sm:$0xff]  ;;  %v1008_v38 = vld [vmem:[#allocation7 + $0x618] sm:$0xff] }
 0x22a   :  { %1396 = vmatprep.mubr.f32.mxu0 %v314_v20  ;;  %1262 = vmatpush1.msra.mxu1 %v1041_v42  ;;  %511 = vst [vmem:[#allocation17 + $0x80] sm:$0xff] %v484_v47  ;;  %v875_v20 = vld [vmem:[#allocation7 + $0x1f0] sm:$0xff]  ;;  %v1006_v42 = vld [vmem:[#allocation7 + $0x608] sm:$0xff] }
 0x22b   :  { %2867 = vmatpush3.msra.mxu0 %v851_v44  ;;  %1263 = vmatprep.subr.mxu1 %v1039_v45  ;;  %v486_v53 = vpop.f32.mrf.mxu0  ;;  %v863_v44 = vld [vmem:[#allocation7 + $0x190] sm:$0xff]  ;;  %v1005_v45 = vld [vmem:[#allocation7 + $0x600] sm:$0xff] }
 0x22c   :  { %2868 = vmatprep.subr.mxu0 %v896_v46  ;;  %1264 = vmatpush1.msra.mxu1 %v1038_v49  ;;  %512 = vst [vmem:[#allocation17 + $0x88] sm:$0xff] %v486_v53  ;;  %v815_v46 = vld [vmem:[#allocation7 + $0x10] sm:$0xff]  ;;  %v1004_v49 = vld [vmem:[#allocation7 + $0x5f8] sm:$0xff]  ;;  %v1001_v53 = vld [vmem:[#allocation7 + $0x5e0] sm:$0xff] }
 0x22d   :  { %2869 = vmatpush3.msra.mxu0 %v848_v50  ;;  %1265 = vmatprep.subr.mxu1 %v1036_v51  ;;  %v3761_v58 = vpop.f32.mrf.mxu0  ;;  %v1099_v47 = vld [vmem:[#allocation7 + $0x8f0] sm:$0xff]  ;;  %v1098_v50 = vld [vmem:[#allocation7 + $0x8e8] sm:$0xff]  ;;  %v956_v51 = vld [vmem:[#allocation7 + $0x478] sm:$0xff] }
 0x22e   :  { %2870 = vmatprep.subr.mxu0 %v893_v52  ;;  %1266 = vmatpush1.msra.mxu1 %v1035_v54  ;;  %517 = vst [vmem:[#allocation17 + $0x50] sm:$0xff] %v3761_v58  ;;  %v1096_v52 = vld [vmem:[#allocation7 + $0x8d8] sm:$0xff]  ;;  %v1095_v54 = vld [vmem:[#allocation7 + $0x8d0] sm:$0xff] }
 0x22f   :  { %2871 = vmatpush3.msra.mxu0 %v845_v55  ;;  %1267 = vmatprep.subr.mxu1 %v1033_v56  ;;  %v3764_v63 = vpop.f32.mrf.mxu0  ;;  %v953_v55 = vld [vmem:[#allocation7 + $0x460] sm:$0xff] }
 0x230   :  { %2872 = vmatprep.subr.mxu0 %v890_v57  ;;  %1268 = vmatpush1.msra.mxu1 %v1032_v59  ;;  %518 = vst [vmem:[#allocation17 + $0x58] sm:$0xff] %v3764_v63  ;;  %v1093_v56 = vld [vmem:[#allocation7 + $0x8c0] sm:$0xff]  ;;  %v998_v57 = vld [vmem:[#allocation7 + $0x5c8] sm:$0xff]  ;;  %v1092_v59 = vld [vmem:[#allocation7 + $0x8b8] sm:$0xff] }
 0x231   :  { %2873 = vmatpush3.msra.mxu0 %v842_v60  ;;  %1269 = vmatprep.subr.mxu1 %v1030_v61  ;;  %v3767_v5 = vpop.f32.mrf.mxu0  ;;  %v950_v60 = vld [vmem:[#allocation7 + $0x448] sm:$0xff]  ;;  %v995_v61 = vld [vmem:[#allocation7 + $0x5b0] sm:$0xff] }
 0x232   :  { %2874 = vmatprep.subr.mxu0 %v887_v62  ;;  %1270 = vmatpush1.msra.mxu1 %v1029_v0  ;;  %523 = vst [vmem:[#allocation17 + $0xb0] sm:$0xff] %v3767_v5  ;;  %v1089_v62 = vld [vmem:[#allocation7 + $0x8a0] sm:$0xff]  ;;  %v947_v0 = vld [vmem:[#allocation7 + $0x430] sm:$0xff] }
 0x233   :  { %2875 = vmatpush3.msra.mxu0 %v839_v2  ;;  %1271 = vmatprep.subr.mxu1 %v1027_v3  ;;  %v3770_v10 = vpop.f32.mrf.mxu0  ;;  %v992_v2 = vld [vmem:[#allocation7 + $0x598] sm:$0xff]  ;;  %v1086_v3 = vld [vmem:[#allocation7 + $0x888] sm:$0xff] }
 0x234   :  { %1319 = vmatprep.mubr.f32.mxu1 %v3764_v63  ;;  %2876 = vmatprep.subr.mxu0 %v884_v4  ;;  %524 = vst [vmem:[#allocation17 + $0xb8] sm:$0xff] %v3770_v10  ;;  %v944_v4 = vld [vmem:[#allocation7 + $0x418] sm:$0xff] }
 0x235   :  { %1272 = vmatpush1.msra.mxu1 %v1026_v6  ;;  %2877 = vmatpush3.msra.mxu0 %v836_v7  ;;  %v1084_v6 = vld [vmem:[#allocation7 + $0x878] sm:$0xff]  ;;  %v989_v7 = vld [vmem:[#allocation7 + $0x580] sm:$0xff] }
 0x236   :  { %1273 = vmatprep.subr.mxu1 %v1024_v8  ;;  %2878 = vmatprep.subr.mxu0 %v881_v9  ;;  %v941_v8 = vld [vmem:[#allocation7 + $0x400] sm:$0xff] }
 0x237   :  { %1274 = vmatpush1.msra.mxu1 %v1023_v11  ;;  %2879 = vmatpush3.msra.mxu0 %v833_v12  ;;  %v1081_v9 = vld [vmem:[#allocation7 + $0x860] sm:$0xff]  ;;  %v986_v11 = vld [vmem:[#allocation7 + $0x568] sm:$0xff] }
 0x238   :  { %1275 = vmatprep.subr.mxu1 %v1021_v43  ;;  %2880 = vmatprep.subr.mxu0 %v878_v15  ;;  %v938_v12 = vld [vmem:[#allocation7 + $0x3e8] sm:$0xff]  ;;  %v983_v15 = vld [vmem:[#allocation7 + $0x550] sm:$0xff] }
 0x239   :  { %1276 = vmatpush1.msra.mxu1 %v1020_v48  ;;  %2881 = vmatpush3.msra.mxu0 %v830_v16  ;;  %v1078_v43 = vld [vmem:[#allocation7 + $0x848] sm:$0xff]  ;;  %v1077_v48 = vld [vmem:[#allocation7 + $0x840] sm:$0xff]  ;;  %v935_v16 = vld [vmem:[#allocation7 + $0x3d0] sm:$0xff] }
 0x23a   :  { %1277 = vmatprep.subr.mxu1 %v1018_v17  ;;  %2882 = vmatprep.subr.mxu0 %v875_v20  ;;  %v1075_v17 = vld [vmem:[#allocation7 + $0x830] sm:$0xff]  ;;  %v980_v20 = vld [vmem:[#allocation7 + $0x538] sm:$0xff] }
 0x23b   :  { %1278 = vmatpush1.msra.mxu1 %v1017_v22  ;;  %2883 = vmatpush3.msra.mxu0 %v827_v23  ;;  %v1074_v22 = vld [vmem:[#allocation7 + $0x828] sm:$0xff]  ;;  %v932_v23 = vld [vmem:[#allocation7 + $0x3b8] sm:$0xff] }
 0x23c   :  { %1279 = vmatprep.subr.mxu1 %v1015_v24  ;;  %2884 = vmatprep.subr.mxu0 %v872_v25  ;;  %v1072_v24 = vld [vmem:[#allocation7 + $0x818] sm:$0xff]  ;;  %v977_v25 = vld [vmem:[#allocation7 + $0x520] sm:$0xff] }
 0x23d   :  { %1280 = vmatpush1.msra.mxu1 %v1014_v28  ;;  %2885 = vmatpush3.msra.mxu0 %v824_v29  ;;  %v1071_v28 = vld [vmem:[#allocation7 + $0x810] sm:$0xff]  ;;  %v929_v29 = vld [vmem:[#allocation7 + $0x3a0] sm:$0xff] }
 0x23e   :  { %1281 = vmatprep.subr.mxu1 %v1012_v32  ;;  %2886 = vmatprep.subr.mxu0 %v869_v33  ;;  %v1069_v32 = vld [vmem:[#allocation7 + $0x800] sm:$0xff]  ;;  %v974_v33 = vld [vmem:[#allocation7 + $0x508] sm:$0xff] }
 0x23f   :  { %1282 = vmatpush1.msra.mxu1 %v1011_v34  ;;  %2887 = vmatpush3.msra.mxu0 %v821_v35  ;;  %v1068_v34 = vld [vmem:[#allocation7 + $0x7f8] sm:$0xff]  ;;  %v926_v35 = vld [vmem:[#allocation7 + $0x388] sm:$0xff] }
 0x240   :  { %1283 = vmatprep.subr.mxu1 %v1009_v36  ;;  %2888 = vmatprep.subr.mxu0 %v866_v37  ;;  %v1066_v36 = vld [vmem:[#allocation7 + $0x7e8] sm:$0xff]  ;;  %v971_v37 = vld [vmem:[#allocation7 + $0x4f0] sm:$0xff] }
 0x241   :  { %1284 = vmatpush1.msra.mxu1 %v1008_v38  ;;  %2889 = vmatpush3.msra.mxu0 %v818_v40  ;;  %v1065_v38 = vld [vmem:[#allocation7 + $0x7e0] sm:$0xff]  ;;  %v923_v40 = vld [vmem:[#allocation7 + $0x370] sm:$0xff] }
 0x242   :  { %1285 = vmatprep.subr.mxu1 %v1006_v42  ;;  %2890 = vmatprep.subr.mxu0 %v863_v44  ;;  %v1063_v42 = vld [vmem:[#allocation7 + $0x7d0] sm:$0xff]  ;;  %v968_v44 = vld [vmem:[#allocation7 + $0x4d8] sm:$0xff] }
 0x243   :  { %1286 = vmatpush1.msra.mxu1 %v1005_v45  ;;  %2891 = vmatpush3.msra.mxu0 %v815_v46  ;;  %v1062_v45 = vld [vmem:[#allocation7 + $0x7c8] sm:$0xff]  ;;  %v920_v46 = vld [vmem:[#allocation7 + $0x358] sm:$0xff] }
 0x244   :  { %1287 = vmatprep.subr.mxu1 %v1099_v47  ;;  %1397 = vmatmul.mubr.f32.vlgmr.msra.gmra.mxu0 %v3733_v18  ;;  %v1090_v18 = vld [vmem:[#allocation7 + $0x8a8] sm:$0xff]  ;;  %v1060_v47 = vld [vmem:[#allocation7 + $0x7b8] sm:$0xff] }
 0x245   :  { %2898 = vmatprep.subr.mxu0 %v1004_v49  ;;  %1288 = vmatpush2.msra.mxu1 %v1098_v50  ;;  %v965_v49 = vld [vmem:[#allocation7 + $0x4c0] sm:$0xff]  ;;  %v1059_v50 = vld [vmem:[#allocation7 + $0x7b0] sm:$0xff] }
 0x246   :  { %1401 = vmatprep.mubr.f32.mxu0 %v3751_v30  ;;  %2899 = vmatpush3.msra.mxu0 %v956_v51  ;;  %v1087_v30 = vld [vmem:[#allocation7 + $0x890] sm:$0xff]  ;;  %v917_v51 = vld [vmem:[#allocation7 + $0x340] sm:$0xff] }
 0x247   :  { %1289 = vmatprep.subr.mxu1 %v1096_v52  ;;  %2900 = vmatprep.subr.mxu0 %v1001_v53  ;;  %v1057_v52 = vld [vmem:[#allocation7 + $0x7a0] sm:$0xff]  ;;  %v962_v53 = vld [vmem:[#allocation7 + $0x4a8] sm:$0xff] }
 0x248   :  { %1290 = vmatpush2.msra.mxu1 %v1095_v54  ;;  %2901 = vmatpush3.msra.mxu0 %v953_v55  ;;  %v1056_v54 = vld [vmem:[#allocation7 + $0x798] sm:$0xff]  ;;  %v914_v55 = vld [vmem:[#allocation7 + $0x328] sm:$0xff] }
 0x249   :  { %1291 = vmatprep.subr.mxu1 %v1093_v56  ;;  %1402 = vmatmul.mubr.f32.gmra.mxu0 %v3743_v26  ;;  %v1083_v26 = vld [vmem:[#allocation7 + $0x870] sm:$0xff]  ;;  %v1054_v56 = vld [vmem:[#allocation7 + $0x788] sm:$0xff] }
 0x24a   :  { %2902 = vmatprep.subr.mxu0 %v998_v57  ;;  %1292 = vmatpush2.msra.mxu1 %v1092_v59  ;;  %v959_v57 = vld [vmem:[#allocation7 + $0x490] sm:$0xff]  ;;  %v1053_v59 = vld [vmem:[#allocation7 + $0x780] sm:$0xff] }
 0x24b   :  { %2903 = vmatpush3.msra.mxu0 %v950_v60  ;;  %1471 = vmatprep.mubr.f32.mxu0 %v3739_v21  ;;  %v1080_v21 = vld [vmem:[#allocation7 + $0x858] sm:$0xff]  ;;  %v911_v60 = vld [vmem:[#allocation7 + $0x310] sm:$0xff] }
 0x24c   :  { %1293 = vmatprep.subr.mxu1 %v1090_v18  ;;  %2904 = vmatprep.subr.mxu0 %v995_v61  ;;  %v1100_v18 = vld [vmem:[#allocation7 + $0x8f8] sm:$0xff]  ;;  %v571_v61 = vld [vmem:[#allocation5 + $0x170] sm:$0xff] }
 0x24d   :  { %1294 = vmatpush2.msra.mxu1 %v1089_v62  ;;  %2905 = vmatpush3.msra.mxu0 %v947_v0  ;;  %v1052_v62 = vld [vmem:[#allocation7 + $0x778] sm:$0xff]  ;;  %v570_v0 = vld [vmem:[#allocation5 + $0x168] sm:$0xff] }
 0x24e   :  { %1295 = vmatprep.subr.mxu1 %v1087_v30  ;;  %2906 = vmatprep.subr.mxu0 %v992_v2  ;;  %v1097_v30 = vld [vmem:[#allocation7 + $0x8e0] sm:$0xff]  ;;  %v568_v2 = vld [vmem:[#allocation5 + $0x158] sm:$0xff] }
 0x24f   :  { %1296 = vmatpush2.msra.mxu1 %v1086_v3  ;;  %2907 = vmatpush3.msra.mxu0 %v944_v4  ;;  %v1049_v3 = vld [vmem:[#allocation7 + $0x760] sm:$0xff]  ;;  %v567_v4 = vld [vmem:[#allocation5 + $0x150] sm:$0xff] }
 0x250   :  { %1297 = vmatprep.subr.mxu1 %v1084_v6  ;;  %2908 = vmatprep.subr.mxu0 %v989_v7  ;;  %v1094_v6 = vld [vmem:[#allocation7 + $0x8c8] sm:$0xff]  ;;  %v565_v7 = vld [vmem:[#allocation5 + $0x140] sm:$0xff] }
 0x251   :  { %1298 = vmatpush2.msra.mxu1 %v1083_v26  ;;  %2909 = vmatpush3.msra.mxu0 %v941_v8  ;;  %v564_v26 = vld [vmem:[#allocation5 + $0x138] sm:$0xff]  ;;  %v1091_v8 = vld [vmem:[#allocation7 + $0x8b0] sm:$0xff] }
 0x252   :  { %1299 = vmatprep.subr.mxu1 %v1081_v9  ;;  %2910 = vmatprep.subr.mxu0 %v986_v11  ;;  %v1043_v9 = vld [vmem:[#allocation7 + $0x730] sm:$0xff]  ;;  %v561_v11 = vld [vmem:[#allocation5 + $0x120] sm:$0xff] }
 0x253   :  { %1300 = vmatpush2.msra.mxu1 %v1080_v21  ;;  %2911 = vmatpush3.msra.mxu0 %v938_v12  ;;  %v1088_v21 = vld [vmem:[#allocation7 + $0x898] sm:$0xff]  ;;  %v559_v12 = vld [vmem:[#allocation5 + $0x110] sm:$0xff] }
 0x254   :  { %1301 = vmatprep.subr.mxu1 %v1078_v43  ;;  %2912 = vmatprep.subr.mxu0 %v983_v15  ;;  %v1040_v43 = vld [vmem:[#allocation7 + $0x718] sm:$0xff]  ;;  %v558_v15 = vld [vmem:[#allocation5 + $0x108] sm:$0xff] }
 0x255   :  { %1302 = vmatpush2.msra.mxu1 %v1077_v48  ;;  %2913 = vmatpush3.msra.mxu0 %v935_v16  ;;  %v556_v48 = vld [vmem:[#allocation5 + $0xf8] sm:$0xff]  ;;  %v1037_v16 = vld [vmem:[#allocation7 + $0x700] sm:$0xff] }
 0x256   :  { %1303 = vmatprep.subr.mxu1 %v1075_v17  ;;  %2914 = vmatprep.subr.mxu0 %v980_v20  ;;  %v555_v17 = vld [vmem:[#allocation5 + $0xf0] sm:$0xff]  ;;  %v553_v20 = vld [vmem:[#allocation5 + $0xe0] sm:$0xff] }
 0x257   :  { %1304 = vmatpush2.msra.mxu1 %v1074_v22  ;;  %2915 = vmatpush3.msra.mxu0 %v932_v23  ;;  %v552_v22 = vld [vmem:[#allocation5 + $0xd8] sm:$0xff]  ;;  %v1079_v23 = vld [vmem:[#allocation7 + $0x850] sm:$0xff] }
 0x258   :  { %1305 = vmatprep.subr.mxu1 %v1072_v24  ;;  %2916 = vmatprep.subr.mxu0 %v977_v25  ;;  %v550_v24 = vld [vmem:[#allocation5 + $0xc8] sm:$0xff]  ;;  %v1031_v25 = vld [vmem:[#allocation7 + $0x6d0] sm:$0xff] }
 0x259   :  { %1306 = vmatpush2.msra.mxu1 %v1071_v28  ;;  %2917 = vmatpush3.msra.mxu0 %v929_v29  ;;  %v549_v28 = vld [vmem:[#allocation5 + $0xc0] sm:$0xff]  ;;  %v1076_v29 = vld [vmem:[#allocation7 + $0x838] sm:$0xff] }
 0x25a   :  { %1307 = vmatprep.subr.mxu1 %v1069_v32  ;;  %2918 = vmatprep.subr.mxu0 %v974_v33  ;;  %v547_v32 = vld [vmem:[#allocation5 + $0xb0] sm:$0xff]  ;;  %v1028_v33 = vld [vmem:[#allocation7 + $0x6b8] sm:$0xff] }
 0x25b   :  { %1308 = vmatpush2.msra.mxu1 %v1068_v34  ;;  %2919 = vmatpush3.msra.mxu0 %v926_v35  ;;  %v546_v34 = vld [vmem:[#allocation5 + $0xa8] sm:$0xff]  ;;  %v1073_v35 = vld [vmem:[#allocation7 + $0x820] sm:$0xff] }
 0x25c   :  { %1309 = vmatprep.subr.mxu1 %v1066_v36  ;;  %2920 = vmatprep.subr.mxu0 %v971_v37  ;;  %v544_v36 = vld [vmem:[#allocation5 + $0x98] sm:$0xff]  ;;  %v1025_v37 = vld [vmem:[#allocation7 + $0x6a0] sm:$0xff] }
 0x25d   :  { %1310 = vmatpush2.msra.mxu1 %v1065_v38  ;;  %2921 = vmatpush3.msra.mxu0 %v923_v40  ;;  %v543_v38 = vld [vmem:[#allocation5 + $0x90] sm:$0xff]  ;;  %v1070_v40 = vld [vmem:[#allocation7 + $0x808] sm:$0xff] }
 0x25e   :  { %1311 = vmatprep.subr.mxu1 %v1063_v42  ;;  %2922 = vmatprep.subr.mxu0 %v968_v44  ;;  %v541_v42 = vld [vmem:[#allocation5 + $0x80] sm:$0xff]  ;;  %v1022_v44 = vld [vmem:[#allocation7 + $0x688] sm:$0xff] }
 0x25f   :  { %1312 = vmatpush2.msra.mxu1 %v1062_v45  ;;  %2923 = vmatpush3.msra.mxu0 %v920_v46  ;;  %v540_v45 = vld [vmem:[#allocation5 + $0x78] sm:$0xff]  ;;  %v1067_v46 = vld [vmem:[#allocation7 + $0x7f0] sm:$0xff] }
 0x260   :  { %1313 = vmatprep.subr.mxu1 %v1060_v47  ;;  %2924 = vmatprep.subr.mxu0 %v965_v49  ;;  %v538_v47 = vld [vmem:[#allocation5 + $0x68] sm:$0xff]  ;;  %v1019_v49 = vld [vmem:[#allocation7 + $0x670] sm:$0xff] }
 0x261   :  { %1314 = vmatpush2.msra.mxu1 %v1059_v50  ;;  %2925 = vmatpush3.msra.mxu0 %v917_v51  ;;  %v537_v50 = vld [vmem:[#allocation5 + $0x60] sm:$0xff]  ;;  %v1064_v51 = vld [vmem:[#allocation7 + $0x7d8] sm:$0xff] }
 0x262   :  { %1315 = vmatprep.subr.mxu1 %v1057_v52  ;;  %2926 = vmatprep.subr.mxu0 %v962_v53  ;;  %v535_v52 = vld [vmem:[#allocation5 + $0x50] sm:$0xff]  ;;  %v1016_v53 = vld [vmem:[#allocation7 + $0x658] sm:$0xff] }
 0x263   :  { %1316 = vmatpush2.msra.mxu1 %v1056_v54  ;;  %2927 = vmatpush3.msra.mxu0 %v914_v55  ;;  %v534_v54 = vld [vmem:[#allocation5 + $0x48] sm:$0xff]  ;;  %v1061_v55 = vld [vmem:[#allocation7 + $0x7c0] sm:$0xff] }
 0x264   :  { %1317 = vmatprep.subr.mxu1 %v1054_v56  ;;  %2928 = vmatprep.subr.mxu0 %v959_v57  ;;  %v532_v56 = vld [vmem:[#allocation5 + $0x38] sm:$0xff]  ;;  %v1013_v57 = vld [vmem:[#allocation7 + $0x640] sm:$0xff] }
 0x265   :  { %1318 = vmatpush2.msra.mxu1 %v1053_v59  ;;  %2929 = vmatpush3.msra.mxu0 %v911_v60  ;;  %v531_v59 = vld [vmem:[#allocation5 + $0x30] sm:$0xff]  ;;  %v1058_v60 = vld [vmem:[#allocation7 + $0x7a8] sm:$0xff] }
 0x266   :  { %1320 = vmatmul.mubr.f32.vlgmr.msra.gmra.mxu1 %v3761_v58  ;;  %1472 = vmatmul.mubr.f32.vlgmr.msra.gmra.mxu0 %v3735_v19  ;;  %v1046_v19 = vld [vmem:[#allocation7 + $0x748] sm:$0xff] }
 0x267   :  { %2936 = vmatprep.subr.mxu1 %v1100_v18  ;;  %1557 = vmatprep.subr.mxu0 %v571_v61  ;;  %v529_v18 = vld [vmem:[#allocation5 + $0x20] sm:$0xff]  ;;  %v1010_v61 = vld [vmem:[#allocation7 + $0x628] sm:$0xff] }
 0x268   :  { %1325 = vmatprep.mubr.f32.mxu1 %v3770_v10  ;;  %1476 = vmatprep.mubr.f32.mxu0 %v3753_v31  ;;  %v562_v31 = vld [vmem:[#allocation5 + $0x128] sm:$0xff] }
 0x269   :  { %2937 = vmatpush3.msra.mxu1 %v1052_v62  ;;  %1558 = vmatpush1.msra.mxu0 %v570_v0  ;;  %v528_v62 = vld [vmem:[#allocation5 + $0x18] sm:$0xff]  ;;  %v1055_v0 = vld [vmem:[#allocation7 + $0x790] sm:$0xff] }
 0x26a   :  { %2938 = vmatprep.subr.mxu1 %v1097_v30  ;;  %1559 = vmatprep.subr.mxu0 %v568_v2  ;;  %v526_v30 = vld [vmem:[#allocation5 + $0x8] sm:$0xff]  ;;  %v1007_v2 = vld [vmem:[#allocation7 + $0x610] sm:$0xff] }
 0x26b   :  { %2939 = vmatpush3.msra.mxu1 %v1049_v3  ;;  %1560 = vmatpush1.msra.mxu0 %v567_v4  ;;  %v525_v3 = vld [vmem:[#allocation5] sm:$0xff]  ;;  %v619_v4 = vld [vmem:[#allocation5 + $0x2f0] sm:$0xff] }
 0x26c   :  { %1326 = vmatmul.mubr.f32.gmra.mxu1 %v3767_v5  ;;  %1477 = vmatmul.mubr.f32.gmra.mxu0 %v3745_v27  ;;  %v1085_v27 = vld [vmem:[#allocation7 + $0x880] sm:$0xff] }
 0x26d   :  { %2940 = vmatprep.subr.mxu1 %v1094_v6  ;;  %1561 = vmatprep.subr.mxu0 %v565_v7  ;;  %v667_v6 = vld [vmem:[#allocation5 + $0x470] sm:$0xff]  ;;  %v618_v7 = vld [vmem:[#allocation5 + $0x2e8] sm:$0xff] }
 0x26e   :  { %2941 = vmatpush3.msra.mxu1 %v1046_v19  ;;  %1546 = vmatprep.mubr.f32.mxu1 %v3764_v63  ;;  %v1082_v63 = vld [vmem:[#allocation7 + $0x868] sm:$0xff] }
 0x26f   :  { %1562 = vmatpush1.msra.mxu0 %v564_v26  ;;  %1621 = vmatprep.mubr.f32.mxu0 %v3727_v13  ;;  %v1034_v13 = vld [vmem:[#allocation7 + $0x6e8] sm:$0xff]  ;;  %v616_v26 = vld [vmem:[#allocation5 + $0x2d8] sm:$0xff] }
 0x270   :  { %2942 = vmatprep.subr.mxu1 %v1091_v8  ;;  %1563 = vmatprep.subr.mxu0 %v562_v31  ;;  %v666_v19 = vld [vmem:[#allocation5 + $0x468] sm:$0xff]  ;;  %v664_v8 = vld [vmem:[#allocation5 + $0x458] sm:$0xff]  ;;  %v615_v31 = vld [vmem:[#allocation5 + $0x2d0] sm:$0xff] }
 0x271   :  { %2943 = vmatpush3.msra.mxu1 %v1043_v9  ;;  %1564 = vmatpush1.msra.mxu0 %v561_v11  ;;  %v663_v9 = vld [vmem:[#allocation5 + $0x450] sm:$0xff]  ;;  %v613_v11 = vld [vmem:[#allocation5 + $0x2c0] sm:$0xff] }
 0x272   :  { %2944 = vmatprep.subr.mxu1 %v1088_v21  ;;  %1565 = vmatprep.subr.mxu0 %v559_v12  ;;  %v661_v21 = vld [vmem:[#allocation5 + $0x440] sm:$0xff]  ;;  %v612_v12 = vld [vmem:[#allocation5 + $0x2b8] sm:$0xff] }
 0x273   :  { %2945 = vmatpush3.msra.mxu1 %v1040_v43  ;;  %1566 = vmatpush1.msra.mxu0 %v558_v15  ;;  %v660_v43 = vld [vmem:[#allocation5 + $0x438] sm:$0xff]  ;;  %v658_v15 = vld [vmem:[#allocation5 + $0x428] sm:$0xff] }
 0x274   :  { %2946 = vmatprep.subr.mxu1 %v1085_v27  ;;  %1567 = vmatprep.subr.mxu0 %v556_v48  ;;  %v657_v27 = vld [vmem:[#allocation5 + $0x420] sm:$0xff]  ;;  %v607_v48 = vld [vmem:[#allocation5 + $0x290] sm:$0xff] }
 0x275   :  { %2947 = vmatpush3.msra.mxu1 %v1037_v16  ;;  %1568 = vmatpush1.msra.mxu0 %v555_v17  ;;  %v655_v16 = vld [vmem:[#allocation5 + $0x410] sm:$0xff]  ;;  %v606_v17 = vld [vmem:[#allocation5 + $0x288] sm:$0xff] }
 0x276   :  { %2948 = vmatprep.subr.mxu1 %v1082_v63  ;;  %1569 = vmatprep.subr.mxu0 %v553_v20  ;;  %v654_v63 = vld [vmem:[#allocation5 + $0x408] sm:$0xff]  ;;  %v604_v20 = vld [vmem:[#allocation5 + $0x278] sm:$0xff] }
 0x277   :  { %2949 = vmatpush3.msra.mxu1 %v1034_v13  ;;  %1570 = vmatpush1.msra.mxu0 %v552_v22  ;;  %v603_v13 = vld [vmem:[#allocation5 + $0x270] sm:$0xff] }
 0x278   :  { %2950 = vmatprep.subr.mxu1 %v1079_v23  ;;  %1571 = vmatprep.subr.mxu0 %v550_v24  ;;  %v651_v22 = vld [vmem:[#allocation5 + $0x3f0] sm:$0xff]  ;;  %v601_v23 = vld [vmem:[#allocation5 + $0x260] sm:$0xff] }
 0x279   :  { %2951 = vmatpush3.msra.mxu1 %v1031_v25  ;;  %1572 = vmatpush1.msra.mxu0 %v549_v28  ;;  %v649_v24 = vld [vmem:[#allocation5 + $0x3e0] sm:$0xff]  ;;  %v648_v25 = vld [vmem:[#allocation5 + $0x3d8] sm:$0xff]  ;;  %v598_v28 = vld [vmem:[#allocation5 + $0x248] sm:$0xff] }
 0x27a   :  { %2952 = vmatprep.subr.mxu1 %v1076_v29  ;;  %1573 = vmatprep.subr.mxu0 %v547_v32  ;;  %v646_v29 = vld [vmem:[#allocation5 + $0x3c8] sm:$0xff]  ;;  %v597_v32 = vld [vmem:[#allocation5 + $0x240] sm:$0xff] }
 0x27b   :  { %2953 = vmatpush3.msra.mxu1 %v1028_v33  ;;  %1574 = vmatpush1.msra.mxu0 %v546_v34  ;;  %v645_v33 = vld [vmem:[#allocation5 + $0x3c0] sm:$0xff]  ;;  %v595_v34 = vld [vmem:[#allocation5 + $0x230] sm:$0xff] }
 0x27c   :  { %2954 = vmatprep.subr.mxu1 %v1073_v35  ;;  %1575 = vmatprep.subr.mxu0 %v544_v36  ;;  %v643_v35 = vld [vmem:[#allocation5 + $0x3b0] sm:$0xff]  ;;  %v594_v36 = vld [vmem:[#allocation5 + $0x228] sm:$0xff] }
 0x27d   :  { %2955 = vmatpush3.msra.mxu1 %v1025_v37  ;;  %1576 = vmatpush1.msra.mxu0 %v543_v38  ;;  %v642_v37 = vld [vmem:[#allocation5 + $0x3a8] sm:$0xff]  ;;  %v592_v38 = vld [vmem:[#allocation5 + $0x218] sm:$0xff] }
 0x27e   :  { %2956 = vmatprep.subr.mxu1 %v1070_v40  ;;  %1577 = vmatprep.subr.mxu0 %v541_v42  ;;  %v640_v40 = vld [vmem:[#allocation5 + $0x398] sm:$0xff]  ;;  %v591_v42 = vld [vmem:[#allocation5 + $0x210] sm:$0xff] }
 0x27f   :  { %2957 = vmatpush3.msra.mxu1 %v1022_v44  ;;  %1578 = vmatpush1.msra.mxu0 %v540_v45  ;;  %v639_v44 = vld [vmem:[#allocation5 + $0x390] sm:$0xff]  ;;  %v589_v45 = vld [vmem:[#allocation5 + $0x200] sm:$0xff] }
 0x280   :  { %2958 = vmatprep.subr.mxu1 %v1067_v46  ;;  %1579 = vmatprep.subr.mxu0 %v538_v47  ;;  %v637_v46 = vld [vmem:[#allocation5 + $0x380] sm:$0xff]  ;;  %v588_v47 = vld [vmem:[#allocation5 + $0x1f8] sm:$0xff] }
 0x281   :  { %2959 = vmatpush3.msra.mxu1 %v1019_v49  ;;  %1580 = vmatpush1.msra.mxu0 %v537_v50  ;;  %v636_v49 = vld [vmem:[#allocation5 + $0x378] sm:$0xff]  ;;  %v586_v50 = vld [vmem:[#allocation5 + $0x1e8] sm:$0xff] }
 0x282   :  { %2960 = vmatprep.subr.mxu1 %v1064_v51  ;;  %1581 = vmatprep.subr.mxu0 %v535_v52  ;;  %v634_v51 = vld [vmem:[#allocation5 + $0x368] sm:$0xff]  ;;  %v585_v52 = vld [vmem:[#allocation5 + $0x1e0] sm:$0xff] }
 0x283   :  { %2961 = vmatpush3.msra.mxu1 %v1016_v53  ;;  %1582 = vmatpush1.msra.mxu0 %v534_v54  ;;  %v633_v53 = vld [vmem:[#allocation5 + $0x360] sm:$0xff]  ;;  %v583_v54 = vld [vmem:[#allocation5 + $0x1d0] sm:$0xff] }
 0x284   :  { %2962 = vmatprep.subr.mxu1 %v1061_v55  ;;  %1583 = vmatprep.subr.mxu0 %v532_v56  ;;  %v631_v55 = vld [vmem:[#allocation5 + $0x350] sm:$0xff]  ;;  %v582_v56 = vld [vmem:[#allocation5 + $0x1c8] sm:$0xff] }
 0x285   :  { %2963 = vmatpush3.msra.mxu1 %v1013_v57  ;;  %1584 = vmatpush1.msra.mxu0 %v531_v59  ;;  %v630_v57 = vld [vmem:[#allocation5 + $0x348] sm:$0xff]  ;;  %v580_v59 = vld [vmem:[#allocation5 + $0x1b8] sm:$0xff] }
 0x286   :  { %2964 = vmatprep.subr.mxu1 %v1058_v60  ;;  %1585 = vmatprep.subr.mxu0 %v529_v18  ;;  %v628_v60 = vld [vmem:[#allocation5 + $0x338] sm:$0xff]  ;;  %v579_v18 = vld [vmem:[#allocation5 + $0x1b0] sm:$0xff] }
 0x287   :  { %2965 = vmatpush3.msra.mxu1 %v1010_v61  ;;  %1586 = vmatpush1.msra.mxu0 %v528_v62  ;;  %v627_v61 = vld [vmem:[#allocation5 + $0x330] sm:$0xff]  ;;  %v577_v62 = vld [vmem:[#allocation5 + $0x1a0] sm:$0xff] }
 0x288   :  { %2966 = vmatprep.subr.mxu1 %v1055_v0  ;;  %1587 = vmatprep.subr.mxu0 %v526_v30  ;;  %v625_v0 = vld [vmem:[#allocation5 + $0x320] sm:$0xff]  ;;  %v576_v30 = vld [vmem:[#allocation5 + $0x198] sm:$0xff] }
 0x289   :  { %2967 = vmatpush3.msra.mxu1 %v1007_v2  ;;  %1588 = vmatpush1.msra.mxu0 %v525_v3  ;;  %v624_v2 = vld [vmem:[#allocation5 + $0x318] sm:$0xff]  ;;  %v574_v3 = vld [vmem:[#allocation5 + $0x188] sm:$0xff] }
 0x28a   :  { %1547 = vmatmul.mubr.f32.vlgmr.msra.gmra.mxu1 %v3761_v58  ;;  %1589 = vmatprep.subr.mxu0 %v619_v4  ;;  %v610_v58 = vld [vmem:[#allocation5 + $0x2a8] sm:$0xff] }
 0x28b   :  { %1634 = vmatprep.subr.mxu1 %v667_v6  ;;  %1551 = vmatprep.mubr.f32.mxu1 %v3770_v10  ;;  %v609_v10 = vld [vmem:[#allocation5 + $0x2a0] sm:$0xff]  ;;  %v622_v4 = vld [vmem:[#allocation5 + $0x308] sm:$0xff] }
 0x28c   :  { %1590 = vmatpush2.msra.mxu0 %v618_v7  ;;  %1635 = vmatpush1.msra.mxu1 %v666_v19  ;;  %v573_v6 = vld [vmem:[#allocation5 + $0x180] sm:$0xff]  ;;  %v715_v19 = vld [vmem:[#allocation5 + $0x5f0] sm:$0xff] }
 0x28d   :  { %1591 = vmatprep.subr.mxu0 %v616_v26  ;;  %1636 = vmatprep.subr.mxu1 %v664_v8  ;;  %v621_v7 = vld [vmem:[#allocation5 + $0x300] sm:$0xff]  ;;  %v763_v26 = vld [vmem:[#allocation5 + $0x770] sm:$0xff]  ;;  %v714_v8 = vld [vmem:[#allocation5 + $0x5e8] sm:$0xff] }
 0x28e   :  { %1592 = vmatpush2.msra.mxu0 %v615_v31  ;;  %1637 = vmatpush1.msra.mxu1 %v663_v9  ;;  %v762_v31 = vld [vmem:[#allocation5 + $0x768] sm:$0xff]  ;;  %v3790_v9 = vld [vmem:[#allocation17] sm:$0xff] }
 0x28f   :  { %1552 = vmatmul.mubr.f32.gmra.mxu1 %v3767_v5  ;;  %1593 = vmatprep.subr.mxu0 %v613_v11  ;;  %v652_v5 = vld [vmem:[#allocation5 + $0x3f8] sm:$0xff] }
 0x290   :  { %1638 = vmatprep.subr.mxu1 %v661_v21  ;;  %1594 = vmatpush2.msra.mxu0 %v612_v12  ;;  %v712_v11 = vld [vmem:[#allocation5 + $0x5d8] sm:$0xff]  ;;  %v3793_v12 = vld [vmem:[#allocation17 + $0x68] sm:$0xff] }
 0x291   :  { %1639 = vmatpush1.msra.mxu1 %v660_v43  ;;  %1698 = vmatprep.mubr.f32.mxu1 %v3729_v14  ;;  %v600_v14 = vld [vmem:[#allocation5 + $0x258] sm:$0xff]  ;;  %v711_v43 = vld [vmem:[#allocation5 + $0x5d0] sm:$0xff] }
 0x292   :  { %1595 = vmatprep.subr.mxu0 %v610_v58  ;;  %1640 = vmatprep.subr.mxu1 %v658_v15  ;;  %v760_v21 = vld [vmem:[#allocation5 + $0x758] sm:$0xff]  ;;  %v759_v58 = vld [vmem:[#allocation5 + $0x750] sm:$0xff]  ;;  %v709_v15 = vld [vmem:[#allocation5 + $0x5c0] sm:$0xff] }
 0x293   :  { %1596 = vmatpush2.msra.mxu0 %v609_v10  ;;  %1641 = vmatpush1.msra.mxu1 %v657_v27  ;;  %v757_v10 = vld [vmem:[#allocation5 + $0x740] sm:$0xff]  ;;  %v708_v27 = vld [vmem:[#allocation5 + $0x5b8] sm:$0xff] }
 0x294   :  { %1597 = vmatprep.subr.mxu0 %v607_v48  ;;  %1642 = vmatprep.subr.mxu1 %v655_v16  ;;  %v756_v48 = vld [vmem:[#allocation5 + $0x738] sm:$0xff] }
 0x295   :  { %1598 = vmatpush2.msra.mxu0 %v606_v17  ;;  %1643 = vmatpush1.msra.mxu1 %v654_v63  ;;  %v3796_v16 = vld [vmem:[#allocation17 + $0x60] sm:$0xff]  ;;  %v706_v17 = vld [vmem:[#allocation5 + $0x5a8] sm:$0xff] }
 0x296   :  { %1599 = vmatprep.subr.mxu0 %v604_v20  ;;  %1644 = vmatprep.subr.mxu1 %v652_v5  ;;  %v754_v63 = vld [vmem:[#allocation5 + $0x728] sm:$0xff]  ;;  %v705_v20 = vld [vmem:[#allocation5 + $0x5a0] sm:$0xff] }
 0x297   :  { %1600 = vmatpush2.msra.mxu0 %v603_v13  ;;  %1645 = vmatpush1.msra.mxu1 %v651_v22  ;;  %v753_v5 = vld [vmem:[#allocation5 + $0x720] sm:$0xff]  ;;  %v703_v22 = vld [vmem:[#allocation5 + $0x590] sm:$0xff] }
 0x298   :  { %1601 = vmatprep.subr.mxu0 %v601_v23  ;;  %1646 = vmatprep.subr.mxu1 %v649_v24  ;;  %v3799_v13 = vld [vmem:[#allocation17 + $0x28] sm:$0xff]  ;;  %v751_v23 = vld [vmem:[#allocation5 + $0x710] sm:$0xff] }
 0x299   :  { %1602 = vmatpush2.msra.mxu0 %v600_v14  ;;  %1647 = vmatpush1.msra.mxu1 %v648_v25  ;;  %v702_v24 = vld [vmem:[#allocation5 + $0x588] sm:$0xff]  ;;  %v700_v25 = vld [vmem:[#allocation5 + $0x578] sm:$0xff] }
 0x29a   :  { %1603 = vmatprep.subr.mxu0 %v598_v28  ;;  %1648 = vmatprep.subr.mxu1 %v646_v29  ;;  %v750_v14 = vld [vmem:[#allocation5 + $0x708] sm:$0xff]  ;;  %v748_v28 = vld [vmem:[#allocation5 + $0x6f8] sm:$0xff]  ;;  %v699_v29 = vld [vmem:[#allocation5 + $0x570] sm:$0xff] }
 0x29b   :  { %1604 = vmatpush2.msra.mxu0 %v597_v32  ;;  %1649 = vmatpush1.msra.mxu1 %v645_v33  ;;  %v747_v32 = vld [vmem:[#allocation5 + $0x6f0] sm:$0xff]  ;;  %v697_v33 = vld [vmem:[#allocation5 + $0x560] sm:$0xff] }
 0x29c   :  { %1605 = vmatprep.subr.mxu0 %v595_v34  ;;  %1650 = vmatprep.subr.mxu1 %v643_v35  ;;  %v745_v34 = vld [vmem:[#allocation5 + $0x6e0] sm:$0xff]  ;;  %v696_v35 = vld [vmem:[#allocation5 + $0x558] sm:$0xff] }
 0x29d   :  { %1606 = vmatpush2.msra.mxu0 %v594_v36  ;;  %1651 = vmatpush1.msra.mxu1 %v642_v37  ;;  %v744_v36 = vld [vmem:[#allocation5 + $0x6d8] sm:$0xff]  ;;  %v694_v37 = vld [vmem:[#allocation5 + $0x548] sm:$0xff] }
 0x29e   :  { %1607 = vmatprep.subr.mxu0 %v592_v38  ;;  %1652 = vmatprep.subr.mxu1 %v640_v40  ;;  %v742_v38 = vld [vmem:[#allocation5 + $0x6c8] sm:$0xff]  ;;  %v693_v40 = vld [vmem:[#allocation5 + $0x540] sm:$0xff] }
 0x29f   :  { %1608 = vmatpush2.msra.mxu0 %v591_v42  ;;  %1653 = vmatpush1.msra.mxu1 %v639_v44  ;;  %v741_v42 = vld [vmem:[#allocation5 + $0x6c0] sm:$0xff]  ;;  %v691_v44 = vld [vmem:[#allocation5 + $0x530] sm:$0xff] }
 0x2a0   :  { %1609 = vmatprep.subr.mxu0 %v589_v45  ;;  %1654 = vmatprep.subr.mxu1 %v637_v46  ;;  %v739_v45 = vld [vmem:[#allocation5 + $0x6b0] sm:$0xff]  ;;  %v690_v46 = vld [vmem:[#allocation5 + $0x528] sm:$0xff] }
 0x2a1   :  { %1610 = vmatpush2.msra.mxu0 %v588_v47  ;;  %1655 = vmatpush1.msra.mxu1 %v636_v49  ;;  %v738_v47 = vld [vmem:[#allocation5 + $0x6a8] sm:$0xff]  ;;  %v688_v49 = vld [vmem:[#allocation5 + $0x518] sm:$0xff] }
 0x2a2   :  { %1611 = vmatprep.subr.mxu0 %v586_v50  ;;  %1656 = vmatprep.subr.mxu1 %v634_v51  ;;  %v736_v50 = vld [vmem:[#allocation5 + $0x698] sm:$0xff]  ;;  %v687_v51 = vld [vmem:[#allocation5 + $0x510] sm:$0xff] }
 0x2a3   :  { %1612 = vmatpush2.msra.mxu0 %v585_v52  ;;  %1657 = vmatpush1.msra.mxu1 %v633_v53  ;;  %v735_v52 = vld [vmem:[#allocation5 + $0x690] sm:$0xff]  ;;  %v685_v53 = vld [vmem:[#allocation5 + $0x500] sm:$0xff] }
 0x2a4   :  { %1613 = vmatprep.subr.mxu0 %v583_v54  ;;  %1658 = vmatprep.subr.mxu1 %v631_v55  ;;  %v733_v54 = vld [vmem:[#allocation5 + $0x680] sm:$0xff]  ;;  %v684_v55 = vld [vmem:[#allocation5 + $0x4f8] sm:$0xff] }
 0x2a5   :  { %1614 = vmatpush2.msra.mxu0 %v582_v56  ;;  %1659 = vmatpush1.msra.mxu1 %v630_v57  ;;  %v732_v56 = vld [vmem:[#allocation5 + $0x678] sm:$0xff]  ;;  %v682_v57 = vld [vmem:[#allocation5 + $0x4e8] sm:$0xff] }
 0x2a6   :  { %1615 = vmatprep.subr.mxu0 %v580_v59  ;;  %1660 = vmatprep.subr.mxu1 %v628_v60  ;;  %v730_v59 = vld [vmem:[#allocation5 + $0x668] sm:$0xff]  ;;  %v681_v60 = vld [vmem:[#allocation5 + $0x4e0] sm:$0xff] }
 0x2a7   :  { %1616 = vmatpush2.msra.mxu0 %v579_v18  ;;  %1661 = vmatpush1.msra.mxu1 %v627_v61  ;;  %v729_v18 = vld [vmem:[#allocation5 + $0x660] sm:$0xff]  ;;  %v679_v61 = vld [vmem:[#allocation5 + $0x4d0] sm:$0xff] }
 0x2a8   :  { %1617 = vmatprep.subr.mxu0 %v577_v62  ;;  %1662 = vmatprep.subr.mxu1 %v625_v0  ;;  %v727_v62 = vld [vmem:[#allocation5 + $0x650] sm:$0xff]  ;;  %v678_v0 = vld [vmem:[#allocation5 + $0x4c8] sm:$0xff] }
 0x2a9   :  { %1618 = vmatpush2.msra.mxu0 %v576_v30  ;;  %1663 = vmatpush1.msra.mxu1 %v624_v2  ;;  %v726_v30 = vld [vmem:[#allocation5 + $0x648] sm:$0xff]  ;;  %v676_v2 = vld [vmem:[#allocation5 + $0x4b8] sm:$0xff] }
 0x2aa   :  { %1619 = vmatprep.subr.mxu0 %v574_v3  ;;  %1664 = vmatprep.subr.mxu1 %v622_v4  ;;  %v724_v3 = vld [vmem:[#allocation5 + $0x638] sm:$0xff]  ;;  %v675_v4 = vld [vmem:[#allocation5 + $0x4b0] sm:$0xff] }
 0x2ab   :  { %1620 = vmatpush2.msra.mxu0 %v573_v6  ;;  %1665 = vmatpush1.msra.mxu1 %v621_v7  ;;  %v723_v6 = vld [vmem:[#allocation5 + $0x630] sm:$0xff]  ;;  %v673_v7 = vld [vmem:[#allocation5 + $0x4a0] sm:$0xff] }
 0x2ac   :  { %1622 = vmatmul.mubr.f32.vlgmr.msra.gmra.mxu0 %v3790_v9  ;;  %1666 = vmatprep.subr.mxu1 %v715_v19  ;;  %v721_v19 = vld [vmem:[#allocation5 + $0x620] sm:$0xff] }
 0x2ad   :  { %1711 = vmatprep.subr.mxu0 %v763_v26  ;;  %1627 = vmatprep.mubr.f32.mxu0 %v3793_v12  ;;  %v672_v26 = vld [vmem:[#allocation5 + $0x498] sm:$0xff] }
 0x2ae   :  { %1667 = vmatpush2.msra.mxu1 %v714_v8  ;;  %1712 = vmatpush1.msra.mxu0 %v762_v31  ;;  %v720_v8 = vld [vmem:[#allocation5 + $0x618] sm:$0xff]  ;;  %v670_v31 = vld [vmem:[#allocation5 + $0x488] sm:$0xff] }
 0x2af   :  { %1668 = vmatprep.subr.mxu1 %v712_v11  ;;  %1713 = vmatprep.subr.mxu0 %v760_v21  ;;  %v718_v11 = vld [vmem:[#allocation5 + $0x608] sm:$0xff]  ;;  %v669_v21 = vld [vmem:[#allocation5 + $0x480] sm:$0xff] }
 0x2b0   :  { %1669 = vmatpush2.msra.mxu1 %v711_v43  ;;  %1714 = vmatpush1.msra.mxu0 %v759_v58  ;;  %v717_v43 = vld [vmem:[#allocation5 + $0x600] sm:$0xff]  ;;  %v811_v58 = vld [vmem:[#allocation5 + $0x8f0] sm:$0xff] }
 0x2b1   :  { %1628 = vmatmul.mubr.f32.gmra.mxu0 %v3796_v16  ;;  %1670 = vmatprep.subr.mxu1 %v709_v15  ;;  %v620_v15 = vld [vmem:[#allocation5 + $0x2f8] sm:$0xff] }
 0x2b2   :  { %1715 = vmatprep.subr.mxu0 %v757_v10  ;;  %1671 = vmatpush2.msra.mxu1 %v708_v27  ;;  %v810_v10 = vld [vmem:[#allocation5 + $0x8e8] sm:$0xff]  ;;  %v572_v27 = vld [vmem:[#allocation5 + $0x178] sm:$0xff] }
 0x2b3   :  { %1716 = vmatpush1.msra.mxu0 %v756_v48  ;;  %1775 = vmatprep.mubr.f32.mxu0 %v3799_v13  ;;  %v3802_v48 = vld [vmem:[#allocation17 + $0x10] sm:$0xff] }
 0x2b4   :  { %1672 = vmatprep.subr.mxu1 %v706_v17  ;;  %1717 = vmatprep.subr.mxu0 %v754_v63  ;;  %v808_v17 = vld [vmem:[#allocation5 + $0x8d8] sm:$0xff]  ;;  %v617_v63 = vld [vmem:[#allocation5 + $0x2e0] sm:$0xff] }
 0x2b5   :  { %1673 = vmatpush2.msra.mxu1 %v705_v20  ;;  %1718 = vmatpush1.msra.mxu0 %v753_v5  ;;  %v3805_v20 = vld [vmem:[#allocation17 + $0x78] sm:$0xff] }
 0x2b6   :  { %1674 = vmatprep.subr.mxu1 %v703_v22  ;;  %1719 = vmatprep.subr.mxu0 %v751_v23  ;;  %v807_v5 = vld [vmem:[#allocation5 + $0x8d0] sm:$0xff]  ;;  %v569_v22 = vld [vmem:[#allocation5 + $0x160] sm:$0xff] }
 0x2b7   :  { %1675 = vmatpush2.msra.mxu1 %v702_v24  ;;  %1720 = vmatpush1.msra.mxu0 %v750_v14  ;;  %v805_v23 = vld [vmem:[#allocation5 + $0x8c0] sm:$0xff]  ;;  %v614_v24 = vld [vmem:[#allocation5 + $0x2c8] sm:$0xff]  ;;  %v804_v14 = vld [vmem:[#allocation5 + $0x8b8] sm:$0xff] }
 0x2b8   :  { %1676 = vmatprep.subr.mxu1 %v700_v25  ;;  %1721 = vmatprep.subr.mxu0 %v748_v28  ;;  %v566_v25 = vld [vmem:[#allocation5 + $0x148] sm:$0xff] }
 0x2b9   :  { %1677 = vmatpush2.msra.mxu1 %v699_v29  ;;  %1722 = vmatpush1.msra.mxu0 %v747_v32  ;;  %v3808_v28 = vld [vmem:[#allocation17 + $0x70] sm:$0xff] }
 0x2ba   :  { %1678 = vmatprep.subr.mxu1 %v697_v33  ;;  %1723 = vmatprep.subr.mxu0 %v745_v34  ;;  %v802_v29 = vld [vmem:[#allocation5 + $0x8a8] sm:$0xff]  ;;  %v611_v32 = vld [vmem:[#allocation5 + $0x2b0] sm:$0xff]  ;;  %v801_v33 = vld [vmem:[#allocation5 + $0x8a0] sm:$0xff] }
 0x2bb   :  { %1679 = vmatpush2.msra.mxu1 %v696_v35  ;;  %1724 = vmatpush1.msra.mxu0 %v744_v36  ;;  %v563_v34 = vld [vmem:[#allocation5 + $0x130] sm:$0xff]  ;;  %v3315_v35 = vld [vmem:[#allocation17 + $0x8] sm:$0xff] }
 0x2bc   :  { %1680 = vmatprep.subr.mxu1 %v694_v37  ;;  %1725 = vmatprep.subr.mxu0 %v742_v38  ;;  %v799_v36 = vld [vmem:[#allocation5 + $0x890] sm:$0xff]  ;;  %v608_v37 = vld [vmem:[#allocation5 + $0x298] sm:$0xff]  ;;  %v798_v38 = vld [vmem:[#allocation5 + $0x888] sm:$0xff] }
 0x2bd   :  { %1681 = vmatpush2.msra.mxu1 %v693_v40  ;;  %1726 = vmatpush1.msra.mxu0 %v741_v42  ;;  %v560_v40 = vld [vmem:[#allocation5 + $0x118] sm:$0xff] }
 0x2be   :  { %1682 = vmatprep.subr.mxu1 %v691_v44  ;;  %1727 = vmatprep.subr.mxu0 %v739_v45  ;;  %v796_v42 = vld [vmem:[#allocation5 + $0x878] sm:$0xff]  ;;  %v605_v44 = vld [vmem:[#allocation5 + $0x280] sm:$0xff]  ;;  %v795_v45 = vld [vmem:[#allocation5 + $0x870] sm:$0xff] }
 0x2bf   :  { %1683 = vmatpush2.msra.mxu1 %v690_v46  ;;  %1728 = vmatpush1.msra.mxu0 %v738_v47  ;;  %v557_v46 = vld [vmem:[#allocation5 + $0x100] sm:$0xff] }
 0x2c0   :  { %1684 = vmatprep.subr.mxu1 %v688_v49  ;;  %1729 = vmatprep.subr.mxu0 %v736_v50  ;;  %v793_v47 = vld [vmem:[#allocation5 + $0x860] sm:$0xff]  ;;  %v602_v49 = vld [vmem:[#allocation5 + $0x268] sm:$0xff]  ;;  %v792_v50 = vld [vmem:[#allocation5 + $0x858] sm:$0xff] }
 0x2c1   :  { %1685 = vmatpush2.msra.mxu1 %v687_v51  ;;  %1730 = vmatpush1.msra.mxu0 %v735_v52  ;;  %v554_v51 = vld [vmem:[#allocation5 + $0xe8] sm:$0xff] }
 0x2c2   :  { %1686 = vmatprep.subr.mxu1 %v685_v53  ;;  %1731 = vmatprep.subr.mxu0 %v733_v54  ;;  %v790_v52 = vld [vmem:[#allocation5 + $0x848] sm:$0xff]  ;;  %v599_v53 = vld [vmem:[#allocation5 + $0x250] sm:$0xff]  ;;  %v789_v54 = vld [vmem:[#allocation5 + $0x840] sm:$0xff] }
 0x2c3   :  { %1687 = vmatpush2.msra.mxu1 %v684_v55  ;;  %1732 = vmatpush1.msra.mxu0 %v732_v56  ;;  %v551_v55 = vld [vmem:[#allocation5 + $0xd0] sm:$0xff] }
 0x2c4   :  { %1688 = vmatprep.subr.mxu1 %v682_v57  ;;  %1733 = vmatprep.subr.mxu0 %v730_v59  ;;  %v787_v56 = vld [vmem:[#allocation5 + $0x830] sm:$0xff]  ;;  %v596_v57 = vld [vmem:[#allocation5 + $0x238] sm:$0xff]  ;;  %v786_v59 = vld [vmem:[#allocation5 + $0x828] sm:$0xff] }
 0x2c5   :  { %1689 = vmatpush2.msra.mxu1 %v681_v60  ;;  %1734 = vmatpush1.msra.mxu0 %v729_v18  ;;  %v548_v60 = vld [vmem:[#allocation5 + $0xb8] sm:$0xff] }
 0x2c6   :  { %1690 = vmatprep.subr.mxu1 %v679_v61  ;;  %1735 = vmatprep.subr.mxu0 %v727_v62  ;;  %v784_v18 = vld [vmem:[#allocation5 + $0x818] sm:$0xff]  ;;  %v593_v61 = vld [vmem:[#allocation5 + $0x220] sm:$0xff]  ;;  %v783_v62 = vld [vmem:[#allocation5 + $0x810] sm:$0xff] }
 0x2c7   :  { %1691 = vmatpush2.msra.mxu1 %v678_v0  ;;  %1736 = vmatpush1.msra.mxu0 %v726_v30  ;;  %v545_v0 = vld [vmem:[#allocation5 + $0xa0] sm:$0xff] }
 0x2c8   :  { %1692 = vmatprep.subr.mxu1 %v676_v2  ;;  %1737 = vmatprep.subr.mxu0 %v724_v3  ;;  %v781_v30 = vld [vmem:[#allocation5 + $0x800] sm:$0xff]  ;;  %v590_v2 = vld [vmem:[#allocation5 + $0x208] sm:$0xff]  ;;  %v780_v3 = vld [vmem:[#allocation5 + $0x7f8] sm:$0xff] }
 0x2c9   :  { %1693 = vmatpush2.msra.mxu1 %v675_v4  ;;  %1738 = vmatpush1.msra.mxu0 %v723_v6  ;;  %v542_v4 = vld [vmem:[#allocation5 + $0x88] sm:$0xff] }
 0x2ca   :  { %1694 = vmatprep.subr.mxu1 %v673_v7  ;;  %1739 = vmatprep.subr.mxu0 %v721_v19  ;;  %v778_v6 = vld [vmem:[#allocation5 + $0x7e8] sm:$0xff]  ;;  %v587_v7 = vld [vmem:[#allocation5 + $0x1f0] sm:$0xff]  ;;  %v777_v19 = vld [vmem:[#allocation5 + $0x7e0] sm:$0xff] }
 0x2cb   :  { %1695 = vmatpush2.msra.mxu1 %v672_v26  ;;  %1740 = vmatpush1.msra.mxu0 %v720_v8  ;;  %v539_v26 = vld [vmem:[#allocation5 + $0x70] sm:$0xff] }
 0x2cc   :  { %1696 = vmatprep.subr.mxu1 %v670_v31  ;;  %1741 = vmatprep.subr.mxu0 %v718_v11  ;;  %v775_v8 = vld [vmem:[#allocation5 + $0x7d0] sm:$0xff]  ;;  %v584_v31 = vld [vmem:[#allocation5 + $0x1d8] sm:$0xff]  ;;  %v774_v11 = vld [vmem:[#allocation5 + $0x7c8] sm:$0xff] }
 0x2cd   :  { %1697 = vmatpush2.msra.mxu1 %v669_v21  ;;  %1742 = vmatpush1.msra.mxu0 %v717_v43  ;;  %v536_v21 = vld [vmem:[#allocation5 + $0x58] sm:$0xff] }
 0x2ce   :  { %1699 = vmatmul.mubr.f32.vlgmr.msra.gmra.mxu1 %v3802_v48  ;;  %1743 = vmatprep.subr.mxu0 %v811_v58  ;;  %v772_v43 = vld [vmem:[#allocation5 + $0x7b8] sm:$0xff]  ;;  %v581_v58 = vld [vmem:[#allocation5 + $0x1c0] sm:$0xff] }
 0x2cf   :  { %2974 = vmatprep.subr.mxu1 %v620_v15  ;;  %1704 = vmatprep.mubr.f32.mxu1 %v3805_v20  ;;  %v771_v15 = vld [vmem:[#allocation5 + $0x7b0] sm:$0xff] }
 0x2d0   :  { %1744 = vmatpush2.msra.mxu0 %v810_v10  ;;  %2975 = vmatpush3.msra.mxu1 %v572_v27  ;;  %v533_v10 = vld [vmem:[#allocation5 + $0x40] sm:$0xff] }
 0x2d1   :  { %1745 = vmatprep.subr.mxu0 %v808_v17  ;;  %2976 = vmatprep.subr.mxu1 %v617_v63  ;;  %v769_v27 = vld [vmem:[#allocation5 + $0x7a0] sm:$0xff]  ;;  %v578_v17 = vld [vmem:[#allocation5 + $0x1a8] sm:$0xff]  ;;  %v768_v63 = vld [vmem:[#allocation5 + $0x798] sm:$0xff] }
 0x2d2   :  { %1746 = vmatpush2.msra.mxu0 %v807_v5  ;;  %2977 = vmatpush3.msra.mxu1 %v569_v22  ;;  %v530_v5 = vld [vmem:[#allocation5 + $0x28] sm:$0xff] }
 0x2d3   :  { %1705 = vmatmul.mubr.f32.gmra.mxu1 %v3808_v28  ;;  %1747 = vmatprep.subr.mxu0 %v805_v23  ;;  %v766_v22 = vld [vmem:[#allocation5 + $0x788] sm:$0xff]  ;;  %v575_v23 = vld [vmem:[#allocation5 + $0x190] sm:$0xff] }
 0x2d4   :  { %2978 = vmatprep.subr.mxu1 %v614_v24  ;;  %1748 = vmatpush2.msra.mxu0 %v804_v14  ;;  %v765_v24 = vld [vmem:[#allocation5 + $0x780] sm:$0xff]  ;;  %v527_v14 = vld [vmem:[#allocation5 + $0x10] sm:$0xff] }
 0x2d5   :  { %2979 = vmatpush3.msra.mxu1 %v566_v25  ;;  %1852 = vmatprep.mubr.f32.mxu1 %v3315_v35  ;;  %v716_v25 = vld [vmem:[#allocation5 + $0x5f8] sm:$0xff]  ;;  %v713_v35 = vld [vmem:[#allocation5 + $0x5e0] sm:$0xff] }
 0x2d6   :  { %1749 = vmatprep.subr.mxu0 %v802_v29  ;;  %2980 = vmatprep.subr.mxu1 %v611_v32  ;;  %v812_v29 = vld [vmem:[#allocation5 + $0x8f8] sm:$0xff] }
 0x2d7   :  { %1750 = vmatpush2.msra.mxu0 %v801_v33  ;;  %2981 = vmatpush3.msra.mxu1 %v563_v34  ;;  %v3811_v32 = vld [vmem:[#allocation17 + $0x20] sm:$0xff] }
 0x2d8   :  { %1751 = vmatprep.subr.mxu0 %v799_v36  ;;  %2982 = vmatprep.subr.mxu1 %v608_v37  ;;  %v668_v33 = vld [vmem:[#allocation5 + $0x478] sm:$0xff]  ;;  %v809_v36 = vld [vmem:[#allocation5 + $0x8e0] sm:$0xff] }
 0x2d9   :  { %1752 = vmatpush2.msra.mxu0 %v798_v38  ;;  %2983 = vmatpush3.msra.mxu1 %v560_v40  ;;  %v764_v34 = vld [vmem:[#allocation5 + $0x778] sm:$0xff]  ;;  %v3815_v37 = vld [vmem:[#allocation17 + $0x88] sm:$0xff] }
 0x2da   :  { %1753 = vmatprep.subr.mxu0 %v796_v42  ;;  %2984 = vmatprep.subr.mxu1 %v605_v44  ;;  %v665_v38 = vld [vmem:[#allocation5 + $0x460] sm:$0xff]  ;;  %v710_v42 = vld [vmem:[#allocation5 + $0x5c8] sm:$0xff] }
 0x2db   :  { %1754 = vmatpush2.msra.mxu0 %v795_v45  ;;  %2985 = vmatpush3.msra.mxu1 %v557_v46  ;;  %v761_v40 = vld [vmem:[#allocation5 + $0x760] sm:$0xff]  ;;  %v662_v44 = vld [vmem:[#allocation5 + $0x448] sm:$0xff] }
 0x2dc   :  { %1755 = vmatprep.subr.mxu0 %v793_v47  ;;  %2986 = vmatprep.subr.mxu1 %v602_v49  ;;  %v3819_v45 = vld [vmem:[#allocation17 + $0x80] sm:$0xff]  ;;  %v758_v46 = vld [vmem:[#allocation5 + $0x748] sm:$0xff]  ;;  %v803_v47 = vld [vmem:[#allocation5 + $0x8b0] sm:$0xff] }
 0x2dd   :  { %1756 = vmatpush2.msra.mxu0 %v792_v50  ;;  %2987 = vmatpush3.msra.mxu1 %v554_v51  ;;  %v3319_v49 = vld [vmem:[#allocation17 + $0x18] sm:$0xff] }
 0x2de   :  { %1757 = vmatprep.subr.mxu0 %v790_v52  ;;  %2988 = vmatprep.subr.mxu1 %v599_v53  ;;  %v659_v50 = vld [vmem:[#allocation5 + $0x430] sm:$0xff]  ;;  %v704_v52 = vld [vmem:[#allocation5 + $0x598] sm:$0xff] }
 0x2df   :  { %1758 = vmatpush2.msra.mxu0 %v789_v54  ;;  %2989 = vmatpush3.msra.mxu1 %v551_v55  ;;  %v755_v51 = vld [vmem:[#allocation5 + $0x730] sm:$0xff]  ;;  %v800_v53 = vld [vmem:[#allocation5 + $0x898] sm:$0xff] }
 0x2e0   :  { %1759 = vmatprep.subr.mxu0 %v787_v56  ;;  %2990 = vmatprep.subr.mxu1 %v596_v57  ;;  %v656_v54 = vld [vmem:[#allocation5 + $0x418] sm:$0xff]  ;;  %v797_v56 = vld [vmem:[#allocation5 + $0x880] sm:$0xff] }
 0x2e1   :  { %1760 = vmatpush2.msra.mxu0 %v786_v59  ;;  %2991 = vmatpush3.msra.mxu1 %v548_v60  ;;  %v752_v55 = vld [vmem:[#allocation5 + $0x718] sm:$0xff]  ;;  %v653_v57 = vld [vmem:[#allocation5 + $0x400] sm:$0xff]  ;;  %v698_v60 = vld [vmem:[#allocation5 + $0x568] sm:$0xff] }
 0x2e2   :  { %1761 = vmatprep.subr.mxu0 %v784_v18  ;;  %2992 = vmatprep.subr.mxu1 %v593_v61  ;;  %v749_v59 = vld [vmem:[#allocation5 + $0x700] sm:$0xff]  ;;  %v794_v18 = vld [vmem:[#allocation5 + $0x868] sm:$0xff] }
 0x2e3   :  { %1762 = vmatpush2.msra.mxu0 %v783_v62  ;;  %2993 = vmatpush3.msra.mxu1 %v545_v0  ;;  %v746_v61 = vld [vmem:[#allocation5 + $0x6e8] sm:$0xff]  ;;  %v695_v62 = vld [vmem:[#allocation5 + $0x550] sm:$0xff] }
 0x2e4   :  { %1763 = vmatprep.subr.mxu0 %v781_v30  ;;  %2994 = vmatprep.subr.mxu1 %v590_v2  ;;  %v791_v0 = vld [vmem:[#allocation5 + $0x850] sm:$0xff] }
 0x2e5   :  { %1764 = vmatpush2.msra.mxu0 %v780_v3  ;;  %2995 = vmatpush3.msra.mxu1 %v542_v4  ;;  %v647_v30 = vld [vmem:[#allocation5 + $0x3d0] sm:$0xff]  ;;  %v692_v3 = vld [vmem:[#allocation5 + $0x538] sm:$0xff] }
 0x2e6   :  { %1765 = vmatprep.subr.mxu0 %v778_v6  ;;  %2996 = vmatprep.subr.mxu1 %v587_v7  ;;  %v743_v2 = vld [vmem:[#allocation5 + $0x6d0] sm:$0xff]  ;;  %v788_v4 = vld [vmem:[#allocation5 + $0x838] sm:$0xff] }
 0x2e7   :  { %1766 = vmatpush2.msra.mxu0 %v777_v19  ;;  %2997 = vmatpush3.msra.mxu1 %v539_v26  ;;  %v644_v6 = vld [vmem:[#allocation5 + $0x3b8] sm:$0xff]  ;;  %v689_v19 = vld [vmem:[#allocation5 + $0x520] sm:$0xff] }
 0x2e8   :  { %1767 = vmatprep.subr.mxu0 %v775_v8  ;;  %2998 = vmatprep.subr.mxu1 %v584_v31  ;;  %v740_v7 = vld [vmem:[#allocation5 + $0x6b8] sm:$0xff]  ;;  %v785_v26 = vld [vmem:[#allocation5 + $0x820] sm:$0xff] }
 0x2e9   :  { %1768 = vmatpush2.msra.mxu0 %v774_v11  ;;  %2999 = vmatpush3.msra.mxu1 %v536_v21  ;;  %v641_v8 = vld [vmem:[#allocation5 + $0x3a0] sm:$0xff]  ;;  %v686_v11 = vld [vmem:[#allocation5 + $0x508] sm:$0xff] }
 0x2ea   :  { %1769 = vmatprep.subr.mxu0 %v772_v43  ;;  %3000 = vmatprep.subr.mxu1 %v581_v58  ;;  %v737_v31 = vld [vmem:[#allocation5 + $0x6a0] sm:$0xff]  ;;  %v782_v21 = vld [vmem:[#allocation5 + $0x808] sm:$0xff] }
 0x2eb   :  { %1770 = vmatpush2.msra.mxu0 %v771_v15  ;;  %3001 = vmatpush3.msra.mxu1 %v533_v10  ;;  %v638_v43 = vld [vmem:[#allocation5 + $0x388] sm:$0xff]  ;;  %v683_v15 = vld [vmem:[#allocation5 + $0x4f0] sm:$0xff] }
 0x2ec   :  { %1771 = vmatprep.subr.mxu0 %v769_v27  ;;  %3002 = vmatprep.subr.mxu1 %v578_v17  ;;  %v734_v58 = vld [vmem:[#allocation5 + $0x688] sm:$0xff]  ;;  %v779_v10 = vld [vmem:[#allocation5 + $0x7f0] sm:$0xff] }
 0x2ed   :  { %1772 = vmatpush2.msra.mxu0 %v768_v63  ;;  %3003 = vmatpush3.msra.mxu1 %v530_v5  ;;  %v635_v27 = vld [vmem:[#allocation5 + $0x370] sm:$0xff]  ;;  %v680_v63 = vld [vmem:[#allocation5 + $0x4d8] sm:$0xff] }
 0x2ee   :  { %1773 = vmatprep.subr.mxu0 %v766_v22  ;;  %3004 = vmatprep.subr.mxu1 %v575_v23  ;;  %v731_v17 = vld [vmem:[#allocation5 + $0x670] sm:$0xff]  ;;  %v776_v5 = vld [vmem:[#allocation5 + $0x7d8] sm:$0xff] }
 0x2ef   :  { %1774 = vmatpush2.msra.mxu0 %v765_v24  ;;  %3005 = vmatpush3.msra.mxu1 %v527_v14  ;;  %v632_v22 = vld [vmem:[#allocation5 + $0x358] sm:$0xff]  ;;  %v677_v24 = vld [vmem:[#allocation5 + $0x4c0] sm:$0xff] }
 0x2f0   :  { %1776 = vmatmul.mubr.f32.vlgmr.msra.gmra.mxu0 %v3811_v32  ;;  %1853 = vmatmul.mubr.f32.vlgmr.msra.gmra.mxu1 %v3790_v9  ;;  %v806_v9 = vld [vmem:[#allocation5 + $0x8c8] sm:$0xff]  ;;  %v728_v23 = vld [vmem:[#allocation5 + $0x658] sm:$0xff]  ;;  %v773_v14 = vld [vmem:[#allocation5 + $0x7c0] sm:$0xff] }
 0x2f1   :  { %3012 = vmatprep.subr.mxu1 %v716_v25  ;;  %3050 = vmatprep.subr.mxu0 %v812_v29  ;;  %v629_v25 = vld [vmem:[#allocation5 + $0x340] sm:$0xff] }
 0x2f2   :  { %1781 = vmatprep.mubr.f32.mxu0 %v3815_v37  ;;  %1857 = vmatprep.mubr.f32.mxu1 %v3793_v12  ;;  %v707_v12 = vld [vmem:[#allocation5 + $0x5b0] sm:$0xff]  ;;  %v725_v29 = vld [vmem:[#allocation5 + $0x640] sm:$0xff] }
 0x2f3   :  { %3013 = vmatpush3.msra.mxu1 %v668_v33  ;;  %3051 = vmatpush3.msra.mxu0 %v764_v34  ;;  %v674_v33 = vld [vmem:[#allocation5 + $0x4a8] sm:$0xff] }
 0x2f4   :  { %3014 = vmatprep.subr.mxu1 %v713_v35  ;;  %3052 = vmatprep.subr.mxu0 %v809_v36  ;;  %v770_v34 = vld [vmem:[#allocation5 + $0x7a8] sm:$0xff] }
 0x2f5   :  { %3015 = vmatpush3.msra.mxu1 %v665_v38  ;;  %3053 = vmatpush3.msra.mxu0 %v761_v40  ;;  %v626_v35 = vld [vmem:[#allocation5 + $0x328] sm:$0xff]  ;;  %v671_v38 = vld [vmem:[#allocation5 + $0x490] sm:$0xff] }
 0x2f6   :  { %1782 = vmatmul.mubr.f32.gmra.mxu0 %v3819_v45  ;;  %1858 = vmatmul.mubr.f32.gmra.mxu1 %v3796_v16  ;;  %v701_v16 = vld [vmem:[#allocation5 + $0x580] sm:$0xff]  ;;  %v722_v36 = vld [vmem:[#allocation5 + $0x628] sm:$0xff]  ;;  %v767_v40 = vld [vmem:[#allocation5 + $0x790] sm:$0xff] }
 0x2f7   :  { %3016 = vmatprep.subr.mxu1 %v710_v42  ;;  %3054 = vmatprep.subr.mxu0 %v806_v9  ;;  %v623_v42 = vld [vmem:[#allocation5 + $0x310] sm:$0xff] }
 0x2f8   :  { %3017 = vmatpush3.msra.mxu1 %v662_v44  ;;  %1927 = vmatprep.mubr.f32.mxu1 %v3319_v49  ;;  %v719_v9 = vld [vmem:[#allocation5 + $0x610] sm:$0xff]  ;;  %v2082_v49 = vld [vmem:[#allocation10 + $0x140] sm:$0xff] }
 0x2f9   :  { %3055 = vmatpush3.msra.mxu0 %v758_v46  ;;  %2002 = vmatprep.mubr.f32.mxu0 %v3799_v13  ;;  %v650_v13 = vld [vmem:[#allocation5 + $0x3e8] sm:$0xff]  ;;  %v2088_v44 = vld [vmem:[#allocation10 + $0x170] sm:$0xff] }
 0x2fa   :  { %3018 = vmatprep.subr.mxu1 %v707_v12  ;;  %3056 = vmatprep.subr.mxu0 %v803_v47  ;;  %v2087_v46 = vld [vmem:[#allocation10 + $0x168] sm:$0xff]  ;;  %v2085_v12 = vld [vmem:[#allocation10 + $0x158] sm:$0xff]  ;;  %v2084_v47 = vld [vmem:[#allocation10 + $0x150] sm:$0xff] }
 0x2fb   :  { %3019 = vmatpush3.msra.mxu1 %v659_v50  ;;  %3057 = vmatpush3.msra.mxu0 %v755_v51  ;;  %v2081_v50 = vld [vmem:[#allocation10 + $0x138] sm:$0xff] }
 0x2fc   :  { %3020 = vmatprep.subr.mxu1 %v704_v52  ;;  %3058 = vmatprep.subr.mxu0 %v800_v53  ;;  %v2073_v51 = vld [vmem:[#allocation10 + $0xf8] sm:$0xff]  ;;  %v2072_v52 = vld [vmem:[#allocation10 + $0xf0] sm:$0xff]  ;;  %v2067_v53 = vld [vmem:[#allocation10 + $0xc8] sm:$0xff] }
 0x2fd   :  { %3021 = vmatpush3.msra.mxu1 %v656_v54  ;;  %3059 = vmatpush3.msra.mxu0 %v752_v55  ;;  %v2066_v54 = vld [vmem:[#allocation10 + $0xc0] sm:$0xff]  ;;  %v2064_v55 = vld [vmem:[#allocation10 + $0xb0] sm:$0xff] }
 0x2fe   :  { %3022 = vmatprep.subr.mxu1 %v701_v16  ;;  %3060 = vmatprep.subr.mxu0 %v797_v56  ;;  %v2063_v16 = vld [vmem:[#allocation10 + $0xa8] sm:$0xff]  ;;  %v2061_v56 = vld [vmem:[#allocation10 + $0x98] sm:$0xff] }
 0x2ff   :  { %3023 = vmatpush3.msra.mxu1 %v653_v57  ;;  %3061 = vmatpush3.msra.mxu0 %v749_v59  ;;  %v2060_v57 = vld [vmem:[#allocation10 + $0x90] sm:$0xff]  ;;  %v2058_v59 = vld [vmem:[#allocation10 + $0x80] sm:$0xff] }
 0x300   :  { %3024 = vmatprep.subr.mxu1 %v698_v60  ;;  %3062 = vmatprep.subr.mxu0 %v794_v18  ;;  %v2057_v60 = vld [vmem:[#allocation10 + $0x78] sm:$0xff]  ;;  %v2055_v18 = vld [vmem:[#allocation10 + $0x68] sm:$0xff] }
 0x301   :  { %3025 = vmatpush3.msra.mxu1 %v650_v13  ;;  %3063 = vmatpush3.msra.mxu0 %v746_v61  ;;  %v2054_v13 = vld [vmem:[#allocation10 + $0x60] sm:$0xff]  ;;  %v2052_v61 = vld [vmem:[#allocation10 + $0x50] sm:$0xff] }
 0x302   :  { %3026 = vmatprep.subr.mxu1 %v695_v62  ;;  %3064 = vmatprep.subr.mxu0 %v791_v0  ;;  %v2051_v62 = vld [vmem:[#allocation10 + $0x48] sm:$0xff]  ;;  %v2049_v0 = vld [vmem:[#allocation10 + $0x38] sm:$0xff] }
 0x303   :  { %3027 = vmatpush3.msra.mxu1 %v647_v30  ;;  %3065 = vmatpush3.msra.mxu0 %v743_v2  ;;  %v2048_v30 = vld [vmem:[#allocation10 + $0x30] sm:$0xff]  ;;  %v2046_v2 = vld [vmem:[#allocation10 + $0x20] sm:$0xff] }
 0x304   :  { %3028 = vmatprep.subr.mxu1 %v692_v3  ;;  %3066 = vmatprep.subr.mxu0 %v788_v4  ;;  %v2045_v3 = vld [vmem:[#allocation10 + $0x18] sm:$0xff]  ;;  %v2043_v4 = vld [vmem:[#allocation10 + $0x8] sm:$0xff] }
 0x305   :  { %3029 = vmatpush3.msra.mxu1 %v644_v6  ;;  %3067 = vmatpush3.msra.mxu0 %v740_v7  ;;  %v2042_v6 = vld [vmem:[#allocation10] sm:$0xff]  ;;  %v2136_v7 = vld [vmem:[#allocation10 + $0x2f0] sm:$0xff] }
 0x306   :  { %3030 = vmatprep.subr.mxu1 %v689_v19  ;;  %3068 = vmatprep.subr.mxu0 %v785_v26  ;;  %v2135_v19 = vld [vmem:[#allocation10 + $0x2e8] sm:$0xff]  ;;  %v2133_v26 = vld [vmem:[#allocation10 + $0x2d8] sm:$0xff] }
 0x307   :  { %3031 = vmatpush3.msra.mxu1 %v641_v8  ;;  %3069 = vmatpush3.msra.mxu0 %v737_v31  ;;  %v2132_v8 = vld [vmem:[#allocation10 + $0x2d0] sm:$0xff]  ;;  %v2130_v31 = vld [vmem:[#allocation10 + $0x2c0] sm:$0xff] }
 0x308   :  { %3032 = vmatprep.subr.mxu1 %v686_v11  ;;  %3070 = vmatprep.subr.mxu0 %v782_v21  ;;  %v2129_v11 = vld [vmem:[#allocation10 + $0x2b8] sm:$0xff]  ;;  %v2127_v21 = vld [vmem:[#allocation10 + $0x2a8] sm:$0xff] }
 0x309   :  { %3033 = vmatpush3.msra.mxu1 %v638_v43  ;;  %3071 = vmatpush3.msra.mxu0 %v734_v58  ;;  %v2126_v43 = vld [vmem:[#allocation10 + $0x2a0] sm:$0xff]  ;;  %v2124_v58 = vld [vmem:[#allocation10 + $0x290] sm:$0xff] }
 0x30a   :  { %3034 = vmatprep.subr.mxu1 %v683_v15  ;;  %3072 = vmatprep.subr.mxu0 %v779_v10  ;;  %v2123_v15 = vld [vmem:[#allocation10 + $0x288] sm:$0xff]  ;;  %v2184_v10 = vld [vmem:[#allocation10 + $0x470] sm:$0xff] }
 0x30b   :  { %3035 = vmatpush3.msra.mxu1 %v635_v27  ;;  %3073 = vmatpush3.msra.mxu0 %v731_v17  ;;  %v2121_v27 = vld [vmem:[#allocation10 + $0x278] sm:$0xff]  ;;  %v2120_v17 = vld [vmem:[#allocation10 + $0x270] sm:$0xff] }
 0x30c   :  { %3036 = vmatprep.subr.mxu1 %v680_v63  ;;  %3074 = vmatprep.subr.mxu0 %v776_v5  ;;  %v2118_v63 = vld [vmem:[#allocation10 + $0x260] sm:$0xff]  ;;  %v2183_v5 = vld [vmem:[#allocation10 + $0x468] sm:$0xff] }
 0x30d   :  { %3037 = vmatpush3.msra.mxu1 %v632_v22  ;;  %3075 = vmatpush3.msra.mxu0 %v728_v23  ;;  %v2181_v22 = vld [vmem:[#allocation10 + $0x458] sm:$0xff]  ;;  %v2180_v23 = vld [vmem:[#allocation10 + $0x450] sm:$0xff] }
 0x30e   :  { %3038 = vmatprep.subr.mxu1 %v677_v24  ;;  %3076 = vmatprep.subr.mxu0 %v773_v14  ;;  %v2178_v24 = vld [vmem:[#allocation10 + $0x440] sm:$0xff]  ;;  %v2117_v14 = vld [vmem:[#allocation10 + $0x258] sm:$0xff] }
 0x30f   :  { %3039 = vmatpush3.msra.mxu1 %v629_v25  ;;  %3077 = vmatpush3.msra.mxu0 %v725_v29  ;;  %v2177_v25 = vld [vmem:[#allocation10 + $0x438] sm:$0xff]  ;;  %v2115_v29 = vld [vmem:[#allocation10 + $0x248] sm:$0xff] }
 0x310   :  { %3040 = vmatprep.subr.mxu1 %v674_v33  ;;  %3078 = vmatprep.subr.mxu0 %v770_v34  ;;  %v2175_v33 = vld [vmem:[#allocation10 + $0x428] sm:$0xff]  ;;  %v2114_v34 = vld [vmem:[#allocation10 + $0x240] sm:$0xff] }
 0x311   :  { %3041 = vmatpush3.msra.mxu1 %v626_v35  ;;  %3079 = vmatpush3.msra.mxu0 %v722_v36  ;;  %v2174_v35 = vld [vmem:[#allocation10 + $0x420] sm:$0xff]  ;;  %v2112_v36 = vld [vmem:[#allocation10 + $0x230] sm:$0xff] }
 0x312   :  { %3042 = vmatprep.subr.mxu1 %v671_v38  ;;  %3080 = vmatprep.subr.mxu0 %v767_v40  ;;  %v2172_v38 = vld [vmem:[#allocation10 + $0x410] sm:$0xff]  ;;  %v2111_v40 = vld [vmem:[#allocation10 + $0x228] sm:$0xff] }
 0x313   :  { %3043 = vmatpush3.msra.mxu1 %v623_v42  ;;  %3081 = vmatpush3.msra.mxu0 %v719_v9  ;;  %v2171_v42 = vld [vmem:[#allocation10 + $0x408] sm:$0xff]  ;;  %v2109_v9 = vld [vmem:[#allocation10 + $0x218] sm:$0xff] }
 0x314   :  { %1928 = vmatmul.mubr.f32.vlgmr.msra.gmra.mxu1 %v3802_v48  ;;  %2003 = vmatmul.mubr.f32.vlgmr.msra.gmra.mxu0 %v3811_v32  ;;  %v2079_v48 = vld [vmem:[#allocation10 + $0x128] sm:$0xff]  ;;  %v2078_v32 = vld [vmem:[#allocation10 + $0x120] sm:$0xff] }
 0x315   :  { %1932 = vmatprep.mubr.f32.mxu1 %v3805_v20  ;;  %2007 = vmatprep.mubr.f32.mxu0 %v3815_v37  ;;  %v2076_v20 = vld [vmem:[#allocation10 + $0x110] sm:$0xff]  ;;  %v2075_v37 = vld [vmem:[#allocation10 + $0x108] sm:$0xff] }
 0x316   :  { %2203 = vmatprep.subr.mxu1 %v2088_v44  ;;  %2280 = vmatprep.subr.mxu0 %v2184_v10  ;;  %v2169_v44 = vld [vmem:[#allocation10 + $0x3f8] sm:$0xff] }
 0x317   :  { %2204 = vmatpush1.msra.mxu1 %v2087_v46  ;;  %2281 = vmatpush1.msra.mxu0 %v2183_v5  ;;  %v2108_v46 = vld [vmem:[#allocation10 + $0x210] sm:$0xff] }
 0x318   :  { %1933 = vmatmul.mubr.f32.gmra.mxu1 %v3808_v28  ;;  %2008 = vmatmul.mubr.f32.gmra.mxu0 %v3819_v45  ;;  %v2070_v28 = vld [vmem:[#allocation10 + $0xe0] sm:$0xff]  ;;  %v2069_v45 = vld [vmem:[#allocation10 + $0xd8] sm:$0xff] }
 0x319   :  { %2205 = vmatprep.subr.mxu1 %v2085_v12  ;;  %2344 = vmatprep.mubr.f32.mxu0 %v3571_v1  ;;  %v2168_v12 = vld [vmem:[#allocation10 + $0x3f0] sm:$0xff] }
 0x31a   :  { %2206 = vmatpush1.msra.mxu1 %v2084_v47  ;;  %2282 = vmatprep.subr.mxu0 %v2181_v22  ;;  %v2106_v47 = vld [vmem:[#allocation10 + $0x200] sm:$0xff] }
 0x31b   :  { %2207 = vmatprep.subr.mxu1 %v2082_v49  ;;  %2283 = vmatpush1.msra.mxu0 %v2180_v23  ;;  %v2166_v49 = vld [vmem:[#allocation10 + $0x3e0] sm:$0xff] }
 0x31c   :  { %2208 = vmatpush1.msra.mxu1 %v2081_v50  ;;  %2284 = vmatprep.subr.mxu0 %v2178_v24  ;;  %v2105_v50 = vld [vmem:[#allocation10 + $0x1f8] sm:$0xff] }
 0x31d   :  { %2209 = vmatprep.subr.mxu1 %v2079_v48  ;;  %2285 = vmatpush1.msra.mxu0 %v2177_v25  ;;  %v2165_v48 = vld [vmem:[#allocation10 + $0x3d8] sm:$0xff] }
 0x31e   :  { %2210 = vmatpush1.msra.mxu1 %v2078_v32  ;;  %2286 = vmatprep.subr.mxu0 %v2175_v33  ;;  %v2103_v32 = vld [vmem:[#allocation10 + $0x1e8] sm:$0xff] }
 0x31f   :  { %2211 = vmatprep.subr.mxu1 %v2076_v20  ;;  %2287 = vmatpush1.msra.mxu0 %v2174_v35  ;;  %v2163_v20 = vld [vmem:[#allocation10 + $0x3c8] sm:$0xff] }
 0x320   :  { %2212 = vmatpush1.msra.mxu1 %v2075_v37  ;;  %2288 = vmatprep.subr.mxu0 %v2172_v38  ;;  %v2102_v37 = vld [vmem:[#allocation10 + $0x1e0] sm:$0xff] }
 0x321   :  { %2213 = vmatprep.subr.mxu1 %v2073_v51  ;;  %2289 = vmatpush1.msra.mxu0 %v2171_v42  ;;  %v2162_v51 = vld [vmem:[#allocation10 + $0x3c0] sm:$0xff] }
 0x322   :  { %2214 = vmatpush1.msra.mxu1 %v2072_v52  ;;  %2290 = vmatprep.subr.mxu0 %v2169_v44  ;;  %v2100_v52 = vld [vmem:[#allocation10 + $0x1d0] sm:$0xff] }
 0x323   :  { %2215 = vmatprep.subr.mxu1 %v2070_v28  ;;  %2291 = vmatpush1.msra.mxu0 %v2168_v12  ;;  %v2160_v28 = vld [vmem:[#allocation10 + $0x3b0] sm:$0xff] }
 0x324   :  { %2216 = vmatpush1.msra.mxu1 %v2069_v45  ;;  %2292 = vmatprep.subr.mxu0 %v2166_v49  ;;  %v2099_v45 = vld [vmem:[#allocation10 + $0x1c8] sm:$0xff] }
 0x325   :  { %2217 = vmatprep.subr.mxu1 %v2067_v53  ;;  %2293 = vmatpush1.msra.mxu0 %v2165_v48  ;;  %v2159_v53 = vld [vmem:[#allocation10 + $0x3a8] sm:$0xff] }
 0x326   :  { %2218 = vmatpush1.msra.mxu1 %v2066_v54  ;;  %2294 = vmatprep.subr.mxu0 %v2163_v20  ;;  %v2097_v54 = vld [vmem:[#allocation10 + $0x1b8] sm:$0xff] }
 0x327   :  { %2219 = vmatprep.subr.mxu1 %v2064_v55  ;;  %2295 = vmatpush1.msra.mxu0 %v2162_v51  ;;  %v2157_v55 = vld [vmem:[#allocation10 + $0x398] sm:$0xff] }
 0x328   :  { %2220 = vmatpush1.msra.mxu1 %v2063_v16  ;;  %v2096_v16 = vld [vmem:[#allocation10 + $0x1b0] sm:$0xff]  ;;  %2296 = vmatprep.subr.mxu0 %v2160_v28  ;;  %v3862_v28 = vld [vmem:[#allocation8] sm:$0x7] }
 0x329   :  { %2221 = vmatprep.subr.mxu1 %v2061_v56  ;;  %v2156_v56 = vld [vmem:[#allocation10 + $0x390] sm:$0xff]  ;;  %2297 = vmatpush1.msra.mxu0 %v2159_v53 }
 0x32a   :  { %2222 = vmatpush1.msra.mxu1 %v2060_v57  ;;  %v2094_v57 = vld [vmem:[#allocation10 + $0x1a0] sm:$0xff]  ;;  %2298 = vmatprep.subr.mxu0 %v2157_v55 }
 0x32b   :  { %2223 = vmatprep.subr.mxu1 %v2058_v59  ;;  %v2093_v59 = vld [vmem:[#allocation10 + $0x198] sm:$0xff]  ;;  %2299 = vmatpush1.msra.mxu0 %v2156_v56 }
 0x32c   :  { %2224 = vmatpush1.msra.mxu1 %v2057_v60  ;;  %v2091_v60 = vld [vmem:[#allocation10 + $0x188] sm:$0xff] }
 0x32d   :  { %2225 = vmatprep.subr.mxu1 %v2055_v18  ;;  %v2090_v18 = vld [vmem:[#allocation10 + $0x180] sm:$0xff] }
 0x32e   :  { %2226 = vmatpush1.msra.mxu1 %v2054_v13  ;;  %v2154_v13 = vld [vmem:[#allocation10 + $0x380] sm:$0xff] }
 0x32f   :  { %2227 = vmatprep.subr.mxu1 %v2052_v61  ;;  %v3831_v61 = vld [vmem:[#allocation10 + $0x478] sm:$0xff]  ;;  %2300 = vmatprep.subr.mxu0 %v2154_v13 }
 0x330   :  { %2228 = vmatpush1.msra.mxu1 %v2051_v62  ;;  %v2153_v62 = vld [vmem:[#allocation10 + $0x378] sm:$0xff] }
 0x331   :  { %2229 = vmatprep.subr.mxu1 %v2049_v0  ;;  %2301 = vmatpush1.msra.mxu0 %v2153_v62  ;;  %v2151_v0 = vld [vmem:[#allocation10 + $0x368] sm:$0xff] }
 0x332   :  { %2230 = vmatpush1.msra.mxu1 %v2048_v30  ;;  %2302 = vmatprep.subr.mxu0 %v2151_v0  ;;  %v2150_v30 = vld [vmem:[#allocation10 + $0x360] sm:$0xff] }
 0x333   :  { %2231 = vmatprep.subr.mxu1 %v2046_v2  ;;  %2303 = vmatpush1.msra.mxu0 %v2150_v30  ;;  %v2148_v2 = vld [vmem:[#allocation10 + $0x350] sm:$0xff] }
 0x334   :  { %2232 = vmatpush1.msra.mxu1 %v2045_v3  ;;  %2304 = vmatprep.subr.mxu0 %v2148_v2  ;;  %v2147_v3 = vld [vmem:[#allocation10 + $0x348] sm:$0xff] }
 0x335   :  { %2233 = vmatprep.subr.mxu1 %v2043_v4  ;;  %2305 = vmatpush1.msra.mxu0 %v2147_v3  ;;  %v2145_v4 = vld [vmem:[#allocation10 + $0x338] sm:$0xff] }
 0x336   :  { %2234 = vmatpush1.msra.mxu1 %v2042_v6  ;;  %2306 = vmatprep.subr.mxu0 %v2145_v4  ;;  %v2144_v6 = vld [vmem:[#allocation10 + $0x330] sm:$0xff] }
 0x337   :  { %2235 = vmatprep.subr.mxu1 %v2136_v7  ;;  %2307 = vmatpush1.msra.mxu0 %v2144_v6  ;;  %v2142_v7 = vld [vmem:[#allocation10 + $0x320] sm:$0xff] }
 0x338   :  { %2236 = vmatpush2.msra.mxu1 %v2135_v19  ;;  %2308 = vmatprep.subr.mxu0 %v2142_v7  ;;  %v2141_v19 = vld [vmem:[#allocation10 + $0x318] sm:$0xff] }
 0x339   :  { %2237 = vmatprep.subr.mxu1 %v2133_v26  ;;  %2309 = vmatpush1.msra.mxu0 %v2141_v19  ;;  %v2139_v26 = vld [vmem:[#allocation10 + $0x308] sm:$0xff] }
 0x33a   :  { %2238 = vmatpush2.msra.mxu1 %v2132_v8  ;;  %2310 = vmatprep.subr.mxu0 %v2139_v26  ;;  %v2138_v8 = vld [vmem:[#allocation10 + $0x300] sm:$0xff] }
 0x33b   :  { %2239 = vmatprep.subr.mxu1 %v2130_v31  ;;  %2311 = vmatpush1.msra.mxu0 %v2138_v8  ;;  %v2137_v31 = vld [vmem:[#allocation10 + $0x2f8] sm:$0xff] }
 0x33c   :  { %2240 = vmatpush2.msra.mxu1 %v2129_v11  ;;  %3088 = vmatprep.subr.mxu0 %v2137_v31  ;;  %v1244_v11 = vpop.f32.mrf.mxu0 }
 0x33d   :  { %2241 = vmatprep.subr.mxu1 %v2127_v21 }
 0x33e   :  { %2242 = vmatpush2.msra.mxu1 %v2126_v43  ;;  %v1246_v21 = vpop.f32.mrf.mxu0  ;;  %v1167_v43 = vpop.f32.mrf.mxu1 }
 0x33f   :  { %2243 = vmatprep.subr.mxu1 %v2124_v58  ;;  %v1245_v49 = vadd.f32 %v1244_v11, %v1167_v43 }
 0x340   :  { %2244 = vmatpush2.msra.mxu1 %v2123_v15  ;;  %v1250_v58 = vpop.f32.mrf.mxu0  ;;  %v1169_v15 = vpop.f32.mrf.mxu1 }
 0x341   :  { %2245 = vmatprep.subr.mxu1 %v2121_v27  ;;  %v1247_v48 = vadd.f32 %v1246_v21, %v1169_v15 }
 0x342   :  { %2246 = vmatpush2.msra.mxu1 %v2120_v17  ;;  %v1252_v10 = vpop.f32.mrf.mxu0  ;;  %v1173_v27 = vpop.f32.mrf.mxu1 }
 0x343   :  { %2247 = vmatprep.subr.mxu1 %v2118_v63 }
 0x344   :  { %2248 = vmatpush2.msra.mxu1 %v2117_v14  ;;  %v3834_v17 = vpop.f32.mrf.mxu0  ;;  %v1175_v63 = vpop.f32.mrf.mxu1 }
 0x345   :  { %2249 = vmatprep.subr.mxu1 %v2115_v29  ;;  %v1253_v56 = vadd.f32 %v1252_v10, %v1175_v63  ;;  %v2182_v10 = vld [vmem:[#allocation10 + $0x460] sm:$0xff] }
 0x346   :  { %2250 = vmatpush2.msra.mxu1 %v2114_v34  ;;  %v3836_v5 = vpop.f32.mrf.mxu0  ;;  %v1321_v22 = vpop.f32.mrf.mxu1 }
 0x347   :  { %2251 = vmatprep.subr.mxu1 %v2112_v36 }
 0x348   :  { %2252 = vmatpush2.msra.mxu1 %v2111_v40  ;;  %v3838_v23 = vpop.f32.mrf.mxu0  ;;  %v1323_v24 = vpop.f32.mrf.mxu1 }
 0x349   :  { %2253 = vmatprep.subr.mxu1 %v2109_v9  ;;  %v1324_v51 = vadd.f32 %v1323_v24, %v1247_v48  ;;  %v2158_v48 = vld [vmem:[#allocation10 + $0x3a0] sm:$0xff] }
 0x34a   :  { %2254 = vmatpush2.msra.mxu1 %v2108_v46  ;;  %v3840_v14 = vpop.f32.mrf.mxu0  ;;  %v1327_v29 = vpop.f32.mrf.mxu1 }
 0x34b   :  { %2255 = vmatprep.subr.mxu1 %v2106_v47  ;;  %v3859_v47 = vshrl.u32 %v195_v39, 7 }
 0x34c   :  { %2256 = vmatpush2.msra.mxu1 %v2105_v50  ;;  %v3842_v25 = vpop.f32.mrf.mxu0  ;;  %v1329_v34 = vpop.f32.mrf.mxu1 }
 0x34d   :  { %2257 = vmatprep.subr.mxu1 %v2103_v32  ;;  %v1322_v32 = vadd.f32 %v1321_v22, %v1245_v49  ;;  %v1330_v30 = vadd.f32 %v1329_v34, %v1253_v56  ;;  %v2179_v22 = vld [vmem:[#allocation10 + $0x448] sm:$0xff]  ;;  %v2146_v56 = vld [vmem:[#allocation10 + $0x340] sm:$0xff] }
 0x34e   :  { %2258 = vmatpush2.msra.mxu1 %v2102_v37  ;;  %v3844_v33 = vpop.f32.mrf.mxu0  ;;  %v3846_v35 = vpop.f32.mrf.mxu1  ;;  %v2017_v37 = vsub.s32 0, %v3859_v47 }
 0x34f   :  { %2259 = vmatprep.subr.mxu1 %v2100_v52 }
 0x350   :  { %2260 = vmatpush2.msra.mxu1 %v2099_v45  ;;  %v3848_v36 = vpop.f32.mrf.mxu0  ;;  %v3850_v38 = vpop.f32.mrf.mxu1  ;;  %v2021_v45 = vsub.s32 1, %v3859_v47 }
 0x351   :  { %2261 = vmatprep.subr.mxu1 %v2097_v54  ;;  %v1251_v54 = vadd.f32 %v1250_v58, %v1173_v27 }
 0x352   :  { %2262 = vmatpush2.msra.mxu1 %v2096_v16  ;;  %v3852_v40 = vpop.f32.mrf.mxu0  ;;  %v3854_v42 = vpop.f32.mrf.mxu1  ;;  %v2022_v62 = vrot.slane %v3862_v28, %v2021_v45 }
 0x353   :  { %2263 = vmatprep.subr.mxu1 %v2094_v57 }
 0x354   :  { %2264 = vmatpush2.msra.mxu1 %v2093_v59  ;;  %v3856_v44 = vpop.f32.mrf.mxu1  ;;  %v2018_v59 = vrot.slane %v3862_v28, %v2017_v37 }
 0x355   :  { %2265 = vmatprep.subr.mxu1 %v2091_v60  ;;  %v1328_v60 = vadd.f32 %v1327_v29, %v1251_v54  ;;  %v2176_v29 = vld [vmem:[#allocation10 + $0x430] sm:$0xff]  ;;  %v2149_v54 = vld [vmem:[#allocation10 + $0x358] sm:$0xff] }
 0x356   :  { %2266 = vmatpush2.msra.mxu1 %v2090_v18 }
 0x357   :  { %3200 = vmatprep.subr.mxu1 %v3831_v61 }
 0x36c   :  { %v1623_v9 = vpop.f32.mrf.mxu0 }
 0x36d   :  { %v1624_v52 = vadd.f32 %v1623_v9, %v1322_v32  ;;  %v2173_v9 = vld [vmem:[#allocation10 + $0x418] sm:$0xff] }
 0x36e   :  { %v1625_v46 = vpop.f32.mrf.mxu0 }
 0x36f   :  { %v1626_v55 = vadd.f32 %v1625_v46, %v1324_v51  ;;  %v2167_v46 = vld [vmem:[#allocation10 + $0x3e8] sm:$0xff]  ;;  %v2152_v51 = vld [vmem:[#allocation10 + $0x370] sm:$0xff] }
 0x371   :  { %v1629_v50 = vpop.f32.mrf.mxu0 }
 0x372   :  { %v1630_v2 = vadd.f32 %v1629_v50, %v1328_v60  ;;  %v2161_v50 = vld [vmem:[#allocation10 + $0x3b8] sm:$0xff] }
 0x373   :  { %v1631_v53 = vpop.f32.mrf.mxu0 }
 0x374   :  { %v1632_v7 = vadd.f32 %v1631_v53, %v1330_v30  ;;  %v2932_v53 = vadd.f32 %v3844_v33, %v3842_v25  ;;  %v2143_v25 = vld [vmem:[#allocation10 + $0x328] sm:$0xff] }
 0x38e   :  { %v1700_v12 = vpop.f32.mrf.mxu1 }
 0x38f   :  { %v1701_v16 = vadd.f32 %v1700_v12, %v1624_v52  ;;  %v2164_v12 = vld [vmem:[#allocation10 + $0x3d0] sm:$0xff] }
 0x390   :  { %v1702_v20 = vpop.f32.mrf.mxu1 }
 0x391   :  { %v1703_v18 = vadd.f32 %v1702_v20, %v1626_v55  ;;  %v2155_v20 = vld [vmem:[#allocation10 + $0x388] sm:$0xff]  ;;  %v2894_v55 = vadd.f32 %v3836_v5, %v3834_v17  ;;  %v2897_v17 = vadd.f32 %v3840_v14, %v3838_v23 }
 0x393   :  { %v1706_v39 = vpop.f32.mrf.mxu1 }
 0x394   :  { %v1707_v19 = vadd.f32 %v1706_v39, %v1630_v2 }
 0x395   :  { %v1708_v4 = vpop.f32.mrf.mxu1 }
 0x396   :  { %v1709_v31 = vadd.f32 %v1708_v4, %v1632_v7 }
 0x3b0   :  { %v1777_v57 = vpop.f32.mrf.mxu0  ;;  %v3006_v49 = vpop.f32.mrf.mxu1 }
 0x3b1   :  { %v1778_v13 = vadd.f32 %v1777_v57, %v1701_v16  ;;  %v2970_v16 = vadd.f32 %v3850_v38, %v3846_v35  ;;  %v1474_v57 = vadd.f32 %v2932_v53, %v2894_v55  ;;  %v2973_v35 = vadd.f32 %v3856_v44, %v3854_v42  ;;  %v2074_v53 = vld [vmem:[#allocation10 + $0x100] sm:$0xff]  ;;  %v2071_v55 = vld [vmem:[#allocation10 + $0xe8] sm:$0xff] }
 0x3b2   :  { %v1779_v0 = vpop.f32.mrf.mxu0  ;;  %v3007_v32 = vpop.f32.mrf.mxu1  ;;  %v2025_v38 = vsub.s32 2, %v3859_v47 }
 0x3b3   :  { %v1780_v3 = vadd.f32 %v1779_v0, %v1703_v18  ;;  %v3871_v6 = vadd.f32 %v2018_v59, %v1778_v13  ;;  %v3008_v60 = vadd.f32 %v3007_v32, %v3006_v49  ;;  %v1549_v5 = vadd.f32 %v2970_v16, %v1474_v57  ;;  %v2140_v13 = vld [vmem:[#allocation10 + $0x310] sm:$0xff]  ;;  %v2065_v57 = vld [vmem:[#allocation10 + $0xb8] sm:$0xff] }
 0x3b4   :  { %v2026_v42 = vrot.slane %v3862_v28, %v2025_v38  ;;  %v2131_v28 = vld [vmem:[#allocation10 + $0x2c8] sm:$0xff]  ;;  %v2080_v32 = vld [vmem:[#allocation10 + $0x130] sm:$0xff] }
 0x3b5   :  { %v3873_v26 = vadd.f32 %v2022_v62, %v1780_v3  ;;  %v2036_v43 = vmax.f32 %v3871_v6, 0.0  ;;  %v2116_v16 = vld [vmem:[#allocation10 + $0x250] sm:$0xff]  ;;  %v2525_v6 = vld [vmem:[#allocation13 + $0x60] sm:$0xff] }
 0x3b6   :  { %v1783_v8 = vpop.f32.mrf.mxu0  ;;  %v3009_v52 = vpop.f32.mrf.mxu1 }
 0x3b7   :  { %v2037_v11 = vmax.f32 %v3873_v26, 0.0  ;;  %v1784_v21 = vadd.f32 %v1783_v8, %v1707_v19  ;;  %v2110_v26 = vld [vmem:[#allocation10 + $0x220] sm:$0xff] }
 0x3b8   :  { %v1785_v58 = vpop.f32.mrf.mxu0  ;;  %v3010_v39 = vpop.f32.mrf.mxu1 }
 0x3b9   :  { %v1786_v15 = vadd.f32 %v1785_v58, %v1709_v31  ;;  %2267 = vmatprep.mubr.f32.mxu1 %v2037_v11  ;;  %v3879_v27 = vadd.f32 %v2018_v59, %v1784_v21  ;;  %v2935_v59 = vadd.f32 %v3852_v40, %v3848_v36  ;;  %v1855_v40 = vadd.f32 %v3008_v60, %v1549_v5  ;;  %v2059_v60 = vld [vmem:[#allocation10 + $0x88] sm:$0xff]  ;;  %v2098_v5 = vld [vmem:[#allocation10 + $0x1c0] sm:$0xff] }
 0x3ba   :  { %2268 = vmatmul.mubr.f32.vlgmr.msra.gmra.mxu1 %v2036_v43  ;;  %v3011_v30 = vadd.f32 %v3010_v39, %v3009_v52  ;;  %v2122_v52 = vld [vmem:[#allocation10 + $0x280] sm:$0xff]  ;;  %v2113_v39 = vld [vmem:[#allocation10 + $0x238] sm:$0xff] }
 0x3bb   :  { %v3883_v63 = vadd.f32 %v2022_v62, %v1786_v15  ;;  %3201 = vmatpush3.msra.mxu1 %v3831_v61  ;;  %v2039_v34 = vmax.f32 %v3879_v27, 0.0  ;;  %v2170_v61 = vld [vmem:[#allocation10 + $0x400] sm:$0xff]  ;;  %v1479_v36 = vadd.f32 %v2935_v59, %v2897_v17  ;;  %v2107_v59 = vld [vmem:[#allocation10 + $0x208] sm:$0xff]  ;;  %v2053_v17 = vld [vmem:[#allocation10 + $0x58] sm:$0xff] }
 0x3bc   :  { %3202 = vmatprep.subr.mxu1 %v2182_v10  ;;  %v2538_v27 = vld [vmem:[#allocation13 + $0xc8] sm:$0xff] }
 0x3bd   :  { %v2040_v24 = vmax.f32 %v3883_v63, 0.0  ;;  %3203 = vmatpush3.msra.mxu1 %v2182_v10  ;;  %v1554_v23 = vadd.f32 %v2973_v35, %v1479_v36  ;;  %v2050_v35 = vld [vmem:[#allocation10 + $0x40] sm:$0xff]  ;;  %v2044_v36 = vld [vmem:[#allocation10 + $0x10] sm:$0xff] }
 0x3be   :  { %3204 = vmatprep.subr.mxu1 %v2179_v22  ;;  %v2524_v63 = vld [vmem:[#allocation13 + $0x58] sm:$0xff] }
 0x3bf   :  { %2273 = vmatprep.mubr.f32.mxu1 %v2040_v24  ;;  %3205 = vmatpush3.msra.mxu1 %v2179_v22  ;;  %v1860_v8 = vadd.f32 %v3011_v30, %v1554_v23  ;;  %v2528_v30 = vld [vmem:[#allocation13 + $0x78] sm:$0xff]  ;;  %v2526_v23 = vld [vmem:[#allocation13 + $0x68] sm:$0xff] }
 0x3c0   :  { %2274 = vmatmul.mubr.f32.gmra.mxu1 %v2039_v34  ;;  %3206 = vmatprep.subr.mxu1 %v2176_v29 }
 0x3c1   :  { %3207 = vmatpush3.msra.mxu1 %v2176_v29 }
 0x3c2   :  { %3208 = vmatprep.subr.mxu1 %v2173_v9 }
 0x3c3   :  { %3209 = vmatpush3.msra.mxu1 %v2173_v9  ;;  %v2089_v9 = vld [vmem:[#allocation10 + $0x178] sm:$0xff] }
 0x3c4   :  { %3210 = vmatprep.subr.mxu1 %v2170_v61 }
 0x3c5   :  { %3211 = vmatpush3.msra.mxu1 %v2170_v61  ;;  %v2134_v61 = vld [vmem:[#allocation10 + $0x2e0] sm:$0xff] }
 0x3c6   :  { %3212 = vmatprep.subr.mxu1 %v2167_v46 }
 0x3c7   :  { %3213 = vmatpush3.msra.mxu1 %v2167_v46  ;;  %v2086_v46 = vld [vmem:[#allocation10 + $0x160] sm:$0xff] }
 0x3c8   :  { %3214 = vmatprep.subr.mxu1 %v2164_v12 }
 0x3c9   :  { %3215 = vmatpush3.msra.mxu1 %v2164_v12 }
 0x3ca   :  { %3216 = vmatprep.subr.mxu1 %v2161_v50 }
 0x3cb   :  { %3217 = vmatpush3.msra.mxu1 %v2161_v50  ;;  %v2083_v50 = vld [vmem:[#allocation10 + $0x148] sm:$0xff] }
 0x3cc   :  { %3218 = vmatprep.subr.mxu1 %v2158_v48 }
 0x3cd   :  { %3219 = vmatpush3.msra.mxu1 %v2158_v48  ;;  %v2128_v48 = vld [vmem:[#allocation10 + $0x2b0] sm:$0xff] }
 0x3ce   :  { %3220 = vmatprep.subr.mxu1 %v2155_v20 }
 0x3cf   :  { %3221 = vmatpush3.msra.mxu1 %v2155_v20  ;;  %v2125_v20 = vld [vmem:[#allocation10 + $0x298] sm:$0xff] }
 0x3d0   :  { %3222 = vmatprep.subr.mxu1 %v2152_v51 }
 0x3d1   :  { %3223 = vmatpush3.msra.mxu1 %v2152_v51  ;;  %v2077_v51 = vld [vmem:[#allocation10 + $0x118] sm:$0xff] }
 0x3d2   :  { %3224 = vmatprep.subr.mxu1 %v2149_v54 }
 0x3d3   :  { %3225 = vmatpush3.msra.mxu1 %v2149_v54  ;;  %v2119_v54 = vld [vmem:[#allocation10 + $0x268] sm:$0xff] }
 0x3d4   :  { %v3044_v33 = vpop.f32.mrf.mxu1  ;;  %v3082_v18 = vpop.f32.mrf.mxu0  ;;  %3226 = vmatprep.subr.mxu1 %v2146_v56 }
 0x3d5   :  { %3227 = vmatpush3.msra.mxu1 %v2146_v56  ;;  %v2068_v56 = vld [vmem:[#allocation10 + $0xd0] sm:$0xff] }
 0x3d6   :  { %v3045_v62 = vpop.f32.mrf.mxu1  ;;  %v3083_v0 = vpop.f32.mrf.mxu0  ;;  %3228 = vmatprep.subr.mxu1 %v2143_v25 }
 0x3d7   :  { %v3046_v2 = vadd.f32 %v3045_v62, %v3044_v33  ;;  %3229 = vmatpush3.msra.mxu1 %v2143_v25  ;;  %v3084_v7 = vadd.f32 %v3083_v0, %v3082_v18  ;;  %v2104_v25 = vld [vmem:[#allocation10 + $0x1f0] sm:$0xff]  ;;  %v2101_v18 = vld [vmem:[#allocation10 + $0x1d8] sm:$0xff]  ;;  %v2047_v62 = vld [vmem:[#allocation10 + $0x28] sm:$0xff] }
 0x3d8   :  { %v3047_v3 = vpop.f32.mrf.mxu1  ;;  %v3085_v4 = vpop.f32.mrf.mxu0  ;;  %3230 = vmatprep.subr.mxu1 %v2140_v13  ;;  %v2056_v33 = vld [vmem:[#allocation10 + $0x70] sm:$0xff] }
 0x3d9   :  { %v1930_v14 = vadd.f32 %v3046_v2, %v1855_v40  ;;  %3231 = vmatpush3.msra.mxu1 %v2140_v13  ;;  %v2095_v13 = vld [vmem:[#allocation10 + $0x1a8] sm:$0xff]  ;;  %v2092_v0 = vld [vmem:[#allocation10 + $0x190] sm:$0xff]  ;;  %v2544_v40 = vld [vmem:[#allocation13 + $0xf8] sm:$0xff] }
 0x3da   :  { %v3048_v44 = vpop.f32.mrf.mxu1  ;;  %v3086_v19 = vpop.f32.mrf.mxu0  ;;  %v2543_v2 = vld [vmem:[#allocation13 + $0xf0] sm:$0xff] }
 0x3db   :  { %v2005_v31 = vadd.f32 %v3084_v7, %v1930_v14  ;;  %v3049_v21 = vadd.f32 %v3048_v44, %v3047_v3  ;;  %v3087_v10 = vadd.f32 %v3086_v19, %v3085_v4  ;;  %v2527_v3 = vld [vmem:[#allocation13 + $0x70] sm:$0xff]  ;;  %v2542_v4 = vld [vmem:[#allocation13 + $0xe8] sm:$0xff]  ;;  %v2541_v14 = vld [vmem:[#allocation13 + $0xe0] sm:$0xff] }
 0x3dc   :  { %v2523_v7 = vld [vmem:[#allocation13 + $0x50] sm:$0xff]  ;;  %v2521_v44 = vld [vmem:[#allocation13 + $0x40] sm:$0xff]  ;;  %v2536_v19 = vld [vmem:[#allocation13 + $0xb8] sm:$0xff] }
 0x3dd   :  { %v2032_v58 = vadd.f32 %v2026_v42, %v2005_v31  ;;  %v1935_v15 = vadd.f32 %v3049_v21, %v1860_v8  ;;  %v2520_v8 = vld [vmem:[#allocation13 + $0x38] sm:$0xff]  ;;  %v2535_v31 = vld [vmem:[#allocation13 + $0xb0] sm:$0xff] }
 0x3de   :  { %v2519_v21 = vld [vmem:[#allocation13 + $0x30] sm:$0xff] }
 0x3df   :  { %v2038_v22 = vmax.f32 %v2032_v58, 0.0  ;;  %v2010_v29 = vadd.f32 %v3087_v10, %v1935_v15  ;;  %v2534_v58 = vld [vmem:[#allocation13 + $0xa8] sm:$0xff]  ;;  %v2533_v10 = vld [vmem:[#allocation13 + $0xa0] sm:$0xff] }
 0x3e0   :  { %v2518_v15 = vld [vmem:[#allocation13 + $0x28] sm:$0xff] }
 0x3e1   :  { %2345 = vmatmul.mubr.f32.vlgmr.msra.gmra.mxu0 %v2038_v22  ;;  %3232 = vmatprep.mubr.f32.mxu1 %v2038_v22  ;;  %v2035_v12 = vadd.f32 %v2026_v42, %v2010_v29  ;;  %v2537_v42 = vld [vmem:[#allocation13 + $0xc0] sm:$0xff]  ;;  %v2532_v29 = vld [vmem:[#allocation13 + $0x98] sm:$0xff] }
 0x3e2   :  { %3089 = vmatpush3.msra.mxu0 %v2089_v9  ;;  %2350 = vmatprep.mubr.f32.mxu0 %v3571_v1  ;;  %v2517_v22 = vld [vmem:[#allocation13 + $0x20] sm:$0xff]  ;;  %v2516_v9 = vld [vmem:[#allocation13 + $0x18] sm:$0xff] }
 0x3e3   :  { %3090 = vmatprep.subr.mxu0 %v2134_v61  ;;  %v2041_v49 = vmax.f32 %v2035_v12, 0.0  ;;  %v2531_v61 = vld [vmem:[#allocation13 + $0x90] sm:$0xff]  ;;  %v2530_v12 = vld [vmem:[#allocation13 + $0x88] sm:$0xff] }
 0x3e4   :  { %3091 = vmatpush3.msra.mxu0 %v2086_v46  ;;  %v2515_v46 = vld [vmem:[#allocation13 + $0x10] sm:$0xff] }
 0x3e5   :  { %3092 = vmatprep.subr.mxu0 %v2131_v28  ;;  %2351 = vmatmul.mubr.f32.gmra.mxu0 %v2041_v49  ;;  %v2514_v28 = vld [vmem:[#allocation13 + $0x8] sm:$0xff] }
 0x3e6   :  { %3093 = vmatpush3.msra.mxu0 %v2083_v50  ;;  %3233 = vmatmul.mubr.f32.vlgmr.msra.gmra.mxu1 %v2041_v49  ;;  %v2529_v49 = vld [vmem:[#allocation13 + $0x80] sm:$0xff] }
 0x3e7   :  { %3094 = vmatprep.subr.mxu0 %v2128_v48  ;;  %2421 = vmatprep.mubr.f32.mxu0 %v2037_v11  ;;  %v2062_v11 = vld [vmem:[#allocation10 + $0xa0] sm:$0xff] }
 0x3e8   :  { %3095 = vmatpush3.msra.mxu0 %v2080_v32  ;;  %v2513_v50 = vld [vmem:[#allocation13] sm:$0xff]  ;;  %v2560_v48 = vld [vmem:[#allocation13 + $0x178] sm:$0xff]  ;;  %v2559_v32 = vld [vmem:[#allocation13 + $0x170] sm:$0xff] }
 0x3e9   :  { %3096 = vmatprep.subr.mxu0 %v2125_v20  ;;  %3235 = vmatprep.subr.mxu1 %v2560_v48  ;;  %v2558_v20 = vld [vmem:[#allocation13 + $0x168] sm:$0xff] }
 0x3ea   :  { %3097 = vmatpush3.msra.mxu0 %v2077_v51  ;;  %3236 = vmatpush3.msra.mxu1 %v2560_v48  ;;  %v2557_v51 = vld [vmem:[#allocation13 + $0x160] sm:$0xff] }
 0x3eb   :  { %3098 = vmatprep.subr.mxu0 %v2122_v52  ;;  %3237 = vmatprep.subr.mxu1 %v2559_v32  ;;  %v2556_v52 = vld [vmem:[#allocation13 + $0x158] sm:$0xff] }
 0x3ec   :  { %3099 = vmatpush3.msra.mxu0 %v2074_v53  ;;  %3238 = vmatpush3.msra.mxu1 %v2559_v32  ;;  %v2555_v53 = vld [vmem:[#allocation13 + $0x150] sm:$0xff] }
 0x3ed   :  { %3100 = vmatprep.subr.mxu0 %v2119_v54  ;;  %3239 = vmatprep.subr.mxu1 %v2558_v20  ;;  %v2554_v54 = vld [vmem:[#allocation13 + $0x148] sm:$0xff] }
 0x3ee   :  { %3101 = vmatpush3.msra.mxu0 %v2071_v55  ;;  %3240 = vmatpush3.msra.mxu1 %v2558_v20  ;;  %v2553_v55 = vld [vmem:[#allocation13 + $0x140] sm:$0xff] }
 0x3ef   :  { %3102 = vmatprep.subr.mxu0 %v2116_v16  ;;  %3241 = vmatprep.subr.mxu1 %v2557_v51  ;;  %v2552_v16 = vld [vmem:[#allocation13 + $0x138] sm:$0xff] }
 0x3f0   :  { %3103 = vmatpush3.msra.mxu0 %v2068_v56  ;;  %3242 = vmatpush3.msra.mxu1 %v2557_v51  ;;  %v2551_v56 = vld [vmem:[#allocation13 + $0x130] sm:$0xff] }
 0x3f1   :  { %3104 = vmatprep.subr.mxu0 %v2113_v39  ;;  %3243 = vmatprep.subr.mxu1 %v2556_v52  ;;  %v2550_v39 = vld [vmem:[#allocation13 + $0x128] sm:$0xff] }
 0x3f2   :  { %3105 = vmatpush3.msra.mxu0 %v2065_v57  ;;  %3244 = vmatpush3.msra.mxu1 %v2556_v52  ;;  %v2549_v57 = vld [vmem:[#allocation13 + $0x120] sm:$0xff] }
 0x3f3   :  { %3106 = vmatprep.subr.mxu0 %v2110_v26  ;;  %3245 = vmatprep.subr.mxu1 %v2555_v53  ;;  %v2548_v26 = vld [vmem:[#allocation13 + $0x118] sm:$0xff] }
 0x3f4   :  { %3107 = vmatpush3.msra.mxu0 %v2062_v11  ;;  %3246 = vmatpush3.msra.mxu1 %v2555_v53  ;;  %v2547_v11 = vld [vmem:[#allocation13 + $0x110] sm:$0xff] }
 0x3f5   :  { %3108 = vmatprep.subr.mxu0 %v2107_v59  ;;  %3247 = vmatprep.subr.mxu1 %v2554_v54  ;;  %v2546_v59 = vld [vmem:[#allocation13 + $0x108] sm:$0xff] }
 0x3f6   :  { %3109 = vmatpush3.msra.mxu0 %v2059_v60  ;;  %3248 = vmatpush3.msra.mxu1 %v2554_v54  ;;  %v2545_v60 = vld [vmem:[#allocation13 + $0x100] sm:$0xff] }
 0x3f7   :  { %3110 = vmatprep.subr.mxu0 %v2104_v25  ;;  %3249 = vmatprep.subr.mxu1 %v2553_v55 }
 0x3f8   :  { %3111 = vmatpush3.msra.mxu0 %v2056_v33  ;;  %3250 = vmatpush3.msra.mxu1 %v2553_v55  ;;  %v2186_v33 = vld [vmem:[#allocation11] sm:$0x7] }
 0x3f9   :  { %3112 = vmatprep.subr.mxu0 %v2101_v18  ;;  %3251 = vmatprep.subr.mxu1 %v2552_v16 }
 0x3fa   :  { %3113 = vmatpush3.msra.mxu0 %v2053_v17  ;;  %3252 = vmatpush3.msra.mxu1 %v2552_v16  ;;  %v2191_v17 = vrot.slane %v2186_v33, %v2017_v37  ;;  %v3320_v16 = vld [vmem:[%s3947_s1 + $0x8] sm:$0xff] }
 0x3fb   :  { %3114 = vmatprep.subr.mxu0 %v2098_v5  ;;  %3253 = vmatprep.subr.mxu1 %v2551_v56  ;;  %v2195_v5 = vrot.slane %v2186_v33, %v2021_v45  ;;  %vm2758_vm8 = vcmp.eq.s32.totalorder %v3320_v16, 1 }
 0x3fc   :  { %3115 = vmatpush3.msra.mxu0 %v2050_v35  ;;  %3254 = vmatpush3.msra.mxu1 %v2551_v56  ;;  %v3321_v56 = vld [vmem:[%s3947_s1] sm:$0xff]  ;;  %s3574_s1 = smov 126  }
 0x3fd   :  { %3116 = vmatprep.subr.mxu0 %v2095_v13  ;;  %3255 = vmatprep.subr.mxu1 %v2550_v39  ;;  %vm2757_vm9 = vcmp.eq.s32.totalorder %v3321_v56, 1 }
 0x3fe   :  { %3117 = vmatpush3.msra.mxu0 %v2047_v62  ;;  %3256 = vmatpush3.msra.mxu1 %v2550_v39 }
 0x3ff   :  { %3118 = vmatprep.subr.mxu0 %v2092_v0  ;;  %3257 = vmatprep.subr.mxu1 %v2549_v57 }
 0x400   :  { %3119 = vmatpush3.msra.mxu0 %v2044_v36  ;;  %3258 = vmatpush3.msra.mxu1 %v2549_v57 }
 0x401   :  { %2422 = vmatmul.mubr.f32.vlgmr.msra.gmra.mxu0 %v2036_v43  ;;  %3144 = vmatprep.subr.mxu0 %v2544_v40  ;;  %v2540_v43 = vld [vmem:[#allocation13 + $0xd8] sm:$0xff] }
 0x402   :  { %2426 = vmatprep.mubr.f32.mxu0 %v2040_v24  ;;  %3145 = vmatpush3.msra.mxu0 %v2528_v30  ;;  %v2539_v24 = vld [vmem:[#allocation13 + $0xd0] sm:$0xff] }
 0x403   :  { %3146 = vmatprep.subr.mxu0 %v2543_v2  ;;  %3259 = vmatprep.subr.mxu1 %v2548_v26 }
 0x404   :  { %3147 = vmatpush3.msra.mxu0 %v2527_v3  ;;  %3260 = vmatpush3.msra.mxu1 %v2548_v26 }
 0x405   :  { %2427 = vmatmul.mubr.f32.gmra.mxu0 %v2039_v34  ;;  %3148 = vmatprep.subr.mxu0 %v2542_v4  ;;  %v2522_v34 = vld [vmem:[#allocation13 + $0x48] sm:$0xff] }
 0x406   :  { %3149 = vmatpush3.msra.mxu0 %v2526_v23  ;;  %3261 = vmatprep.subr.mxu1 %v2547_v11 }
 0x407   :  { %3150 = vmatprep.subr.mxu0 %v2541_v14  ;;  %3262 = vmatpush3.msra.mxu1 %v2547_v11 }
 0x408   :  { %3151 = vmatpush3.msra.mxu0 %v2525_v6  ;;  %3263 = vmatprep.subr.mxu1 %v2546_v59 }
 0x409   :  { %3152 = vmatprep.subr.mxu0 %v2540_v43  ;;  %3264 = vmatpush3.msra.mxu1 %v2546_v59 }
 0x40a   :  { %3153 = vmatpush3.msra.mxu0 %v2524_v63  ;;  %3265 = vmatprep.subr.mxu1 %v2545_v60 }
 0x40b   :  { %3154 = vmatprep.subr.mxu0 %v2539_v24  ;;  %3266 = vmatpush3.msra.mxu1 %v2545_v60 }
 0x40c   :  { %3155 = vmatpush3.msra.mxu0 %v2523_v7 }
 0x40d   :  { %3156 = vmatprep.subr.mxu0 %v2538_v27  ;;  %v2199_v27 = vrot.slane %v2186_v33, %v2025_v38 }
 0x40e   :  { %3157 = vmatpush3.msra.mxu0 %v2522_v34 }
 0x40f   :  { %3158 = vmatprep.subr.mxu0 %v2537_v42 }
 0x410   :  { %3159 = vmatpush3.msra.mxu0 %v2521_v44 }
 0x411   :  { %3160 = vmatprep.subr.mxu0 %v2536_v19 }
 0x412   :  { %3161 = vmatpush3.msra.mxu0 %v2520_v8 }
 0x413   :  { %3162 = vmatprep.subr.mxu0 %v2535_v31 }
 0x414   :  { %3163 = vmatpush3.msra.mxu0 %v2519_v21 }
 0x415   :  { %3164 = vmatprep.subr.mxu0 %v2534_v58 }
 0x416   :  { %3165 = vmatpush3.msra.mxu0 %v2518_v15 }
 0x417   :  { %3166 = vmatprep.subr.mxu0 %v2533_v10 }
 0x418   :  { %3167 = vmatpush3.msra.mxu0 %v2517_v22 }
 0x419   :  { %3168 = vmatprep.subr.mxu0 %v2532_v29 }
 0x41a   :  { %3169 = vmatpush3.msra.mxu0 %v2516_v9 }
 0x41b   :  { %3170 = vmatprep.subr.mxu0 %v2531_v61  ;;  %v3573_v61 = vmov 3  }
 0x41c   :  { %3171 = vmatpush3.msra.mxu0 %v2515_v46  ;;  %3299 = vset.pattern.permute.xlu1 %v3573_v61 }
 0x41d   :  { %3172 = vmatprep.subr.mxu0 %v2530_v12  ;;  %3298 = vset.pattern.permute.xlu0 %v3573_v61 }
 0x41e   :  { %3173 = vmatpush3.msra.mxu0 %v2514_v28 }
 0x41f   :  { %3174 = vmatprep.subr.mxu0 %v2529_v49 }
 0x420   :  { %3175 = vmatpush3.msra.mxu0 %v2513_v50  ;;  %v2857_v50 = vld [vmem:[#allocation14] ss:$0 sm:$0xff] }
 0x47a   :  { %v2269_v25 = vpop.f32.mrf.mxu1 }
 0x47b   :  { %v2270_v13 = vadd.f32 %v2269_v25, %v2191_v17 }
 0x47c   :  { %v2271_v18 = vpop.f32.mrf.mxu1 }
 0x47d   :  { %v2272_v0 = vadd.f32 %v2271_v18, %v2195_v5 }
 0x480   :  { %v2275_v35 = vpop.f32.mrf.mxu1 }
 0x481   :  { %v2276_v3 = vadd.f32 %v2275_v35, %v2191_v17 }
 0x482   :  { %v2277_v36 = vpop.f32.mrf.mxu1 }
 0x483   :  { %v2278_v23 = vadd.f32 %v2277_v36, %v2195_v5 }
 0x4a1   :  { %v2346_v62 = vpop.f32.mrf.mxu0 }
 0x4a2   :  { %v2347_v40 = vadd.f32 %v2346_v62, %v2270_v13 }
 0x4a3   :  { %v2348_v30 = vpop.f32.mrf.mxu0 }
 0x4a4   :  { %v2349_v2 = vadd.f32 %v2348_v30, %v2272_v0  ;;  %v2507_v6 = vmax.f32 %v2347_v40, 0.0 }
 0x4a5   :  { %v2352_v4 = vpop.f32.mrf.mxu0 }
 0x4a6   :  { %v2508_v14 = vmax.f32 %v2349_v2, 0.0  ;;  %v2353_v43 = vadd.f32 %v2352_v4, %v2276_v3  ;;  %v3234_v34 = vpop.f32.mrf.mxu1  ;;  %v2859_v4 = vsel %vm2758_vm8, 1.0, %v3571_v1 }
 0x4a7   :  { %v2354_v63 = vpop.f32.mrf.mxu0 }
 0x4a8   :  { %v2355_v24 = vadd.f32 %v2354_v63, %v2278_v23  ;;  %2632 = vmatprep.mubr.f32.mxu0 %v2508_v14  ;;  %v2510_v45 = vmax.f32 %v2353_v43, 0.0  ;;  %v2498_v31 = vpop.f32.mrf.mxu1 }
 0x4a9   :  { %2633 = vmatmul.mubr.f32.vlgmr.msra.gmra.mxu0 %v2507_v6  ;;  %v2858_v6 = vsel %vm2757_vm9, 1.0, %v3571_v1 }
 0x4aa   :  { %v2511_v37 = vmax.f32 %v2355_v24, 0.0 }
 0x4ac   :  { %2637 = vmatprep.mubr.f32.mxu0 %v2511_v37 }
 0x4ad   :  { %2638 = vmatmul.mubr.f32.gmra.mxu0 %v2510_v45 }
 0x4c1   :  { %v3120_v7 = vpop.f32.mrf.mxu0 }
 0x4c3   :  { %v3121_v42 = vpop.f32.mrf.mxu0 }
 0x4c4   :  { %v3122_v44 = vadd.f32 %v3121_v42, %v3120_v7 }
 0x4c5   :  { %v3123_v19 = vpop.f32.mrf.mxu0 }
 0x4c6   :  { %v2424_v8 = vadd.f32 %v3122_v44, %v2199_v27 }
 0x4c7   :  { %v3124_v21 = vpop.f32.mrf.mxu0 }
 0x4c8   :  { %v3125_v58 = vadd.f32 %v3124_v21, %v3123_v19  ;;  %v2499_v15 = vadd.f32 %v2498_v31, %v2424_v8 }
 0x4ca   :  { %v2429_v10 = vadd.f32 %v3125_v58, %v2199_v27  ;;  %v2509_v22 = vmax.f32 %v2499_v15, 0.0 }
 0x4cc   :  { %v2504_v29 = vadd.f32 %v3234_v34, %v2429_v10  ;;  %3267 = vmatprep.mubr.f32.mxu1 %v2509_v22 }
 0x4ce   :  { %v2512_v9 = vmax.f32 %v2504_v29, 0.0 }
 0x4d0   :  { %3268 = vmatmul.mubr.f32.vlgmr.msra.gmra.mxu1 %v2512_v9 }
 0x569   :  { %v3176_v47 = vpop.f32.mrf.mxu0 }
 0x56b   :  { %v3177_v38 = vpop.f32.mrf.mxu0 }
 0x56c   :  { %v3178_v49 = vadd.f32 %v3177_v38, %v3176_v47 }
 0x56d   :  { %v3179_v46 = vpop.f32.mrf.mxu0 }
 0x56e   :  { %v2635_v51 = vadd.f32 %v3178_v49, %v2857_v50 }
 0x56f   :  { %v3180_v12 = vpop.f32.mrf.mxu0 }
 0x570   :  { %v3181_v28 = vadd.f32 %v3180_v12, %v3179_v46 }
 0x572   :  { %v2640_v48 = vadd.f32 %v3181_v28, %v2857_v50 }
 0x590   :  { %v3269_v32 = vpop.f32.mrf.mxu1 }
 0x591   :  { %v2715_v20 = vadd.f32 %v3269_v32, %v2640_v48 }
 0x592   :  { %v2709_v52 = vpop.f32.mrf.mxu1 }
 0x593   :  { %2719 = vst [vmem:[#allocation16 + $0x8] sm:$0xff] %v2715_v20  ;;  %v2710_v53 = vadd.f32 %v2709_v52, %v2635_v51  ;;  %v2722_v54 = vsel %vm2720_vm5, %v2715_v20, -1e+30 }
 0x594   :  { %2725 = vmax.xlane.f32.xlu0 %v2722_v54 }
 0x595   :  { %2718 = vst [vmem:[#allocation16] sm:$0xff] %v2710_v53  ;;  %v2721_v55 = vsel %vm2720_vm5, %v2710_v53, -1e+30 }
 0x596   :  { %2723 = vmax.xlane.f32.xlu1 %v2721_v55 }
 0x5a7   :  { %2747 = vperm.xlu1 %3299, %v3320_v16  }
 0x5aa   :  { %2744 = vperm.xlu0 %3298, %v3321_v56  }
 0x61d   :  { %v2726_v39 = vpop.xlane.xlu0 %2725 }
 0x61e   :  { %v2728_v57 = vsub.f32 %v2722_v54, %v2726_v39 }
 0x61f   :  { %v2724_v26 = vpop.xlane.xlu1 %2723 }
 0x620   :  { %v2731_v11 = vmul.f32 1.442695, %v2728_v57  ;;  %v2727_v59 = vsub.f32 %v2721_v55, %v2724_v26 }
 0x622   :  { %3300 = vpow2.f32 %v2731_v11  ;;  %v2729_v60 = vmul.f32 1.442695, %v2727_v59 }
 0x623   :  { %v2748_v17 = vpop.permute.xlu1 %2747 }
 0x624   :  { %3302 = vpow2.f32 %v2729_v60  ;;  %vm2750_vm7 = vcmp.eq.s32.totalorder %v3685_v41, %v2748_v17 }
 0x625   :  { %v2745_v33 = vpop.permute.xlu0 %2744  ;;  %v2752_v35 = vsel %vm2750_vm7, %v2715_v20, 0.0 }
 0x626   :  { %vm2749_vm6 = vcmp.eq.s32.totalorder %v3685_v41, %v2745_v33 }
 0x627   :  { %v2751_v5 = vsel %vm2749_vm6, %v2710_v53, 0.0 }
 0x62f   :  { %v3301_v25 = vpop.eup %3300 }
 0x630   :  { %2735 = vadd.xlane.f32.xlu0 %v3301_v25 }
 0x631   :  { %v3303_v18 = vpop.eup %3302 }
 0x632   :  { %2733 = vadd.xlane.f32.xlu1 %v3303_v18 }
 0x636   :  { %2753 = vadd.xlane.f32.xlu1 %v2751_v5 }
 0x63a   :  { %2755 = vadd.xlane.f32.xlu1 %v2752_v35 }
 0x6b9   :  { %v2736_v13 = vpop.xlane.xlu0 %2735 }
 0x6ba   :  { %3304 = vlog2.f32 %v2736_v13 }
 0x6bb   :  { %v2734_v62 = vpop.xlane.xlu1 %2733 }
 0x6bc   :  { %3306 = vlog2.f32 %v2734_v62 }
 0x6bf   :  { %v2754_v0 = vpop.xlane.xlu1 %2753 }
 0x6c3   :  { %v2756_v23 = vpop.xlane.xlu1 %2755 }
 0x6c7   :  { %v3305_v36 = vpop.eup %3304 }
 0x6c8   :  { %v2740_v40 = vmul.f32 0.6931472, %v3305_v36 }
 0x6c9   :  { %v3307_v30 = vpop.eup %3306 }
 0x6ca   :  { %v2738_v2 = vmul.f32 0.6931472, %v3307_v30  ;;  %v2742_v3 = vadd.f32 %v2740_v40, %v2726_v39 }
 0x6cc   :  { %v2741_v14 = vadd.f32 %v2738_v2, %v2724_v26  ;;  %v2764_v41 = vsub.f32 %v2742_v3, %v2756_v23 }
 0x6ce   :  { %v2763_v43 = vsub.f32 %v2741_v14, %v2754_v0  ;;  %v2766_v63 = vmul.f32 %v2859_v4, %v2764_v41 }
 0x6d0   :  { %v2765_v24 = vmul.f32 %v2858_v6, %v2763_v43  ;;  %2771 = vrot.lane.b32.xlu0 %v2766_v63, %s3574_s1 }
 0x6d2   :  { %2769 = vrot.lane.b32.xlu1 %v2765_v24, %s3574_s1 }
 0x742   :  { %v2772_v37 = vpop.permute.xlu0 %2771 }
 0x743   :  { %v2777_v7 = vsel %vm2775_vm10, %v2772_v37, 0.0 }
 0x744   :  { %v2770_v45 = vpop.permute.xlu1 %2769 }
 0x745   :  { %v2776_v27 = vsel %vm2775_vm10, %v2770_v45, 0.0 }
 0x746   :  { %v2778_v34 = vadd.f32 %v2777_v7, %v2776_v27 }
 0x748   :  { %2779 = vadd.xlane.f32.xlu1 %v2778_v34 }
 0x749   :  { %3493 = shalt.err (!%p3490_p2)
}
 0x74a   :  { %s3577_s13 = smov 1536   ;;  %s3578_s2 = smov 96  }
 0x74b   :  { %2814 = dma.vmem_to_hbm [thread:$0]  %s2809_s29, 3072, %s3956_s10, [#allocation18], %s3577_s13, %s3577_s13, %s3578_s2  }
 0x74c   :  { %s3502_s17 = scalar_lea.vmem %s2797_s30, 256  ;;  %p3507_p4 = scmp.lt.s32.totalorder %s2797_s30, %s2797_s30 }
 0x74d   :  { %p3503_p3 = scmp.ne.s32.totalorder %s2797_s30, %s3502_s17  ;;  %p3508_p5 = scmp.lt.s32.totalorder %s3502_s17, %s3502_s17 }
 0x74f   :  { %p3509_p6 = por %p3508_p5, %p3507_p4 }
 0x751   :  { %p3510_p7 = pnand %p3509_p6, %p3503_p3 }
 0x753   :  { %3513 = shalt.err (!%p3510_p7)
}
 0x754   :  { %2802 = dma.vmem_to_hbm [thread:$0]  %s2797_s30, 256, %s3955_s9, [#allocation4], %s3567_s3, %s3567_s3, %s3568_s15   ;;  %vm2789_vm11 = vcmask 0  }
 0x755   :  { %s3579_s10 = smov [#allocation19]  }
 0x756   :  { %s2821_s21 = sshll.u32 %s3579_s10, 4  ;;  %s2822_s21 = int_to_ptr.vmem [resolvable:$true] %s2821_s21 }
 0x757   :  { %s3522_s4 = scalar_lea.vmem %s2822_s21, 16  ;;  %s3526_s19 = scalar_lea.vmem %s2822_s21, 32 }
 0x758   :  { %p3523_p8 = scmp.ne.s32.totalorder %s2822_s21, %s3522_s4  ;;  %p3527_p9 = scmp.lt.s32.totalorder %s2822_s21, %s2822_s21 }
 0x759   :  { %p3528_p10 = scmp.lt.s32.totalorder %s3526_s19, %s3522_s4 }
 0x75b   :  { %p3529_p11 = por %p3528_p10, %p3527_p9 }
 0x75d   :  { %p3530_p12 = pnand %p3529_p11, %p3523_p8 }
 0x7d1   :  { %v2780_v1 = vpop.xlane.xlu1 %2779 }
 0x7d2   :  { %v2781_v42 = vrot.slane %v2780_v1, 4 }
 0x7d4   :  { %v2782_v44 = vadd.f32 %v2781_v42, %v2780_v1 }
 0x7d6   :  { %v2783_v19 = vrot.slane %v2782_v44, 2 }
 0x7d8   :  { %v2784_v8 = vadd.f32 %v2783_v19, %v2782_v44 }
 0x7da   :  { %v2785_v31 = vrot.slane %v2784_v8, 1 }
 0x7dc   :  { %v2786_v21 = vadd.f32 %v2785_v31, %v2784_v8 }
 0x7de   :  { %3270 = vpush %v2786_v21 }
 0x80f   :  { %s3271_s18 = spop %3270 }
 0x810   :  { %v2788_v58 = vstv %s3271_s18 }
 0x811   :  { %2790 = vst.msk [vmem:[#allocation19] sm:$0x1] %vm2789_vm11, %v2788_v58 }
 0x812   :  { %3533 = shalt.err (!%p3530_p12)
}
 0x813   :  { %2824 = dma.vmem_to_hbm [thread:$0]  %s2822_s21, 16, %s3957_s11, [#allocation18]  }
 0x814   :  { %3552 = dma.done.wait [#allocation4], 256  }
 0x815   :  { %3553 = vsyncadd [#allocation4], 4294967040 }
 0x816   :  { %3554 = dma.done.wait [#allocation18], 3088  }
 0x817   :  { %3555 = vsyncadd [#allocation18], 4294964208 }
 0x818   :  { %2834 = vsyncpa [#allocation3], 1 }
 0x819   :  { %2835 = vsyncpa [#allocation6], 1 }
 0x81a   :  { %2836 = vsyncpa [#allocation9], 1 }
 0x81b   :  { %2837 = vsyncpa [#allocation12], 1 }
 0x81c   :  { %2838 = vsyncpa [#allocation15], 1 }
 0x81d   :  { %2839 = vsyncpa [#allocation4], 1 }
 0x81e   :  { %2840 = vsyncpa [#allocation18], 1 }

</bundles_post_ra>
